<compile_context>
chip_gen: v5e
topology: v5e:2x2
jax: 0.10.0
libtpu: 0.0.40
codegen_flags: <defaults>
</compile_context>

<pallas_src>
import functools

import jax
import jax.numpy as jnp
from jax.experimental import pallas as pl
from jax.experimental.pallas import tpu as pltpu

_LANE = 128


def _round_up(x, m):
    return (x + m - 1) // m * m


def _choose_tm(m):
    """M-tile: whole (8-aligned) array when small, else 256-row tiles."""
    m8 = _round_up(max(m, 1), 8)
    return m8 if m8 <= 512 else 256


def _pad_last(x, n):
    pad = n - x.shape[-1]
    return x if pad == 0 else jnp.pad(x, [(0, 0)] * (x.ndim - 1) + [(0, pad)])


# ---------------------------------------------------------------------------
# Pallas kernels
# ---------------------------------------------------------------------------
def _conv_relu_pool_kernel(a00, a01, a10, a11, w_ref, b_ref, o_ref):
    """pooled = relu(max over the 4 pool quadrants of (A_q @ W) + bias)."""
    w = w_ref[...]
    z = jnp.dot(a00[...], w, preferred_element_type=jnp.float32)
    z = jnp.maximum(z, jnp.dot(a01[...], w, preferred_element_type=jnp.float32))
    z = jnp.maximum(z, jnp.dot(a10[...], w, preferred_element_type=jnp.float32))
    z = jnp.maximum(z, jnp.dot(a11[...], w, preferred_element_type=jnp.float32))
    z = jnp.maximum(z + b_ref[...], 0.0)          # f32 bias + ReLU
    o_ref[...] = z.astype(o_ref.dtype)


def _mlp_kernel(x_ref, w1_ref, b1_ref, w2_ref, b2_ref, o_ref):
    """out = relu(x @ W1 + b1) @ W2 + b2 — bf16 operands, f32 accumulate."""
    h = jnp.dot(x_ref[...], w1_ref[...], preferred_element_type=jnp.float32)
    h = jnp.maximum(h + b1_ref[...], 0.0)
    z = jnp.dot(h.astype(w2_ref.dtype), w2_ref[...],
                preferred_element_type=jnp.float32)
    o_ref[...] = (z + b2_ref[...]).astype(o_ref.dtype)


# ---------------------------------------------------------------------------
# Layer wrappers
# ---------------------------------------------------------------------------
def _im2col_pool_quadrants(act, K):
    """act: (B,H,W,C) NHWC.  Returns the 4 quadrant patch matrices of shape
    (B*POH*POW, C*K*K) — row (b,i,j) of quadrant (r,s) is the conv patch at
    output position (2i+r, 2j+s) — plus (POH, POW)."""
    B, H, W, C = act.shape
    OH, OW = H - K + 1, W - K + 1
    POH, POW = OH // 2, OW // 2
    cols = [act[:, kh:kh + OH, kw:kw + OW, :]
            for kh in range(K) for kw in range(K)]
    p = jnp.stack(cols, axis=-1)                       # (B, OH, OW, C, K*K)
    p = p.reshape(B, OH, OW, C * K * K)                # patch order (c, kh, kw)
    quads = [p[:, r:r + 2 * POH:2, s:s + 2 * POW:2, :].reshape(
                 B * POH * POW, C * K * K)
             for r in range(2) for s in range(2)]
    # TODO(synk): at large batch, build the patches inside the kernel via a
    # manual DMA gather to avoid the K*K im2col blow-up in HBM.
    return quads, POH, POW


def conv_relu_pool(act, w_gemm, bias_pad, K):
    """Fused conv(valid, stride 1) + bias + ReLU + 2x2/2 max-pool.
    act: (B,H,W,C); w_gemm: (C*K*K, Npad) bf16; bias_pad: (1, Npad) f32.
    Returns (B, POH, POW, Npad) bf16 (channels >= Cout are exactly zero)."""
    B = act.shape[0]
    quads, POH, POW = _im2col_pool_quadrants(act, K)
    Mp = B * POH * POW
    Kdim = quads[0].shape[1]
    Npad = w_gemm.shape[1]
    TM = _choose_tm(Mp)
    Mpad = _round_up(Mp, TM)
    quads = [jnp.pad(q, ((0, Mpad - Mp), (0, 0))).astype(jnp.bfloat16)
             for q in quads]
    out = pl.pallas_call(
        _conv_relu_pool_kernel,
        out_shape=jax.ShapeDtypeStruct((Mpad, Npad), jnp.bfloat16),
        grid=(Mpad // TM,),
        in_specs=[pl.BlockSpec((TM, Kdim), lambda i: (i, 0))] * 4
        + [pl.BlockSpec((Kdim, Npad), lambda i: (0, 0)),
           pl.BlockSpec((1, Npad), lambda i: (0, 0))],
        out_specs=pl.BlockSpec((TM, Npad), lambda i: (i, 0)),
        compiler_params=pltpu.CompilerParams(
            dimension_semantics=("parallel",)),
    )(*quads, w_gemm, bias_pad)
    return out[:Mp].reshape(B, POH, POW, Npad)


def mlp_head(x, w1, b1, w2, b2):
    """Fused fc1 + ReLU + fc2 (both weight matrices stay resident in VMEM)."""
    M, K1 = x.shape
    N1 = w1.shape[1]
    N2 = w2.shape[1]
    TM = _choose_tm(M)
    Mpad = _round_up(M, TM)
    xp = jnp.pad(x, ((0, Mpad - M), (0, 0))).astype(jnp.bfloat16)
    out = pl.pallas_call(
        _mlp_kernel,
        out_shape=jax.ShapeDtypeStruct((Mpad, N2), jnp.float32),
        grid=(Mpad // TM,),
        in_specs=[pl.BlockSpec((TM, K1), lambda i: (i, 0)),
                  pl.BlockSpec((K1, N1), lambda i: (0, 0)),
                  pl.BlockSpec((1, N1), lambda i: (0, 0)),
                  pl.BlockSpec((N1, N2), lambda i: (0, 0)),
                  pl.BlockSpec((1, N2), lambda i: (0, 0))],
        out_specs=pl.BlockSpec((TM, N2), lambda i: (i, 0)),
        compiler_params=pltpu.CompilerParams(
            dimension_semantics=("parallel",)),
    )(xp, w1, b1, w2, b2)
    return out[:M]


# ---------------------------------------------------------------------------
# One-time parameter repack (hoisted out of the per-forward hot path)
# ---------------------------------------------------------------------------
def prepare_params(params):
    w1, b1 = params["w1"], params["b1"]                # (20,1,5,5), (20,)
    w2, b2 = params["w2"], params["b2"]                # (50,20,5,5), (50,)
    fc1_w, fc1_b = params["fc1_w"], params["fc1_b"]    # (500,800), (500,)
    fc2_w, fc2_b = params["fc2_w"], params["fc2_b"]    # (10,500), (10,)

    c1, cin1, k1, _ = w1.shape
    c2, cin2, k2, _ = w2.shape
    n_hidden, n_feat = fc1_w.shape
    n_out = fc2_w.shape[0]
    side = int(round((n_feat // c2) ** 0.5))           # pooled spatial side (4)

    n1p = _round_up(max(c1, _LANE), _LANE)             # 128
    n2p = _round_up(max(c2, _LANE), _LANE)             # 128
    nhp = _round_up(n_hidden, _LANE)                   # 512
    nop = _round_up(max(n_out, _LANE), _LANE)          # 128

    # conv weights -> (Cin*K*K, Cout_pad) bf16; biases -> (1, Cout_pad) f32
    w1g = _pad_last(w1.reshape(c1, cin1 * k1 * k1).T, n1p).astype(jnp.bfloat16)
    w2g = _pad_last(w2.reshape(c2, cin2 * k2 * k2).T, n2p).astype(jnp.bfloat16)
    b1p = _pad_last(b1.reshape(1, -1), n1p).astype(jnp.float32)
    b2p = _pad_last(b2.reshape(1, -1), n2p).astype(jnp.float32)

    # fc1: rows re-ordered from PyTorch's (c, h, w) flatten to the padded
    # channels-last flatten (h, w, c_pad) produced by the conv2 block.
    wf = fc1_w.reshape(n_hidden, c2, side, side)       # (out, c, h, w)
    wf = jnp.transpose(wf, (2, 3, 1, 0))               # (h, w, c, out)
    wf = jnp.pad(wf, ((0, 0), (0, 0), (0, n2p - c2), (0, nhp - n_hidden)))
    fc1p = wf.reshape(side * side * n2p, nhp).astype(jnp.bfloat16)  # (2048,512)
    fb1 = _pad_last(fc1_b.reshape(1, -1), nhp).astype(jnp.float32)

    # fc2: (in, out) zero-padded to (512, 128)
    fc2p = jnp.pad(fc2_w.T, ((0, nhp - n_hidden), (0, nop - n_out))
                   ).astype(jnp.bfloat16)
    fb2 = _pad_last(fc2_b.reshape(1, -1), nop).astype(jnp.float32)

    prep = dict(w1g=w1g, b1p=b1p, w2g=w2g, b2p=b2p,
                fc1p=fc1p, fb1=fb1, fc2p=fc2p, fb2=fb2)
    meta = dict(c1=c1, k1=k1, k2=k2, n_out=n_out)      # static Python ints
    return prep, meta


# ---------------------------------------------------------------------------
# Forward
# ---------------------------------------------------------------------------
def lenet5_forward(x, prep, *, c1, k1, k2, n_out):
    """x: (B, 1, 28, 28) NCHW (PyTorch convention).  Returns (B, 10) logits."""
    B = x.shape[0]
    act = jnp.transpose(x, (0, 2, 3, 1))                        # NHWC
    a1 = conv_relu_pool(act, prep["w1g"], prep["b1p"], k1)      # (B,12,12,128)
    a1 = a1[..., :c1]                                           # drop zero pad
    a2 = conv_relu_pool(a1, prep["w2g"], prep["b2p"], k2)       # (B,4,4,128)
    flat = a2.reshape(B, -1)                                    # padded NHWC flatten
    out = mlp_head(flat, prep["fc1p"], prep["fb1"],
                   prep["fc2p"], prep["fb2"])                   # (B, 128) f32
    return out[:, :n_out]


def init_params(key):
    ks = jax.random.split(key, 8)
    s = 0.05
    return {
        # PyTorch layouts: conv (Cout, Cin, K, K), linear (out, in)
        "w1": s * jax.random.normal(ks[0], (20, 1, 5, 5), jnp.float32),
        "b1": s * jax.random.normal(ks[1], (20,), jnp.float32),
        "w2": s * jax.random.normal(ks[2], (50, 20, 5, 5), jnp.float32),
        "b2": s * jax.random.normal(ks[3], (50,), jnp.float32),
        "fc1_w": s * jax.random.normal(ks[4], (500, 800), jnp.float32),
        "fc1_b": s * jax.random.normal(ks[5], (500,), jnp.float32),
        "fc2_w": s * jax.random.normal(ks[6], (10, 500), jnp.float32),
        "fc2_b": s * jax.random.normal(ks[7], (10,), jnp.float32),
    }


def lenet5_reference(x, params):
    """Pure-JAX f32 reference of the PyTorch forward (for correctness check)."""
    hp = jax.lax.Precision.HIGHEST

    def conv(x, w, b):
        y = jax.lax.conv_general_dilated(
            x, w, window_strides=(1, 1), padding="VALID",
            dimension_numbers=("NCHW", "OIHW", "NCHW"), precision=hp)
        return jax.nn.relu(y + b.reshape(1, -1, 1, 1))

    def pool(x):
        B, C, H, W = x.shape
        return x.reshape(B, C, H // 2, 2, W // 2, 2).max(axis=(3, 5))

    x = pool(conv(x, params["w1"], params["b1"]))
    x = pool(conv(x, params["w2"], params["b2"]))
    x = x.reshape(x.shape[0], -1)
    x = jax.nn.relu(jnp.dot(x, params["fc1_w"].T, precision=hp) + params["fc1_b"])
    return jnp.dot(x, params["fc2_w"].T, precision=hp) + params["fc2_b"]


# TODO(synk): the low-rank (U S V^T) training machinery (update_step,
# populate_gradients) is training-only; at rank == out_features the forward
# pass equals the dense conv/linear implemented here.

if __name__ == "__main__":
    key = jax.random.PRNGKey(0)
    pkey, xkey = jax.random.split(key)
    params = init_params(pkey)
    prep, meta = prepare_params(params)     # one-time repack, out of hot path
    # MNIST-shaped input (28x28 is required by the 800-wide flatten); batch 2.
    x = jax.random.normal(xkey, (2, 1, 28, 28), jnp.float32)

    fwd = jax.jit(functools.partial(lenet5_forward, **meta))
    out = jax.block_until_ready(fwd(x, prep))
    assert out.shape == (2, 10) and out.dtype == jnp.float32

    ref = lenet5_reference(x, params)
    max_err = jnp.max(jnp.abs(out - ref))
    assert jnp.allclose(out, ref, rtol=2e-2, atol=2e-2), f"max abs err {max_err}"
    print("KERNEL_OK")
</pallas_src>

<mosaic_0001>
module attributes {stable_mosaic.version = 11 : i64} {
  func.func @_conv_relu_pool_kernel(%arg0: i32, %arg1: memref<288x25xbf16, #tpu.memory_space<vmem>>, %arg2: memref<288x25xbf16, #tpu.memory_space<vmem>>, %arg3: memref<288x25xbf16, #tpu.memory_space<vmem>>, %arg4: memref<288x25xbf16, #tpu.memory_space<vmem>>, %arg5: memref<25x128xbf16, #tpu.memory_space<vmem>>, %arg6: memref<1x128xf32, #tpu.memory_space<vmem>>, %arg7: memref<288x128xbf16, #tpu.memory_space<vmem>>) attributes {dimension_semantics = [#tpu.dimension_semantics<parallel>], iteration_bounds = array<i64: 1>, scalar_prefetch = 0 : i64, scratch_operands = 0 : i64, tpu.core_type = #tpu.core_type<tc>, window_params = [{transform_indices = @transform_0, window_bounds = array<i64: 288, 25>}, {transform_indices = @transform_1, window_bounds = array<i64: 288, 25>}, {transform_indices = @transform_2, window_bounds = array<i64: 288, 25>}, {transform_indices = @transform_3, window_bounds = array<i64: 288, 25>}, {pipeline_mode = #tpu.pipeline_mode<synchronous>, transform_indices = @transform_4, window_bounds = array<i64: 25, 128>}, {pipeline_mode = #tpu.pipeline_mode<synchronous>, transform_indices = @transform_5, window_bounds = array<i64: 1, 128>}, {transform_indices = @transform_6, window_bounds = array<i64: 288, 128>}]} {
    %c0 = arith.constant 0 : index
    %c0_0 = arith.constant 0 : index
    %0 = vector.load %arg5[%c0, %c0_0] : memref<25x128xbf16, #tpu.memory_space<vmem>>, vector<25x128xbf16>
    %c0_1 = arith.constant 0 : index
    %c0_2 = arith.constant 0 : index
    %1 = vector.load %arg1[%c0_1, %c0_2] : memref<288x25xbf16, #tpu.memory_space<vmem>>, vector<288x25xbf16>
    %cst = arith.constant dense<0.000000e+00> : vector<288x128xf32>
    %2 = tpu.matmul %1, %0, %cst {dimension_numbers = #tpu.dot_dimension_numbers<[1], [0], [0], [1], [0, 0, 1, 1], [], []>} : vector<288x25xbf16>, vector<25x128xbf16>, vector<288x128xf32> -> vector<288x128xf32>
    %c0_3 = arith.constant 0 : index
    %c0_4 = arith.constant 0 : index
    %3 = vector.load %arg2[%c0_3, %c0_4] : memref<288x25xbf16, #tpu.memory_space<vmem>>, vector<288x25xbf16>
    %cst_5 = arith.constant dense<0.000000e+00> : vector<288x128xf32>
    %4 = tpu.matmul %3, %0, %cst_5 {dimension_numbers = #tpu.dot_dimension_numbers<[1], [0], [0], [1], [0, 0, 1, 1], [], []>} : vector<288x25xbf16>, vector<25x128xbf16>, vector<288x128xf32> -> vector<288x128xf32>
    %5 = arith.maximumf %2, %4 : vector<288x128xf32>
    %c0_6 = arith.constant 0 : index
    %c0_7 = arith.constant 0 : index
    %6 = vector.load %arg3[%c0_6, %c0_7] : memref<288x25xbf16, #tpu.memory_space<vmem>>, vector<288x25xbf16>
    %cst_8 = arith.constant dense<0.000000e+00> : vector<288x128xf32>
    %7 = tpu.matmul %6, %0, %cst_8 {dimension_numbers = #tpu.dot_dimension_numbers<[1], [0], [0], [1], [0, 0, 1, 1], [], []>} : vector<288x25xbf16>, vector<25x128xbf16>, vector<288x128xf32> -> vector<288x128xf32>
    %8 = arith.maximumf %5, %7 : vector<288x128xf32>
    %c0_9 = arith.constant 0 : index
    %c0_10 = arith.constant 0 : index
    %9 = vector.load %arg4[%c0_9, %c0_10] : memref<288x25xbf16, #tpu.memory_space<vmem>>, vector<288x25xbf16>
    %cst_11 = arith.constant dense<0.000000e+00> : vector<288x128xf32>
    %10 = tpu.matmul %9, %0, %cst_11 {dimension_numbers = #tpu.dot_dimension_numbers<[1], [0], [0], [1], [0, 0, 1, 1], [], []>} : vector<288x25xbf16>, vector<25x128xbf16>, vector<288x128xf32> -> vector<288x128xf32>
    %11 = arith.maximumf %8, %10 : vector<288x128xf32>
    %c0_12 = arith.constant 0 : index
    %c0_13 = arith.constant 0 : index
    %12 = vector.load %arg6[%c0_12, %c0_13] : memref<1x128xf32, #tpu.memory_space<vmem>>, vector<1x128xf32>
    %13 = vector.broadcast %12 : vector<1x128xf32> to vector<288x128xf32>
    %14 = arith.addf %11, %13 : vector<288x128xf32>
    %cst_14 = arith.constant 0.000000e+00 : f32
    %15 = vector.broadcast %cst_14 : f32 to vector<288x128xf32>
    %16 = arith.maximumf %14, %15 : vector<288x128xf32>
    %17 = arith.truncf %16 : vector<288x128xf32> to vector<288x128xbf16>
    %c0_15 = arith.constant 0 : index
    %c0_16 = arith.constant 0 : index
    %18 = vector.load %arg7[%c0_15, %c0_16] : memref<288x128xbf16, #tpu.memory_space<vmem>>, vector<288x128xbf16>
    tpu.vector_store %arg7[%c0_15, %c0_16], %17 {strides = array<i32>} : memref<288x128xbf16, #tpu.memory_space<vmem>>, vector<288x128xbf16>,
    return
  }
  func.func @transform_0(%arg0: i32) -> (i32, i32) {
    %c0_i32 = arith.constant 0 : i32
    %c0_i32_0 = arith.constant 0 : i32
    return %arg0, %c0_i32 : i32, i32
  }
  func.func @transform_1(%arg0: i32) -> (i32, i32) {
    %c0_i32 = arith.constant 0 : i32
    %c0_i32_0 = arith.constant 0 : i32
    return %arg0, %c0_i32 : i32, i32
  }
  func.func @transform_2(%arg0: i32) -> (i32, i32) {
    %c0_i32 = arith.constant 0 : i32
    %c0_i32_0 = arith.constant 0 : i32
    return %arg0, %c0_i32 : i32, i32
  }
  func.func @transform_3(%arg0: i32) -> (i32, i32) {
    %c0_i32 = arith.constant 0 : i32
    %c0_i32_0 = arith.constant 0 : i32
    return %arg0, %c0_i32 : i32, i32
  }
  func.func @transform_4(%arg0: i32) -> (i32, i32) {
    %c0_i32 = arith.constant 0 : i32
    %c0_i32_0 = arith.constant 0 : i32
    %c0_i32_1 = arith.constant 0 : i32
    return %c0_i32, %c0_i32_0 : i32, i32
  }
  func.func @transform_5(%arg0: i32) -> (i32, i32) {
    %c0_i32 = arith.constant 0 : i32
    %c0_i32_0 = arith.constant 0 : i32
    %c0_i32_1 = arith.constant 0 : i32
    return %c0_i32, %c0_i32_0 : i32, i32
  }
  func.func @transform_6(%arg0: i32) -> (i32, i32) {
    %c0_i32 = arith.constant 0 : i32
    %c0_i32_0 = arith.constant 0 : i32
    return %arg0, %c0_i32 : i32, i32
  }
}

module attributes {stable_mosaic.version = 11 : i64} {
  func.func @_conv_relu_pool_kernel(%arg0: i32, %arg1: memref<32x500xbf16, #tpu.memory_space<vmem>>, %arg2: memref<32x500xbf16, #tpu.memory_space<vmem>>, %arg3: memref<32x500xbf16, #tpu.memory_space<vmem>>, %arg4: memref<32x500xbf16, #tpu.memory_space<vmem>>, %arg5: memref<500x128xbf16, #tpu.memory_space<vmem>>, %arg6: memref<1x128xf32, #tpu.memory_space<vmem>>, %arg7: memref<32x128xbf16, #tpu.memory_space<vmem>>) attributes {dimension_semantics = [#tpu.dimension_semantics<parallel>], iteration_bounds = array<i64: 1>, scalar_prefetch = 0 : i64, scratch_operands = 0 : i64, tpu.core_type = #tpu.core_type<tc>, window_params = [{transform_indices = @transform_0, window_bounds = array<i64: 32, 500>}, {transform_indices = @transform_1, window_bounds = array<i64: 32, 500>}, {transform_indices = @transform_2, window_bounds = array<i64: 32, 500>}, {transform_indices = @transform_3, window_bounds = array<i64: 32, 500>}, {pipeline_mode = #tpu.pipeline_mode<synchronous>, transform_indices = @transform_4, window_bounds = array<i64: 500, 128>}, {pipeline_mode = #tpu.pipeline_mode<synchronous>, transform_indices = @transform_5, window_bounds = array<i64: 1, 128>}, {transform_indices = @transform_6, window_bounds = array<i64: 32, 128>}]} {
    %c0 = arith.constant 0 : index
    %c0_0 = arith.constant 0 : index
    %0 = vector.load %arg5[%c0, %c0_0] : memref<500x128xbf16, #tpu.memory_space<vmem>>, vector<500x128xbf16>
    %c0_1 = arith.constant 0 : index
    %c0_2 = arith.constant 0 : index
    %1 = vector.load %arg1[%c0_1, %c0_2] : memref<32x500xbf16, #tpu.memory_space<vmem>>, vector<32x500xbf16>
    %cst = arith.constant dense<0.000000e+00> : vector<32x128xf32>
    %2 = tpu.matmul %1, %0, %cst {dimension_numbers = #tpu.dot_dimension_numbers<[1], [0], [0], [1], [0, 0, 1, 1], [], []>} : vector<32x500xbf16>, vector<500x128xbf16>, vector<32x128xf32> -> vector<32x128xf32>
    %c0_3 = arith.constant 0 : index
    %c0_4 = arith.constant 0 : index
    %3 = vector.load %arg2[%c0_3, %c0_4] : memref<32x500xbf16, #tpu.memory_space<vmem>>, vector<32x500xbf16>
    %cst_5 = arith.constant dense<0.000000e+00> : vector<32x128xf32>
    %4 = tpu.matmul %3, %0, %cst_5 {dimension_numbers = #tpu.dot_dimension_numbers<[1], [0], [0], [1], [0, 0, 1, 1], [], []>} : vector<32x500xbf16>, vector<500x128xbf16>, vector<32x128xf32> -> vector<32x128xf32>
    %5 = arith.maximumf %2, %4 : vector<32x128xf32>
    %c0_6 = arith.constant 0 : index
    %c0_7 = arith.constant 0 : index
    %6 = vector.load %arg3[%c0_6, %c0_7] : memref<32x500xbf16, #tpu.memory_space<vmem>>, vector<32x500xbf16>
    %cst_8 = arith.constant dense<0.000000e+00> : vector<32x128xf32>
    %7 = tpu.matmul %6, %0, %cst_8 {dimension_numbers = #tpu.dot_dimension_numbers<[1], [0], [0], [1], [0, 0, 1, 1], [], []>} : vector<32x500xbf16>, vector<500x128xbf16>, vector<32x128xf32> -> vector<32x128xf32>
    %8 = arith.maximumf %5, %7 : vector<32x128xf32>
    %c0_9 = arith.constant 0 : index
    %c0_10 = arith.constant 0 : index
    %9 = vector.load %arg4[%c0_9, %c0_10] : memref<32x500xbf16, #tpu.memory_space<vmem>>, vector<32x500xbf16>
    %cst_11 = arith.constant dense<0.000000e+00> : vector<32x128xf32>
    %10 = tpu.matmul %9, %0, %cst_11 {dimension_numbers = #tpu.dot_dimension_numbers<[1], [0], [0], [1], [0, 0, 1, 1], [], []>} : vector<32x500xbf16>, vector<500x128xbf16>, vector<32x128xf32> -> vector<32x128xf32>
    %11 = arith.maximumf %8, %10 : vector<32x128xf32>
    %c0_12 = arith.constant 0 : index
    %c0_13 = arith.constant 0 : index
    %12 = vector.load %arg6[%c0_12, %c0_13] : memref<1x128xf32, #tpu.memory_space<vmem>>, vector<1x128xf32>
    %13 = vector.broadcast %12 : vector<1x128xf32> to vector<32x128xf32>
    %14 = arith.addf %11, %13 : vector<32x128xf32>
    %cst_14 = arith.constant 0.000000e+00 : f32
    %15 = vector.broadcast %cst_14 : f32 to vector<32x128xf32>
    %16 = arith.maximumf %14, %15 : vector<32x128xf32>
    %17 = arith.truncf %16 : vector<32x128xf32> to vector<32x128xbf16>
    %c0_15 = arith.constant 0 : index
    %c0_16 = arith.constant 0 : index
    %18 = vector.load %arg7[%c0_15, %c0_16] : memref<32x128xbf16, #tpu.memory_space<vmem>>, vector<32x128xbf16>
    tpu.vector_store %arg7[%c0_15, %c0_16], %17 {strides = array<i32>} : memref<32x128xbf16, #tpu.memory_space<vmem>>, vector<32x128xbf16>,
    return
  }
  func.func @transform_0(%arg0: i32) -> (i32, i32) {
    %c0_i32 = arith.constant 0 : i32
    %c0_i32_0 = arith.constant 0 : i32
    return %arg0, %c0_i32 : i32, i32
  }
  func.func @transform_1(%arg0: i32) -> (i32, i32) {
    %c0_i32 = arith.constant 0 : i32
    %c0_i32_0 = arith.constant 0 : i32
    return %arg0, %c0_i32 : i32, i32
  }
  func.func @transform_2(%arg0: i32) -> (i32, i32) {
    %c0_i32 = arith.constant 0 : i32
    %c0_i32_0 = arith.constant 0 : i32
    return %arg0, %c0_i32 : i32, i32
  }
  func.func @transform_3(%arg0: i32) -> (i32, i32) {
    %c0_i32 = arith.constant 0 : i32
    %c0_i32_0 = arith.constant 0 : i32
    return %arg0, %c0_i32 : i32, i32
  }
  func.func @transform_4(%arg0: i32) -> (i32, i32) {
    %c0_i32 = arith.constant 0 : i32
    %c0_i32_0 = arith.constant 0 : i32
    %c0_i32_1 = arith.constant 0 : i32
    return %c0_i32, %c0_i32_0 : i32, i32
  }
  func.func @transform_5(%arg0: i32) -> (i32, i32) {
    %c0_i32 = arith.constant 0 : i32
    %c0_i32_0 = arith.constant 0 : i32
    %c0_i32_1 = arith.constant 0 : i32
    return %c0_i32, %c0_i32_0 : i32, i32
  }
  func.func @transform_6(%arg0: i32) -> (i32, i32) {
    %c0_i32 = arith.constant 0 : i32
    %c0_i32_0 = arith.constant 0 : i32
    return %arg0, %c0_i32 : i32, i32
  }
}

module attributes {stable_mosaic.version = 11 : i64} {
  func.func @_mlp_kernel(%arg0: i32, %arg1: memref<8x2048xbf16, #tpu.memory_space<vmem>>, %arg2: memref<2048x512xbf16, #tpu.memory_space<vmem>>, %arg3: memref<1x512xf32, #tpu.memory_space<vmem>>, %arg4: memref<512x128xbf16, #tpu.memory_space<vmem>>, %arg5: memref<1x128xf32, #tpu.memory_space<vmem>>, %arg6: memref<8x128xf32, #tpu.memory_space<vmem>>) attributes {dimension_semantics = [#tpu.dimension_semantics<parallel>], iteration_bounds = array<i64: 1>, scalar_prefetch = 0 : i64, scratch_operands = 0 : i64, tpu.core_type = #tpu.core_type<tc>, window_params = [{transform_indices = @transform_0, window_bounds = array<i64: 8, 2048>}, {pipeline_mode = #tpu.pipeline_mode<synchronous>, transform_indices = @transform_1, window_bounds = array<i64: 2048, 512>}, {pipeline_mode = #tpu.pipeline_mode<synchronous>, transform_indices = @transform_2, window_bounds = array<i64: 1, 512>}, {pipeline_mode = #tpu.pipeline_mode<synchronous>, transform_indices = @transform_3, window_bounds = array<i64: 512, 128>}, {pipeline_mode = #tpu.pipeline_mode<synchronous>, transform_indices = @transform_4, window_bounds = array<i64: 1, 128>}, {transform_indices = @transform_5, window_bounds = array<i64: 8, 128>}]} {
    %c0 = arith.constant 0 : index
    %c0_0 = arith.constant 0 : index
    %0 = vector.load %arg1[%c0, %c0_0] : memref<8x2048xbf16, #tpu.memory_space<vmem>>, vector<8x2048xbf16>
    %c0_1 = arith.constant 0 : index
    %c0_2 = arith.constant 0 : index
    %1 = vector.load %arg2[%c0_1, %c0_2] : memref<2048x512xbf16, #tpu.memory_space<vmem>>, vector<2048x512xbf16>
    %cst = arith.constant dense<0.000000e+00> : vector<8x512xf32>
    %2 = tpu.matmul %0, %1, %cst {dimension_numbers = #tpu.dot_dimension_numbers<[1], [0], [0], [1], [0, 0, 1, 1], [], []>} : vector<8x2048xbf16>, vector<2048x512xbf16>, vector<8x512xf32> -> vector<8x512xf32>
    %c0_3 = arith.constant 0 : index
    %c0_4 = arith.constant 0 : index
    %3 = vector.load %arg3[%c0_3, %c0_4] : memref<1x512xf32, #tpu.memory_space<vmem>>, vector<1x512xf32>
    %4 = vector.broadcast %3 : vector<1x512xf32> to vector<8x512xf32>
    %5 = arith.addf %2, %4 : vector<8x512xf32>
    %cst_5 = arith.constant 0.000000e+00 : f32
    %6 = vector.broadcast %cst_5 : f32 to vector<8x512xf32>
    %7 = arith.maximumf %5, %6 : vector<8x512xf32>
    %8 = arith.truncf %7 : vector<8x512xf32> to vector<8x512xbf16>
    %c0_6 = arith.constant 0 : index
    %c0_7 = arith.constant 0 : index
    %9 = vector.load %arg4[%c0_6, %c0_7] : memref<512x128xbf16, #tpu.memory_space<vmem>>, vector<512x128xbf16>
    %cst_8 = arith.constant dense<0.000000e+00> : vector<8x128xf32>
    %10 = tpu.matmul %8, %9, %cst_8 {dimension_numbers = #tpu.dot_dimension_numbers<[1], [0], [0], [1], [0, 0, 1, 1], [], []>} : vector<8x512xbf16>, vector<512x128xbf16>, vector<8x128xf32> -> vector<8x128xf32>
    %c0_9 = arith.constant 0 : index
    %c0_10 = arith.constant 0 : index
    %11 = vector.load %arg5[%c0_9, %c0_10] : memref<1x128xf32, #tpu.memory_space<vmem>>, vector<1x128xf32>
    %12 = vector.broadcast %11 : vector<1x128xf32> to vector<8x128xf32>
    %13 = arith.addf %10, %12 : vector<8x128xf32>
    %c0_11 = arith.constant 0 : index
    %c0_12 = arith.constant 0 : index
    %14 = vector.load %arg6[%c0_11, %c0_12] : memref<8x128xf32, #tpu.memory_space<vmem>>, vector<8x128xf32>
    tpu.vector_store %arg6[%c0_11, %c0_12], %13 {strides = array<i32>} : memref<8x128xf32, #tpu.memory_space<vmem>>, vector<8x128xf32>,
    return
  }
  func.func @transform_0(%arg0: i32) -> (i32, i32) {
    %c0_i32 = arith.constant 0 : i32
    %c0_i32_0 = arith.constant 0 : i32
    return %arg0, %c0_i32 : i32, i32
  }
  func.func @transform_1(%arg0: i32) -> (i32, i32) {
    %c0_i32 = arith.constant 0 : i32
    %c0_i32_0 = arith.constant 0 : i32
    %c0_i32_1 = arith.constant 0 : i32
    return %c0_i32, %c0_i32_0 : i32, i32
  }
  func.func @transform_2(%arg0: i32) -> (i32, i32) {
    %c0_i32 = arith.constant 0 : i32
    %c0_i32_0 = arith.constant 0 : i32
    %c0_i32_1 = arith.constant 0 : i32
    return %c0_i32, %c0_i32_0 : i32, i32
  }
  func.func @transform_3(%arg0: i32) -> (i32, i32) {
    %c0_i32 = arith.constant 0 : i32
    %c0_i32_0 = arith.constant 0 : i32
    %c0_i32_1 = arith.constant 0 : i32
    return %c0_i32, %c0_i32_0 : i32, i32
  }
  func.func @transform_4(%arg0: i32) -> (i32, i32) {
    %c0_i32 = arith.constant 0 : i32
    %c0_i32_0 = arith.constant 0 : i32
    %c0_i32_1 = arith.constant 0 : i32
    return %c0_i32, %c0_i32_0 : i32, i32
  }
  func.func @transform_5(%arg0: i32) -> (i32, i32) {
    %c0_i32 = arith.constant 0 : i32
    %c0_i32_0 = arith.constant 0 : i32
    return %arg0, %c0_i32 : i32, i32
  }
}

</mosaic_0001>

<bundles_post_ra>
// kernel: lenet5_forward.3
= control target key start
LH: loop header
LB: loop body
LE: loop exit
PB: predicated region body
PF: predicated region fallthrough
CT: control target
= control target key end

     0   :  { %vm220_vm0 = vcmask 1043456   ;;  %vm221_vm1 = vcmask 1044480   ;;  %v1974_v2 = vmov 65535   ;;  %vm165_vm2 = vcmask 203776   ;;  %s2402_s4 = inlined_call_operand.vmem [shape: bf16[25,128], index: 4, kind: input, shape index: {}]   ;;  %s2403_s0 = inlined_call_operand.vmem [shape: bf16[288,25], index: 0, kind: input, shape index: {}]   ;;  %s2404_s1 = inlined_call_operand.vmem [shape: bf16[288,25], index: 1, kind: input, shape index: {}]   ;;  %s2405_s2 = inlined_call_operand.vmem [shape: bf16[288,25], index: 2, kind: input, shape index: {}]   ;;  %s2406_s3 = inlined_call_operand.vmem [shape: bf16[288,25], index: 3, kind: input, shape index: {}]   ;;  %s2407_s5 = inlined_call_operand.vmem [shape: f32[1,128], index: 5, kind: input, shape index: {}]   ;;  %s2408_s6 = inlined_call_operand.vmem [shape: bf16[288,128], index: 6, kind: output, shape index: {}]  }
   0x1   :  { %v1501_v0 = vld [vmem:[%s2402_s4 + $0x8] sm:$0xf]  ;;  %v1792_v1 = vld [vmem:[%s2402_s4 + $0x8] sm:$0x10]  ;;  %v222_v3 = vsel %vm220_vm0, 4294967295, %v1974_v2  ;;  %v1791_v7 = vld [vmem:[%s2402_s4] sm:$0xff] }
   0x2   :  { %v1502_v4 = vor.u32 %v1792_v1, %v1501_v0  ;;  %v223_v5 = vsel %vm221_vm1, %v222_v3, 0  ;;  %v1793_v8 = vld [vmem:[%s2403_s0] sm:$0xff]  ;;  %v1794_v12 = vld [vmem:[%s2403_s0 + $0x8] sm:$0xff]  ;;  %v1795_v16 = vld [vmem:[%s2403_s0 + $0x10] sm:$0xff] }
   0x3   :  { %v1811_v9 = vld [vmem:[%s2404_s1] sm:$0xff]  ;;  %v1812_v13 = vld [vmem:[%s2404_s1 + $0x8] sm:$0xff]  ;;  %v1813_v17 = vld [vmem:[%s2404_s1 + $0x10] sm:$0xff] }
   0x4   :  { %v225_v6 = vand.u32 %v1502_v4, %v223_v5  ;;  %v1829_v10 = vld [vmem:[%s2405_s2] sm:$0xff]  ;;  %v1830_v14 = vld [vmem:[%s2405_s2 + $0x8] sm:$0xff]  ;;  %v1831_v18 = vld [vmem:[%s2405_s2 + $0x10] sm:$0xff] }
   0x5   :  { %v1847_v11 = vld [vmem:[%s2406_s3] sm:$0xff]  ;;  %v1848_v15 = vld [vmem:[%s2406_s3 + $0x8] sm:$0xff]  ;;  %v1849_v19 = vld [vmem:[%s2406_s3 + $0x10] sm:$0xff] }
   0x6   :  { %233 = vmatpush.bf16.msra.mxu0 %v225_v6  ;;  %512 = vmatpush.bf16.msra.mxu1 %v225_v6  ;;  %v1796_v20 = vld [vmem:[%s2403_s0 + $0x18] sm:$0xff]  ;;  %v1797_v24 = vld [vmem:[%s2403_s0 + $0x20] sm:$0xff]  ;;  %v1798_v28 = vld [vmem:[%s2403_s0 + $0x28] sm:$0xff] }
   0x7   :  { %827 = vmatpush.bf16.msra.mxu2 %v225_v6  ;;  %1142 = vmatpush.bf16.msra.mxu3 %v225_v6  ;;  %v1814_v21 = vld [vmem:[%s2404_s1 + $0x18] sm:$0xff]  ;;  %v1815_v25 = vld [vmem:[%s2404_s1 + $0x20] sm:$0xff]  ;;  %v1816_v29 = vld [vmem:[%s2404_s1 + $0x28] sm:$0xff] }
   0x8   :  { %v1832_v22 = vld [vmem:[%s2405_s2 + $0x18] sm:$0xff]  ;;  %v1833_v26 = vld [vmem:[%s2405_s2 + $0x20] sm:$0xff]  ;;  %v1834_v30 = vld [vmem:[%s2405_s2 + $0x28] sm:$0xff] }
   0x9   :  { %v1850_v23 = vld [vmem:[%s2406_s3 + $0x18] sm:$0xff]  ;;  %v1851_v27 = vld [vmem:[%s2406_s3 + $0x20] sm:$0xff]  ;;  %v1852_v31 = vld [vmem:[%s2406_s3 + $0x28] sm:$0xff] }
   0xa   :  { %234 = vmatpush.bf16.msra.mxu0 %v1791_v7  ;;  %513 = vmatpush.bf16.msra.mxu1 %v1791_v7  ;;  %v1799_v32 = vld [vmem:[%s2403_s0 + $0x30] sm:$0xff]  ;;  %v1800_v36 = vld [vmem:[%s2403_s0 + $0x38] sm:$0xff]  ;;  %v1801_v40 = vld [vmem:[%s2403_s0 + $0x40] sm:$0xff] }
   0xb   :  { %828 = vmatpush.bf16.msra.mxu2 %v1791_v7  ;;  %1143 = vmatpush.bf16.msra.mxu3 %v1791_v7  ;;  %v1817_v33 = vld [vmem:[%s2404_s1 + $0x30] sm:$0xff]  ;;  %v1818_v37 = vld [vmem:[%s2404_s1 + $0x38] sm:$0xff]  ;;  %v1819_v41 = vld [vmem:[%s2404_s1 + $0x40] sm:$0xff] }
   0xc   :  { %v1835_v34 = vld [vmem:[%s2405_s2 + $0x30] sm:$0xff]  ;;  %v1836_v38 = vld [vmem:[%s2405_s2 + $0x38] sm:$0xff]  ;;  %v1837_v44 = vld [vmem:[%s2405_s2 + $0x40] sm:$0xff] }
   0xd   :  { %1503 = vmatmul.msk.bf16.vlgmr.msra.gmra.mxu0 %vm165_vm2, %v1793_v8  ;;  %1593 = vmatmul.msk.bf16.vlgmr.msra.gmra.mxu1 %vm165_vm2, %v1811_v9  ;;  %v1853_v35 = vld [vmem:[%s2406_s3 + $0x30] sm:$0xff]  ;;  %v1854_v39 = vld [vmem:[%s2406_s3 + $0x38] sm:$0xff]  ;;  %v1855_v45 = vld [vmem:[%s2406_s3 + $0x40] sm:$0xff] }
   0xe   :  { %1683 = vmatmul.msk.bf16.vlgmr.msra.gmra.mxu2 %vm165_vm2, %v1829_v10  ;;  %1773 = vmatmul.msk.bf16.vlgmr.msra.gmra.mxu3 %vm165_vm2, %v1847_v11  ;;  %v2166_v53 = vld [vmem:[%s2407_s5] ss:$0 sm:$0xff]  ;;  %v1802_v57 = vld [vmem:[%s2403_s0 + $0x48] sm:$0xff] }
   0xf   :  { %v1820_v58 = vld [vmem:[%s2404_s1 + $0x48] sm:$0xff] }
  0x10   :  { %v1838_v62 = vld [vmem:[%s2405_s2 + $0x48] sm:$0xff] }
  0x11   :  { %v1856_v63 = vld [vmem:[%s2406_s3 + $0x48] sm:$0xff] }
  0x1d   :  { %1504 = vmatmul.msk.bf16.gmra.mxu0 %vm165_vm2, %v1794_v12  ;;  %1594 = vmatmul.msk.bf16.gmra.mxu1 %vm165_vm2, %v1812_v13 }
  0x1e   :  { %1684 = vmatmul.msk.bf16.gmra.mxu2 %vm165_vm2, %v1830_v14  ;;  %1774 = vmatmul.msk.bf16.gmra.mxu3 %vm165_vm2, %v1848_v15 }
  0x2d   :  { %1505 = vmatmul.msk.bf16.gmra.mxu0 %vm165_vm2, %v1795_v16  ;;  %1595 = vmatmul.msk.bf16.gmra.mxu1 %vm165_vm2, %v1813_v17  ;;  %v1803_v16 = vld [vmem:[%s2403_s0 + $0x50] sm:$0xff] }
  0x2e   :  { %1685 = vmatmul.msk.bf16.gmra.mxu2 %vm165_vm2, %v1831_v18  ;;  %1775 = vmatmul.msk.bf16.gmra.mxu3 %vm165_vm2, %v1849_v19  ;;  %v1821_v17 = vld [vmem:[%s2404_s1 + $0x50] sm:$0xff] }
  0x3d   :  { %1506 = vmatmul.msk.bf16.gmra.mxu0 %vm165_vm2, %v1796_v20  ;;  %1596 = vmatmul.msk.bf16.gmra.mxu1 %vm165_vm2, %v1814_v21  ;;  %v1839_v21 = vld [vmem:[%s2405_s2 + $0x50] sm:$0xff] }
  0x3e   :  { %1686 = vmatmul.msk.bf16.gmra.mxu2 %vm165_vm2, %v1832_v22  ;;  %1776 = vmatmul.msk.bf16.gmra.mxu3 %vm165_vm2, %v1850_v23  ;;  %v1857_v22 = vld [vmem:[%s2406_s3 + $0x50] sm:$0xff] }
  0x4d   :  { %1507 = vmatmul.msk.bf16.gmra.mxu0 %vm165_vm2, %v1797_v24  ;;  %1597 = vmatmul.msk.bf16.gmra.mxu1 %vm165_vm2, %v1815_v25 }
  0x4e   :  { %1687 = vmatmul.msk.bf16.gmra.mxu2 %vm165_vm2, %v1833_v26  ;;  %1777 = vmatmul.msk.bf16.gmra.mxu3 %vm165_vm2, %v1851_v27 }
  0x5d   :  { %1508 = vmatmul.msk.bf16.gmra.mxu0 %vm165_vm2, %v1798_v28  ;;  %1598 = vmatmul.msk.bf16.gmra.mxu1 %vm165_vm2, %v1816_v29 }
  0x5e   :  { %1688 = vmatmul.msk.bf16.gmra.mxu2 %vm165_vm2, %v1834_v30  ;;  %1778 = vmatmul.msk.bf16.gmra.mxu3 %vm165_vm2, %v1852_v31 }
  0x6d   :  { %1509 = vmatmul.msk.bf16.gmra.mxu0 %vm165_vm2, %v1799_v32  ;;  %1599 = vmatmul.msk.bf16.gmra.mxu1 %vm165_vm2, %v1817_v33 }
  0x6e   :  { %1689 = vmatmul.msk.bf16.gmra.mxu2 %vm165_vm2, %v1835_v34  ;;  %1779 = vmatmul.msk.bf16.gmra.mxu3 %vm165_vm2, %v1853_v35 }
  0x7d   :  { %1510 = vmatmul.msk.bf16.gmra.mxu0 %vm165_vm2, %v1800_v36  ;;  %1600 = vmatmul.msk.bf16.gmra.mxu1 %vm165_vm2, %v1818_v37 }
  0x7e   :  { %1690 = vmatmul.msk.bf16.gmra.mxu2 %vm165_vm2, %v1836_v38  ;;  %1780 = vmatmul.msk.bf16.gmra.mxu3 %vm165_vm2, %v1854_v39  ;;  %v1804_v39 = vld [vmem:[%s2403_s0 + $0x58] sm:$0xff] }
  0x8a   :  { %v236_v42 = vpop.f32.mrf.mxu0  ;;  %v515_v43 = vpop.f32.mrf.mxu1 }
  0x8b   :  { %v605_v46 = vmax.f32 %v236_v42, %v515_v43 }
  0x8d   :  { %1511 = vmatmul.msk.bf16.gmra.mxu0 %vm165_vm2, %v1801_v40  ;;  %1601 = vmatmul.msk.bf16.gmra.mxu1 %vm165_vm2, %v1819_v41  ;;  %v1822_v40 = vld [vmem:[%s2404_s1 + $0x58] sm:$0xff] }
  0x8e   :  { %1691 = vmatmul.msk.bf16.gmra.mxu2 %vm165_vm2, %v1837_v44  ;;  %1781 = vmatmul.msk.bf16.gmra.mxu3 %vm165_vm2, %v1855_v45  ;;  %v1840_v44 = vld [vmem:[%s2405_s2 + $0x58] sm:$0xff] }
  0x8f   :  { %v1858_v45 = vld [vmem:[%s2406_s3 + $0x58] sm:$0xff] }
  0x91   :  { %v830_v47 = vpop.f32.mrf.mxu2  ;;  %v1145_v48 = vpop.f32.mrf.mxu3 }
  0x92   :  { %v238_v49 = vpop.f32.mrf.mxu0  ;;  %v517_v50 = vpop.f32.mrf.mxu1  ;;  %v920_v51 = vmax.f32 %v605_v46, %v830_v47 }
  0x93   :  { %v606_v54 = vmax.f32 %v238_v49, %v517_v50 }
  0x94   :  { %v1235_v52 = vmax.f32 %v920_v51, %v1145_v48 }
  0x96   :  { %v1275_v0 = vadd.f32 %v2166_v53, %v1235_v52 }
  0x98   :  { %v1311_v3 = vmax.f32 %v1275_v0, 0.0  ;;  %v1823_v0 = vld [vmem:[%s2404_s1 + $0x60] sm:$0xff] }
  0x99   :  { %v832_v55 = vpop.f32.mrf.mxu2  ;;  %v1147_v56 = vpop.f32.mrf.mxu3 }
  0x9a   :  { %v921_v59 = vmax.f32 %v606_v54, %v832_v55  ;;  %v241_v60 = vpop.f32.mrf.mxu0  ;;  %v520_v61 = vpop.f32.mrf.mxu1 }
  0x9b   :  { %v607_v5 = vmax.f32 %v241_v60, %v520_v61 }
  0x9c   :  { %v1236_v1 = vmax.f32 %v921_v59, %v1147_v56 }
  0x9d   :  { %1512 = vmatmul.msk.bf16.gmra.mxu0 %vm165_vm2, %v1802_v57  ;;  %1602 = vmatmul.msk.bf16.gmra.mxu1 %vm165_vm2, %v1820_v58 }
  0x9e   :  { %v1276_v2 = vadd.f32 %v2166_v53, %v1236_v1  ;;  %1692 = vmatmul.msk.bf16.gmra.mxu2 %vm165_vm2, %v1838_v62  ;;  %1782 = vmatmul.msk.bf16.gmra.mxu3 %vm165_vm2, %v1856_v63  ;;  %v1805_v63 = vld [vmem:[%s2403_s0 + $0x60] sm:$0xff] }
  0xa0   :  { %v1312_v4 = vmax.f32 %v1276_v2, 0.0 }
  0xa1   :  { %v835_v6 = vpop.f32.mrf.mxu2  ;;  %v1150_v7 = vpop.f32.mrf.mxu3 }
  0xa2   :  { %v1868_v8 = vpack.c.bf16 %v1312_v4, %v1311_v3  ;;  %v243_v9 = vpop.f32.mrf.mxu0  ;;  %v522_v10 = vpop.f32.mrf.mxu1  ;;  %v922_v11 = vmax.f32 %v607_v5, %v835_v6  ;;  %v1841_v4 = vld [vmem:[%s2405_s2 + $0x60] sm:$0xff] }
  0xa3   :  { %v608_v13 = vmax.f32 %v243_v9, %v522_v10  ;;  %v1859_v5 = vld [vmem:[%s2406_s3 + $0x60] sm:$0xff] }
  0xa4   :  { %1869 = vst [vmem:[%s2408_s6] sm:$0xff] %v1868_v8   ;;  %v1237_v12 = vmax.f32 %v922_v11, %v1150_v7 }
  0xa6   :  { %v1277_v23 = vadd.f32 %v2166_v53, %v1237_v12 }
  0xa8   :  { %v1313_v26 = vmax.f32 %v1277_v23, 0.0  ;;  %v1824_v23 = vld [vmem:[%s2404_s1 + $0x68] sm:$0xff] }
  0xa9   :  { %v837_v14 = vpop.f32.mrf.mxu2  ;;  %v1152_v15 = vpop.f32.mrf.mxu3 }
  0xaa   :  { %v923_v18 = vmax.f32 %v608_v13, %v837_v14  ;;  %v246_v19 = vpop.f32.mrf.mxu0  ;;  %v525_v20 = vpop.f32.mrf.mxu1 }
  0xab   :  { %v609_v28 = vmax.f32 %v246_v19, %v525_v20 }
  0xac   :  { %v1238_v24 = vmax.f32 %v923_v18, %v1152_v15 }
  0xad   :  { %1513 = vmatmul.msk.bf16.gmra.mxu0 %vm165_vm2, %v1803_v16  ;;  %1603 = vmatmul.msk.bf16.gmra.mxu1 %vm165_vm2, %v1821_v17 }
  0xae   :  { %v1278_v25 = vadd.f32 %v2166_v53, %v1238_v24  ;;  %1693 = vmatmul.msk.bf16.gmra.mxu2 %vm165_vm2, %v1839_v21  ;;  %1783 = vmatmul.msk.bf16.gmra.mxu3 %vm165_vm2, %v1857_v22  ;;  %v1806_v22 = vld [vmem:[%s2403_s0 + $0x68] sm:$0xff] }
  0xb0   :  { %v1314_v27 = vmax.f32 %v1278_v25, 0.0 }
  0xb1   :  { %v840_v29 = vpop.f32.mrf.mxu2  ;;  %v1155_v30 = vpop.f32.mrf.mxu3 }
  0xb2   :  { %v1873_v31 = vpack.c.bf16 %v1314_v27, %v1313_v26  ;;  %v248_v32 = vpop.f32.mrf.mxu0  ;;  %v527_v33 = vpop.f32.mrf.mxu1  ;;  %v924_v34 = vmax.f32 %v609_v28, %v840_v29  ;;  %v1842_v27 = vld [vmem:[%s2405_s2 + $0x68] sm:$0xff] }
  0xb3   :  { %v610_v36 = vmax.f32 %v248_v32, %v527_v33  ;;  %v1860_v28 = vld [vmem:[%s2406_s3 + $0x68] sm:$0xff] }
  0xb4   :  { %1955 = vst [vmem:[%s2408_s6 + $0x8] sm:$0xff] %v1873_v31   ;;  %v1239_v35 = vmax.f32 %v924_v34, %v1155_v30 }
  0xb6   :  { %v1279_v46 = vadd.f32 %v2166_v53, %v1239_v35 }
  0xb8   :  { %v1315_v49 = vmax.f32 %v1279_v46, 0.0  ;;  %v1825_v46 = vld [vmem:[%s2404_s1 + $0x70] sm:$0xff] }
  0xb9   :  { %v842_v37 = vpop.f32.mrf.mxu2  ;;  %v1157_v38 = vpop.f32.mrf.mxu3 }
  0xba   :  { %v925_v41 = vmax.f32 %v610_v36, %v842_v37  ;;  %v251_v42 = vpop.f32.mrf.mxu0  ;;  %v530_v43 = vpop.f32.mrf.mxu1 }
  0xbb   :  { %v611_v51 = vmax.f32 %v251_v42, %v530_v43 }
  0xbc   :  { %v1240_v47 = vmax.f32 %v925_v41, %v1157_v38 }
  0xbd   :  { %1514 = vmatmul.msk.bf16.gmra.mxu0 %vm165_vm2, %v1804_v39  ;;  %1604 = vmatmul.msk.bf16.gmra.mxu1 %vm165_vm2, %v1822_v40 }
  0xbe   :  { %v1280_v48 = vadd.f32 %v2166_v53, %v1240_v47  ;;  %1694 = vmatmul.msk.bf16.gmra.mxu2 %vm165_vm2, %v1840_v44  ;;  %1784 = vmatmul.msk.bf16.gmra.mxu3 %vm165_vm2, %v1858_v45  ;;  %v1807_v45 = vld [vmem:[%s2403_s0 + $0x70] sm:$0xff] }
  0xc0   :  { %v1316_v50 = vmax.f32 %v1280_v48, 0.0 }
  0xc1   :  { %v845_v52 = vpop.f32.mrf.mxu2  ;;  %v1160_v54 = vpop.f32.mrf.mxu3 }
  0xc2   :  { %v1878_v55 = vpack.c.bf16 %v1316_v50, %v1315_v49  ;;  %v253_v56 = vpop.f32.mrf.mxu0  ;;  %v532_v57 = vpop.f32.mrf.mxu1  ;;  %v926_v58 = vmax.f32 %v611_v51, %v845_v52  ;;  %v1843_v50 = vld [vmem:[%s2405_s2 + $0x70] sm:$0xff] }
  0xc3   :  { %v612_v60 = vmax.f32 %v253_v56, %v532_v57  ;;  %v1861_v51 = vld [vmem:[%s2406_s3 + $0x70] sm:$0xff] }
  0xc4   :  { %1956 = vst [vmem:[%s2408_s6 + $0x10] sm:$0xff] %v1878_v55   ;;  %v1241_v59 = vmax.f32 %v926_v58, %v1160_v54 }
  0xc6   :  { %v1281_v6 = vadd.f32 %v2166_v53, %v1241_v59 }
  0xc8   :  { %v1317_v9 = vmax.f32 %v1281_v6, 0.0  ;;  %v1826_v6 = vld [vmem:[%s2404_s1 + $0x78] sm:$0xff] }
  0xc9   :  { %v847_v61 = vpop.f32.mrf.mxu2  ;;  %v1162_v62 = vpop.f32.mrf.mxu3 }
  0xca   :  { %v927_v1 = vmax.f32 %v612_v60, %v847_v61  ;;  %v256_v2 = vpop.f32.mrf.mxu0  ;;  %v535_v3 = vpop.f32.mrf.mxu1 }
  0xcb   :  { %v613_v11 = vmax.f32 %v256_v2, %v535_v3 }
  0xcc   :  { %v1242_v7 = vmax.f32 %v927_v1, %v1162_v62 }
  0xcd   :  { %1515 = vmatmul.msk.bf16.gmra.mxu0 %vm165_vm2, %v1805_v63  ;;  %1605 = vmatmul.msk.bf16.gmra.mxu1 %vm165_vm2, %v1823_v0 }
  0xce   :  { %v1282_v8 = vadd.f32 %v2166_v53, %v1242_v7  ;;  %1695 = vmatmul.msk.bf16.gmra.mxu2 %vm165_vm2, %v1841_v4  ;;  %1785 = vmatmul.msk.bf16.gmra.mxu3 %vm165_vm2, %v1859_v5  ;;  %v1808_v5 = vld [vmem:[%s2403_s0 + $0x78] sm:$0xff] }
  0xd0   :  { %v1318_v10 = vmax.f32 %v1282_v8, 0.0 }
  0xd1   :  { %v850_v12 = vpop.f32.mrf.mxu2  ;;  %v1165_v13 = vpop.f32.mrf.mxu3 }
  0xd2   :  { %v1883_v14 = vpack.c.bf16 %v1318_v10, %v1317_v9  ;;  %v258_v15 = vpop.f32.mrf.mxu0  ;;  %v537_v16 = vpop.f32.mrf.mxu1  ;;  %v928_v17 = vmax.f32 %v613_v11, %v850_v12  ;;  %v1844_v10 = vld [vmem:[%s2405_s2 + $0x78] sm:$0xff] }
  0xd3   :  { %v614_v19 = vmax.f32 %v258_v15, %v537_v16  ;;  %v1862_v11 = vld [vmem:[%s2406_s3 + $0x78] sm:$0xff] }
  0xd4   :  { %1957 = vst [vmem:[%s2408_s6 + $0x18] sm:$0xff] %v1883_v14   ;;  %v1243_v18 = vmax.f32 %v928_v17, %v1165_v13 }
  0xd6   :  { %v1283_v29 = vadd.f32 %v2166_v53, %v1243_v18 }
  0xd8   :  { %v1319_v32 = vmax.f32 %v1283_v29, 0.0  ;;  %v1827_v29 = vld [vmem:[%s2404_s1 + $0x80] sm:$0xff] }
  0xd9   :  { %v852_v20 = vpop.f32.mrf.mxu2  ;;  %v1167_v21 = vpop.f32.mrf.mxu3 }
  0xda   :  { %v929_v24 = vmax.f32 %v614_v19, %v852_v20  ;;  %v261_v25 = vpop.f32.mrf.mxu0  ;;  %v540_v26 = vpop.f32.mrf.mxu1 }
  0xdb   :  { %v615_v34 = vmax.f32 %v261_v25, %v540_v26 }
  0xdc   :  { %v1244_v30 = vmax.f32 %v929_v24, %v1167_v21 }
  0xdd   :  { %1516 = vmatmul.msk.bf16.gmra.mxu0 %vm165_vm2, %v1806_v22  ;;  %1606 = vmatmul.msk.bf16.gmra.mxu1 %vm165_vm2, %v1824_v23 }
  0xde   :  { %v1284_v31 = vadd.f32 %v2166_v53, %v1244_v30  ;;  %1696 = vmatmul.msk.bf16.gmra.mxu2 %vm165_vm2, %v1842_v27  ;;  %1786 = vmatmul.msk.bf16.gmra.mxu3 %vm165_vm2, %v1860_v28  ;;  %v1809_v28 = vld [vmem:[%s2403_s0 + $0x80] sm:$0xff] }
  0xe0   :  { %v1320_v33 = vmax.f32 %v1284_v31, 0.0 }
  0xe1   :  { %v855_v35 = vpop.f32.mrf.mxu2  ;;  %v1170_v36 = vpop.f32.mrf.mxu3 }
  0xe2   :  { %v1888_v37 = vpack.c.bf16 %v1320_v33, %v1319_v32  ;;  %v263_v38 = vpop.f32.mrf.mxu0  ;;  %v542_v39 = vpop.f32.mrf.mxu1  ;;  %v930_v40 = vmax.f32 %v615_v34, %v855_v35  ;;  %v1845_v33 = vld [vmem:[%s2405_s2 + $0x80] sm:$0xff] }
  0xe3   :  { %v616_v42 = vmax.f32 %v263_v38, %v542_v39  ;;  %v1863_v34 = vld [vmem:[%s2406_s3 + $0x80] sm:$0xff] }
  0xe4   :  { %1958 = vst [vmem:[%s2408_s6 + $0x20] sm:$0xff] %v1888_v37   ;;  %v1245_v41 = vmax.f32 %v930_v40, %v1170_v36 }
  0xe6   :  { %v1285_v52 = vadd.f32 %v2166_v53, %v1245_v41 }
  0xe8   :  { %v1321_v56 = vmax.f32 %v1285_v52, 0.0  ;;  %v1828_v52 = vld [vmem:[%s2404_s1 + $0x88] sm:$0xff] }
  0xe9   :  { %v857_v43 = vpop.f32.mrf.mxu2  ;;  %v1172_v44 = vpop.f32.mrf.mxu3 }
  0xea   :  { %v931_v47 = vmax.f32 %v616_v42, %v857_v43  ;;  %v266_v48 = vpop.f32.mrf.mxu0  ;;  %v545_v49 = vpop.f32.mrf.mxu1 }
  0xeb   :  { %v617_v58 = vmax.f32 %v266_v48, %v545_v49 }
  0xec   :  { %v1246_v54 = vmax.f32 %v931_v47, %v1172_v44 }
  0xed   :  { %1517 = vmatmul.msk.bf16.gmra.mxu0 %vm165_vm2, %v1807_v45  ;;  %1607 = vmatmul.msk.bf16.gmra.mxu1 %vm165_vm2, %v1825_v46 }
  0xee   :  { %v1286_v55 = vadd.f32 %v2166_v53, %v1246_v54  ;;  %1697 = vmatmul.msk.bf16.gmra.mxu2 %vm165_vm2, %v1843_v50  ;;  %1787 = vmatmul.msk.bf16.gmra.mxu3 %vm165_vm2, %v1861_v51  ;;  %v1810_v51 = vld [vmem:[%s2403_s0 + $0x88] sm:$0xff] }
  0xf0   :  { %v1322_v57 = vmax.f32 %v1286_v55, 0.0 }
  0xf1   :  { %v860_v59 = vpop.f32.mrf.mxu2  ;;  %v1175_v60 = vpop.f32.mrf.mxu3 }
  0xf2   :  { %v1893_v61 = vpack.c.bf16 %v1322_v57, %v1321_v56  ;;  %v268_v62 = vpop.f32.mrf.mxu0  ;;  %v547_v63 = vpop.f32.mrf.mxu1  ;;  %v932_v0 = vmax.f32 %v617_v58, %v860_v59  ;;  %v1846_v57 = vld [vmem:[%s2405_s2 + $0x88] sm:$0xff] }
  0xf3   :  { %v618_v2 = vmax.f32 %v268_v62, %v547_v63  ;;  %v1864_v58 = vld [vmem:[%s2406_s3 + $0x88] sm:$0xff] }
  0xf4   :  { %1959 = vst [vmem:[%s2408_s6 + $0x28] sm:$0xff] %v1893_v61   ;;  %v1247_v1 = vmax.f32 %v932_v0, %v1175_v60 }
  0xf6   :  { %v1287_v12 = vadd.f32 %v2166_v53, %v1247_v1 }
  0xf8   :  { %v1323_v15 = vmax.f32 %v1287_v12, 0.0 }
  0xf9   :  { %v862_v3 = vpop.f32.mrf.mxu2  ;;  %v1177_v4 = vpop.f32.mrf.mxu3 }
  0xfa   :  { %v933_v7 = vmax.f32 %v618_v2, %v862_v3  ;;  %v271_v8 = vpop.f32.mrf.mxu0  ;;  %v550_v9 = vpop.f32.mrf.mxu1 }
  0xfb   :  { %v619_v17 = vmax.f32 %v271_v8, %v550_v9 }
  0xfc   :  { %v1248_v13 = vmax.f32 %v933_v7, %v1177_v4 }
  0xfd   :  { %1518 = vmatmul.msk.bf16.gmra.mxu0 %vm165_vm2, %v1808_v5  ;;  %1608 = vmatmul.msk.bf16.gmra.mxu1 %vm165_vm2, %v1826_v6 }
  0xfe   :  { %v1288_v14 = vadd.f32 %v2166_v53, %v1248_v13  ;;  %1698 = vmatmul.msk.bf16.gmra.mxu2 %vm165_vm2, %v1844_v10  ;;  %1788 = vmatmul.msk.bf16.gmra.mxu3 %vm165_vm2, %v1862_v11 }
 0x100   :  { %v1324_v16 = vmax.f32 %v1288_v14, 0.0 }
 0x101   :  { %v865_v18 = vpop.f32.mrf.mxu2  ;;  %v1180_v19 = vpop.f32.mrf.mxu3 }
 0x102   :  { %v1898_v20 = vpack.c.bf16 %v1324_v16, %v1323_v15  ;;  %v273_v21 = vpop.f32.mrf.mxu0  ;;  %v552_v22 = vpop.f32.mrf.mxu1  ;;  %v934_v23 = vmax.f32 %v619_v17, %v865_v18 }
 0x103   :  { %v620_v25 = vmax.f32 %v273_v21, %v552_v22 }
 0x104   :  { %1960 = vst [vmem:[%s2408_s6 + $0x30] sm:$0xff] %v1898_v20   ;;  %v1249_v24 = vmax.f32 %v934_v23, %v1180_v19 }
 0x106   :  { %v1289_v35 = vadd.f32 %v2166_v53, %v1249_v24 }
 0x108   :  { %v1325_v38 = vmax.f32 %v1289_v35, 0.0 }
 0x109   :  { %v867_v26 = vpop.f32.mrf.mxu2  ;;  %v1182_v27 = vpop.f32.mrf.mxu3 }
 0x10a   :  { %v935_v30 = vmax.f32 %v620_v25, %v867_v26  ;;  %v276_v31 = vpop.f32.mrf.mxu0  ;;  %v555_v32 = vpop.f32.mrf.mxu1 }
 0x10b   :  { %v621_v40 = vmax.f32 %v276_v31, %v555_v32 }
 0x10c   :  { %v1250_v36 = vmax.f32 %v935_v30, %v1182_v27 }
 0x10d   :  { %1519 = vmatmul.msk.bf16.gmra.mxu0 %vm165_vm2, %v1809_v28  ;;  %1609 = vmatmul.msk.bf16.gmra.mxu1 %vm165_vm2, %v1827_v29 }
 0x10e   :  { %v1290_v37 = vadd.f32 %v2166_v53, %v1250_v36  ;;  %1699 = vmatmul.msk.bf16.gmra.mxu2 %vm165_vm2, %v1845_v33  ;;  %1789 = vmatmul.msk.bf16.gmra.mxu3 %vm165_vm2, %v1863_v34 }
 0x110   :  { %v1326_v39 = vmax.f32 %v1290_v37, 0.0 }
 0x111   :  { %v870_v41 = vpop.f32.mrf.mxu2  ;;  %v1185_v42 = vpop.f32.mrf.mxu3 }
 0x112   :  { %v1903_v43 = vpack.c.bf16 %v1326_v39, %v1325_v38  ;;  %v278_v44 = vpop.f32.mrf.mxu0  ;;  %v557_v45 = vpop.f32.mrf.mxu1  ;;  %v936_v46 = vmax.f32 %v621_v40, %v870_v41 }
 0x113   :  { %v622_v48 = vmax.f32 %v278_v44, %v557_v45 }
 0x114   :  { %1961 = vst [vmem:[%s2408_s6 + $0x38] sm:$0xff] %v1903_v43   ;;  %v1251_v47 = vmax.f32 %v936_v46, %v1185_v42 }
 0x116   :  { %v1291_v59 = vadd.f32 %v2166_v53, %v1251_v47 }
 0x118   :  { %v1327_v62 = vmax.f32 %v1291_v59, 0.0 }
 0x119   :  { %v872_v49 = vpop.f32.mrf.mxu2  ;;  %v1187_v50 = vpop.f32.mrf.mxu3 }
 0x11a   :  { %v937_v54 = vmax.f32 %v622_v48, %v872_v49  ;;  %v281_v55 = vpop.f32.mrf.mxu0  ;;  %v560_v56 = vpop.f32.mrf.mxu1 }
 0x11b   :  { %v623_v0 = vmax.f32 %v281_v55, %v560_v56 }
 0x11c   :  { %v1252_v60 = vmax.f32 %v937_v54, %v1187_v50 }
 0x11d   :  { %1520 = vmatmul.msk.bf16.gmra.mxu0 %vm165_vm2, %v1810_v51  ;;  %1610 = vmatmul.msk.bf16.gmra.mxu1 %vm165_vm2, %v1828_v52 }
 0x11e   :  { %v1292_v61 = vadd.f32 %v2166_v53, %v1252_v60  ;;  %1700 = vmatmul.msk.bf16.gmra.mxu2 %vm165_vm2, %v1846_v57  ;;  %1790 = vmatmul.msk.bf16.gmra.mxu3 %vm165_vm2, %v1864_v58 }
 0x120   :  { %v1328_v63 = vmax.f32 %v1292_v61, 0.0 }
 0x121   :  { %v875_v1 = vpop.f32.mrf.mxu2  ;;  %v1190_v2 = vpop.f32.mrf.mxu3 }
 0x122   :  { %v1908_v3 = vpack.c.bf16 %v1328_v63, %v1327_v62  ;;  %v283_v4 = vpop.f32.mrf.mxu0  ;;  %v562_v5 = vpop.f32.mrf.mxu1  ;;  %v938_v6 = vmax.f32 %v623_v0, %v875_v1 }
 0x123   :  { %v624_v8 = vmax.f32 %v283_v4, %v562_v5 }
 0x124   :  { %1962 = vst [vmem:[%s2408_s6 + $0x40] sm:$0xff] %v1908_v3   ;;  %v1253_v7 = vmax.f32 %v938_v6, %v1190_v2 }
 0x126   :  { %v1293_v14 = vadd.f32 %v2166_v53, %v1253_v7 }
 0x128   :  { %v1329_v17 = vmax.f32 %v1293_v14, 0.0 }
 0x129   :  { %v877_v9 = vpop.f32.mrf.mxu2  ;;  %v1192_v10 = vpop.f32.mrf.mxu3 }
 0x12a   :  { %v939_v11 = vmax.f32 %v624_v8, %v877_v9  ;;  %v286_v12 = vpop.f32.mrf.mxu0  ;;  %v565_v13 = vpop.f32.mrf.mxu1 }
 0x12b   :  { %v625_v19 = vmax.f32 %v286_v12, %v565_v13 }
 0x12c   :  { %v1254_v15 = vmax.f32 %v939_v11, %v1192_v10 }
 0x12e   :  { %v1294_v16 = vadd.f32 %v2166_v53, %v1254_v15 }
 0x130   :  { %v1330_v18 = vmax.f32 %v1294_v16, 0.0 }
 0x131   :  { %v880_v20 = vpop.f32.mrf.mxu2  ;;  %v1195_v21 = vpop.f32.mrf.mxu3 }
 0x132   :  { %v1913_v22 = vpack.c.bf16 %v1330_v18, %v1329_v17  ;;  %v288_v23 = vpop.f32.mrf.mxu0  ;;  %v567_v24 = vpop.f32.mrf.mxu1  ;;  %v940_v25 = vmax.f32 %v625_v19, %v880_v20 }
 0x133   :  { %v626_v27 = vmax.f32 %v288_v23, %v567_v24 }
 0x134   :  { %1963 = vst [vmem:[%s2408_s6 + $0x48] sm:$0xff] %v1913_v22   ;;  %v1255_v26 = vmax.f32 %v940_v25, %v1195_v21 }
 0x136   :  { %v1295_v33 = vadd.f32 %v2166_v53, %v1255_v26 }
 0x138   :  { %v1331_v36 = vmax.f32 %v1295_v33, 0.0 }
 0x139   :  { %v882_v28 = vpop.f32.mrf.mxu2  ;;  %v1197_v29 = vpop.f32.mrf.mxu3 }
 0x13a   :  { %v941_v30 = vmax.f32 %v626_v27, %v882_v28  ;;  %v291_v31 = vpop.f32.mrf.mxu0  ;;  %v570_v32 = vpop.f32.mrf.mxu1 }
 0x13b   :  { %v627_v38 = vmax.f32 %v291_v31, %v570_v32 }
 0x13c   :  { %v1256_v34 = vmax.f32 %v941_v30, %v1197_v29 }
 0x13e   :  { %v1296_v35 = vadd.f32 %v2166_v53, %v1256_v34 }
 0x140   :  { %v1332_v37 = vmax.f32 %v1296_v35, 0.0 }
 0x141   :  { %v885_v39 = vpop.f32.mrf.mxu2  ;;  %v1200_v40 = vpop.f32.mrf.mxu3 }
 0x142   :  { %v1918_v41 = vpack.c.bf16 %v1332_v37, %v1331_v36  ;;  %v293_v42 = vpop.f32.mrf.mxu0  ;;  %v572_v43 = vpop.f32.mrf.mxu1  ;;  %v942_v44 = vmax.f32 %v627_v38, %v885_v39 }
 0x143   :  { %v628_v46 = vmax.f32 %v293_v42, %v572_v43 }
 0x144   :  { %1964 = vst [vmem:[%s2408_s6 + $0x50] sm:$0xff] %v1918_v41   ;;  %v1257_v45 = vmax.f32 %v942_v44, %v1200_v40 }
 0x146   :  { %v1297_v52 = vadd.f32 %v2166_v53, %v1257_v45 }
 0x148   :  { %v1333_v56 = vmax.f32 %v1297_v52, 0.0 }
 0x149   :  { %v887_v47 = vpop.f32.mrf.mxu2  ;;  %v1202_v48 = vpop.f32.mrf.mxu3 }
 0x14a   :  { %v943_v49 = vmax.f32 %v628_v46, %v887_v47  ;;  %v296_v50 = vpop.f32.mrf.mxu0  ;;  %v575_v51 = vpop.f32.mrf.mxu1 }
 0x14b   :  { %v629_v58 = vmax.f32 %v296_v50, %v575_v51 }
 0x14c   :  { %v1258_v54 = vmax.f32 %v943_v49, %v1202_v48 }
 0x14e   :  { %v1298_v55 = vadd.f32 %v2166_v53, %v1258_v54 }
 0x150   :  { %v1334_v57 = vmax.f32 %v1298_v55, 0.0 }
 0x151   :  { %v890_v59 = vpop.f32.mrf.mxu2  ;;  %v1205_v60 = vpop.f32.mrf.mxu3 }
 0x152   :  { %v1923_v61 = vpack.c.bf16 %v1334_v57, %v1333_v56  ;;  %v298_v62 = vpop.f32.mrf.mxu0  ;;  %v577_v63 = vpop.f32.mrf.mxu1  ;;  %v944_v0 = vmax.f32 %v629_v58, %v890_v59 }
 0x153   :  { %v630_v2 = vmax.f32 %v298_v62, %v577_v63 }
 0x154   :  { %1965 = vst [vmem:[%s2408_s6 + $0x58] sm:$0xff] %v1923_v61   ;;  %v1259_v1 = vmax.f32 %v944_v0, %v1205_v60 }
 0x156   :  { %v1299_v8 = vadd.f32 %v2166_v53, %v1259_v1 }
 0x158   :  { %v1335_v11 = vmax.f32 %v1299_v8, 0.0 }
 0x159   :  { %v892_v3 = vpop.f32.mrf.mxu2  ;;  %v1207_v4 = vpop.f32.mrf.mxu3 }
 0x15a   :  { %v945_v5 = vmax.f32 %v630_v2, %v892_v3  ;;  %v301_v6 = vpop.f32.mrf.mxu0  ;;  %v580_v7 = vpop.f32.mrf.mxu1 }
 0x15b   :  { %v631_v13 = vmax.f32 %v301_v6, %v580_v7 }
 0x15c   :  { %v1260_v9 = vmax.f32 %v945_v5, %v1207_v4 }
 0x15e   :  { %v1300_v10 = vadd.f32 %v2166_v53, %v1260_v9 }
 0x160   :  { %v1336_v12 = vmax.f32 %v1300_v10, 0.0 }
 0x161   :  { %v895_v14 = vpop.f32.mrf.mxu2  ;;  %v1210_v15 = vpop.f32.mrf.mxu3 }
 0x162   :  { %v1928_v16 = vpack.c.bf16 %v1336_v12, %v1335_v11  ;;  %v303_v17 = vpop.f32.mrf.mxu0  ;;  %v582_v18 = vpop.f32.mrf.mxu1  ;;  %v946_v19 = vmax.f32 %v631_v13, %v895_v14 }
 0x163   :  { %v632_v21 = vmax.f32 %v303_v17, %v582_v18 }
 0x164   :  { %1966 = vst [vmem:[%s2408_s6 + $0x60] sm:$0xff] %v1928_v16   ;;  %v1261_v20 = vmax.f32 %v946_v19, %v1210_v15 }
 0x166   :  { %v1301_v27 = vadd.f32 %v2166_v53, %v1261_v20 }
 0x168   :  { %v1337_v30 = vmax.f32 %v1301_v27, 0.0 }
 0x169   :  { %v897_v22 = vpop.f32.mrf.mxu2  ;;  %v1212_v23 = vpop.f32.mrf.mxu3 }
 0x16a   :  { %v947_v24 = vmax.f32 %v632_v21, %v897_v22  ;;  %v306_v25 = vpop.f32.mrf.mxu0  ;;  %v585_v26 = vpop.f32.mrf.mxu1 }
 0x16b   :  { %v633_v32 = vmax.f32 %v306_v25, %v585_v26 }
 0x16c   :  { %v1262_v28 = vmax.f32 %v947_v24, %v1212_v23 }
 0x16e   :  { %v1302_v29 = vadd.f32 %v2166_v53, %v1262_v28 }
 0x170   :  { %v1338_v31 = vmax.f32 %v1302_v29, 0.0 }
 0x171   :  { %v900_v33 = vpop.f32.mrf.mxu2  ;;  %v1215_v34 = vpop.f32.mrf.mxu3 }
 0x172   :  { %v1933_v35 = vpack.c.bf16 %v1338_v31, %v1337_v30  ;;  %v308_v36 = vpop.f32.mrf.mxu0  ;;  %v587_v37 = vpop.f32.mrf.mxu1  ;;  %v948_v38 = vmax.f32 %v633_v32, %v900_v33 }
 0x173   :  { %v634_v40 = vmax.f32 %v308_v36, %v587_v37 }
 0x174   :  { %1967 = vst [vmem:[%s2408_s6 + $0x68] sm:$0xff] %v1933_v35   ;;  %v1263_v39 = vmax.f32 %v948_v38, %v1215_v34 }
 0x176   :  { %v1303_v46 = vadd.f32 %v2166_v53, %v1263_v39 }
 0x178   :  { %v1339_v49 = vmax.f32 %v1303_v46, 0.0 }
 0x179   :  { %v902_v41 = vpop.f32.mrf.mxu2  ;;  %v1217_v42 = vpop.f32.mrf.mxu3 }
 0x17a   :  { %v949_v43 = vmax.f32 %v634_v40, %v902_v41  ;;  %v311_v44 = vpop.f32.mrf.mxu0  ;;  %v590_v45 = vpop.f32.mrf.mxu1 }
 0x17b   :  { %v635_v51 = vmax.f32 %v311_v44, %v590_v45 }
 0x17c   :  { %v1264_v47 = vmax.f32 %v949_v43, %v1217_v42 }
 0x17e   :  { %v1304_v48 = vadd.f32 %v2166_v53, %v1264_v47 }
 0x180   :  { %v1340_v50 = vmax.f32 %v1304_v48, 0.0 }
 0x181   :  { %v905_v52 = vpop.f32.mrf.mxu2  ;;  %v1220_v54 = vpop.f32.mrf.mxu3 }
 0x182   :  { %v1938_v55 = vpack.c.bf16 %v1340_v50, %v1339_v49  ;;  %v313_v56 = vpop.f32.mrf.mxu0  ;;  %v592_v57 = vpop.f32.mrf.mxu1  ;;  %v950_v58 = vmax.f32 %v635_v51, %v905_v52 }
 0x183   :  { %v636_v60 = vmax.f32 %v313_v56, %v592_v57 }
 0x184   :  { %1968 = vst [vmem:[%s2408_s6 + $0x70] sm:$0xff] %v1938_v55   ;;  %v1265_v59 = vmax.f32 %v950_v58, %v1220_v54 }
 0x186   :  { %v1305_v2 = vadd.f32 %v2166_v53, %v1265_v59 }
 0x188   :  { %v1341_v5 = vmax.f32 %v1305_v2, 0.0 }
 0x189   :  { %v907_v61 = vpop.f32.mrf.mxu2  ;;  %v1222_v62 = vpop.f32.mrf.mxu3 }
 0x18a   :  { %v951_v63 = vmax.f32 %v636_v60, %v907_v61  ;;  %v316_v0 = vpop.f32.mrf.mxu0  ;;  %v595_v1 = vpop.f32.mrf.mxu1 }
 0x18b   :  { %v637_v7 = vmax.f32 %v316_v0, %v595_v1 }
 0x18c   :  { %v1266_v3 = vmax.f32 %v951_v63, %v1222_v62 }
 0x18e   :  { %v1306_v4 = vadd.f32 %v2166_v53, %v1266_v3 }
 0x190   :  { %v1342_v6 = vmax.f32 %v1306_v4, 0.0 }
 0x191   :  { %v910_v8 = vpop.f32.mrf.mxu2  ;;  %v1225_v9 = vpop.f32.mrf.mxu3 }
 0x192   :  { %v1943_v10 = vpack.c.bf16 %v1342_v6, %v1341_v5  ;;  %v318_v11 = vpop.f32.mrf.mxu0  ;;  %v597_v12 = vpop.f32.mrf.mxu1  ;;  %v952_v13 = vmax.f32 %v637_v7, %v910_v8 }
 0x193   :  { %v638_v15 = vmax.f32 %v318_v11, %v597_v12 }
 0x194   :  { %1969 = vst [vmem:[%s2408_s6 + $0x78] sm:$0xff] %v1943_v10   ;;  %v1267_v14 = vmax.f32 %v952_v13, %v1225_v9 }
 0x196   :  { %v1307_v21 = vadd.f32 %v2166_v53, %v1267_v14 }
 0x198   :  { %v1343_v24 = vmax.f32 %v1307_v21, 0.0 }
 0x199   :  { %v912_v16 = vpop.f32.mrf.mxu2  ;;  %v1227_v17 = vpop.f32.mrf.mxu3 }
 0x19a   :  { %v953_v18 = vmax.f32 %v638_v15, %v912_v16  ;;  %v321_v19 = vpop.f32.mrf.mxu0  ;;  %v600_v20 = vpop.f32.mrf.mxu1 }
 0x19b   :  { %v639_v26 = vmax.f32 %v321_v19, %v600_v20 }
 0x19c   :  { %v1268_v22 = vmax.f32 %v953_v18, %v1227_v17 }
 0x19e   :  { %v1308_v23 = vadd.f32 %v2166_v53, %v1268_v22 }
 0x1a0   :  { %v1344_v25 = vmax.f32 %v1308_v23, 0.0 }
 0x1a1   :  { %v915_v27 = vpop.f32.mrf.mxu2  ;;  %v1230_v28 = vpop.f32.mrf.mxu3 }
 0x1a2   :  { %v1948_v29 = vpack.c.bf16 %v1344_v25, %v1343_v24  ;;  %v954_v30 = vmax.f32 %v639_v26, %v915_v27  ;;  %v323_v31 = vpop.f32.mrf.mxu0  ;;  %v602_v32 = vpop.f32.mrf.mxu1 }
 0x1a3   :  { %v640_v34 = vmax.f32 %v323_v31, %v602_v32 }
 0x1a4   :  { %1970 = vst [vmem:[%s2408_s6 + $0x80] sm:$0xff] %v1948_v29   ;;  %v1269_v33 = vmax.f32 %v954_v30, %v1230_v28 }
 0x1a6   :  { %v1309_v38 = vadd.f32 %v2166_v53, %v1269_v33 }
 0x1a8   :  { %v1345_v41 = vmax.f32 %v1309_v38, 0.0 }
 0x1a9   :  { %v917_v35 = vpop.f32.mrf.mxu2  ;;  %v1232_v37 = vpop.f32.mrf.mxu3 }
 0x1aa   :  { %v955_v36 = vmax.f32 %v640_v34, %v917_v35 }
 0x1ac   :  { %v1270_v39 = vmax.f32 %v955_v36, %v1232_v37 }
 0x1ae   :  { %v1310_v40 = vadd.f32 %v2166_v53, %v1270_v39 }
 0x1b0   :  { %v1346_v42 = vmax.f32 %v1310_v40, 0.0 }
 0x1b2   :  { %v1953_v43 = vpack.c.bf16 %v1346_v42, %v1345_v41 }
 0x1b4   :  { %1971 = vst [vmem:[%s2408_s6 + $0x88] sm:$0xff] %v1953_v43  }

// kernel: lenet5_forward.4
= control target key start
LH: loop header
LB: loop body
LE: loop exit
PB: predicated region body
PF: predicated region fallthrough
CT: control target
= control target key end

     0   :  { %vm328_vm0 = vcmask 1041408   ;;  %vm321_vm1 = vcmask 949248   ;;  %s1716_s4 = inlined_call_operand.vmem [shape: bf16[500,128], index: 4, kind: input, shape index: {}]   ;;  %s1717_s0 = inlined_call_operand.vmem [shape: bf16[32,500], index: 0, kind: input, shape index: {}]   ;;  %s1718_s1 = inlined_call_operand.vmem [shape: bf16[32,500], index: 1, kind: input, shape index: {}]   ;;  %s1719_s2 = inlined_call_operand.vmem [shape: bf16[32,500], index: 2, kind: input, shape index: {}]   ;;  %s1720_s3 = inlined_call_operand.vmem [shape: bf16[32,500], index: 3, kind: input, shape index: {}]   ;;  %s1721_s5 = inlined_call_operand.vmem [shape: f32[1,128], index: 5, kind: input, shape index: {}]   ;;  %s1722_s6 = inlined_call_operand.vmem [shape: bf16[32,128], index: 6, kind: output, shape index: {}]  }
   0x1   :  { %v1201_v0 = vld [vmem:[%s1716_s4 + $0x38] sm:$0xff]  ;;  %v1221_v5 = vld [vmem:[%s1716_s4 + $0x30] sm:$0xff]  ;;  %v1241_v10 = vld [vmem:[%s1716_s4 + $0x28] sm:$0xff] }
   0x2   :  { %v1206_v1 = vld [vmem:[%s1716_s4 + $0x78] sm:$0xff]  ;;  %332 = vmatpush.bf16.msra.mxu0 %v1201_v0  ;;  %v1226_v6 = vld [vmem:[%s1716_s4 + $0x70] sm:$0xff]  ;;  %v1246_v11 = vld [vmem:[%s1716_s4 + $0x68] sm:$0xff] }
   0x3   :  { %v1211_v2 = vld [vmem:[%s1716_s4 + $0xb8] sm:$0xff]  ;;  %351 = vmatpush.bf16.msra.mxu1 %v1206_v1  ;;  %v1232_v7 = vld [vmem:[%s1716_s4 + $0xb0] sm:$0xff]  ;;  %v1258_v13 = vld [vmem:[%s1716_s4 + $0xa8] sm:$0xff] }
   0x4   :  { %v85_v3 = vld [vmem:[%s1716_s4 + $0xf8] sm:$0x3]  ;;  %370 = vmatpush.bf16.msra.mxu2 %v1211_v2  ;;  %v1253_v12 = vld [vmem:[%s1716_s4 + $0xf0] sm:$0xff]  ;;  %v1265_v14 = vld [vmem:[%s1716_s4 + $0x20] sm:$0xff] }
   0x5   :  { %v257_v4 = vunpack.c.l.b16 %v85_v3  ;;  %v1270_v15 = vld [vmem:[%s1716_s4 + $0x60] sm:$0xff]  ;;  %v1277_v16 = vld [vmem:[%s1716_s4 + $0xe8] sm:$0xff]  ;;  %v1289_v18 = vld [vmem:[%s1716_s4 + $0x18] sm:$0xff] }
   0x6   :  { %333 = vmatpush.bf16.msra.mxu0 %v1221_v5  ;;  %v1282_v17 = vld [vmem:[%s1716_s4 + $0xa0] sm:$0xff]  ;;  %v1294_v19 = vld [vmem:[%s1716_s4 + $0x58] sm:$0xff]  ;;  %v1313_v22 = vld [vmem:[%s1716_s4 + $0x10] sm:$0xff] }
   0x7   :  { %v289_v8 = vpack.c.b16 %v257_v4, %v257_v4  ;;  %352 = vmatpush.bf16.msra.mxu1 %v1226_v6  ;;  %v1301_v20 = vld [vmem:[%s1716_s4 + $0xe0] sm:$0xff]  ;;  %v1306_v21 = vld [vmem:[%s1716_s4 + $0x98] sm:$0xff]  ;;  %v1318_v23 = vld [vmem:[%s1716_s4 + $0x50] sm:$0xff] }
   0x8   :  { %371 = vmatpush.bf16.msra.mxu2 %v1232_v7  ;;  %v1325_v24 = vld [vmem:[%s1716_s4 + $0xd8] sm:$0xff]  ;;  %v1330_v25 = vld [vmem:[%s1716_s4 + $0x90] sm:$0xff]  ;;  %v1337_v26 = vld [vmem:[%s1716_s4 + $0x8] sm:$0xff] }
   0x9   :  { %v1234_v9 = vsel %vm328_vm0, %v289_v8, 0  ;;  %v1342_v27 = vld [vmem:[%s1716_s4 + $0x48] sm:$0xff]  ;;  %v1349_v28 = vld [vmem:[%s1716_s4 + $0xd0] sm:$0xff]  ;;  %v1364_v31 = vld [vmem:[%s1716_s4] sm:$0xff] }
   0xa   :  { %389 = vmatpush.bf16.msra.mxu3 %v1234_v9  ;;  %334 = vmatpush.bf16.msra.mxu0 %v1241_v10  ;;  %v1354_v29 = vld [vmem:[%s1716_s4 + $0x88] sm:$0xff]  ;;  %v1369_v32 = vld [vmem:[%s1716_s4 + $0x40] sm:$0xff]  ;;  %v1121_v34 = vld [vmem:[%s1717_s0 + $0xc] sm:$0xf0] }
   0xb   :  { %353 = vmatpush.bf16.msra.mxu1 %v1246_v11  ;;  %v1359_v30 = vld [vmem:[%s1716_s4 + $0xc8] sm:$0xff]  ;;  %v830_v33 = vld [vmem:[%s1717_s0] sm:$0xf]  ;;  %v1119_v35 = vld [vmem:[%s1717_s0 + $0x4] sm:$0xf] }
   0xc   :  { %372 = vmatpush.bf16.msra.mxu2 %v1258_v13  ;;  %v832_v36 = vld [vmem:[%s1717_s0 + $0x10] sm:$0xf0]  ;;  %v1390_v37 = vld [vmem:[%s1716_s4 + $0x80] sm:$0xff]  ;;  %v838_v38 = vld [vmem:[%s1717_s0 + $0x8] sm:$0xf]  ;;  %v831_v40 = vor.u32 %v1121_v34, %v830_v33 }
   0xd   :  { %v1122_v39 = vld [vmem:[%s1717_s0 + $0x14] sm:$0xf0]  ;;  %v835_v41 = vor.u32 %v1119_v35, %v832_v36  ;;  %v1405_v43 = vld [vmem:[%s1716_s4 + $0xc0] sm:$0xff]  ;;  %v1120_v44 = vld [vmem:[%s1717_s0 + $0xc] sm:$0xf] }
   0xe   :  { %390 = vmatpush.bf16.msra.mxu3 %v1253_v12  ;;  %335 = vmatpush.bf16.msra.mxu0 %v1265_v14  ;;  %v839_v42 = vor.u32 %v1122_v39, %v838_v38  ;;  %v840_v45 = vld [vmem:[%s1717_s0 + $0x18] sm:$0xf0]  ;;  %v846_v47 = vld [vmem:[%s1717_s0 + $0x20] sm:$0xf]  ;;  %v1125_v48 = vld [vmem:[%s1717_s0 + $0x2c] sm:$0xf0] }
   0xf   :  { %354 = vmatpush.bf16.msra.mxu1 %v1270_v15  ;;  %v843_v46 = vor.u32 %v1120_v44, %v840_v45  ;;  %v1123_v49 = vld [vmem:[%s1717_s0 + $0x24] sm:$0xf]  ;;  %v848_v50 = vld [vmem:[%s1717_s0 + $0x30] sm:$0xf0]  ;;  %v854_v51 = vld [vmem:[%s1717_s0 + $0x28] sm:$0xf]  ;;  %v847_v53 = vor.u32 %v1125_v48, %v846_v47 }
  0x10   :  { %373 = vmatpush.bf16.msra.mxu2 %v1282_v17  ;;  %v1126_v52 = vld [vmem:[%s1717_s0 + $0x34] sm:$0xf0]  ;;  %v851_v54 = vor.u32 %v1123_v49, %v848_v50  ;;  %v1124_v56 = vld [vmem:[%s1717_s0 + $0x2c] sm:$0xf]  ;;  %v856_v57 = vld [vmem:[%s1717_s0 + $0x38] sm:$0xf0] }
  0x11   :  { %v855_v55 = vor.u32 %v1126_v52, %v854_v51  ;;  %v859_v58 = vor.u32 %v1124_v56, %v856_v57  ;;  %v988_v59 = vld [vmem:[%s1718_s1] sm:$0xf]  ;;  %v1129_v60 = vld [vmem:[%s1718_s1 + $0xc] sm:$0xf0]  ;;  %v1127_v61 = vld [vmem:[%s1718_s1 + $0x4] sm:$0xf] }
  0x12   :  { %391 = vmatpush.bf16.msra.mxu3 %v1277_v16  ;;  %336 = vmatpush.bf16.msra.mxu0 %v1289_v18  ;;  %v990_v62 = vld [vmem:[%s1718_s1 + $0x10] sm:$0xf0]  ;;  %v996_v63 = vld [vmem:[%s1718_s1 + $0x8] sm:$0xf]  ;;  %v1130_v3 = vld [vmem:[%s1718_s1 + $0x14] sm:$0xf0]  ;;  %v989_v4 = vor.u32 %v1129_v60, %v988_v59 }
  0x13   :  { %355 = vmatpush.bf16.msra.mxu1 %v1294_v19  ;;  %v993_v8 = vor.u32 %v1127_v61, %v990_v62  ;;  %v997_v33 = vor.u32 %v1130_v3, %v996_v63  ;;  %v1128_v34 = vld [vmem:[%s1718_s1 + $0xc] sm:$0xf]  ;;  %v998_v35 = vld [vmem:[%s1718_s1 + $0x18] sm:$0xf0]  ;;  %v1004_v38 = vld [vmem:[%s1718_s1 + $0x20] sm:$0xf] }
  0x14   :  { %374 = vmatpush.bf16.msra.mxu2 %v1306_v21  ;;  %v1001_v36 = vor.u32 %v1128_v34, %v998_v35  ;;  %v1133_v39 = vld [vmem:[%s1718_s1 + $0x2c] sm:$0xf0]  ;;  %v1134_v44 = vld [vmem:[%s1718_s1 + $0x34] sm:$0xf0]  ;;  %v1132_v48 = vld [vmem:[%s1718_s1 + $0x2c] sm:$0xf] }
  0x15   :  { %v1005_v45 = vor.u32 %v1133_v39, %v1004_v38  ;;  %v1014_v49 = vld [vmem:[%s1718_s1 + $0x38] sm:$0xf0]  ;;  %v1022_v51 = vld [vmem:[%s1719_s2] sm:$0xf]  ;;  %v1137_v52 = vld [vmem:[%s1719_s2 + $0xc] sm:$0xf0] }
  0x16   :  { %392 = vmatpush.bf16.msra.mxu3 %v1301_v20  ;;  %337 = vmatpush.bf16.msra.mxu0 %v1313_v22  ;;  %v1017_v50 = vor.u32 %v1132_v48, %v1014_v49  ;;  %v1138_v56 = vld [vmem:[%s1719_s2 + $0x14] sm:$0xf0]  ;;  %v1023_v57 = vor.u32 %v1137_v52, %v1022_v51  ;;  %v1136_v60 = vld [vmem:[%s1719_s2 + $0xc] sm:$0xf]  ;;  %v1032_v61 = vld [vmem:[%s1719_s2 + $0x18] sm:$0xf0] }
  0x17   :  { %356 = vmatpush.bf16.msra.mxu1 %v1318_v23  ;;  %v1148_v3 = vld [vmem:[%s1720_s3 + $0x2c] sm:$0xf] }
  0x18   :  { %375 = vmatpush.bf16.msra.mxu2 %v1330_v25 }
  0x1a   :  { %393 = vmatpush.bf16.msra.mxu3 %v1325_v24  ;;  %338 = vmatpush.bf16.msra.mxu0 %v1337_v26 }
  0x1b   :  { %357 = vmatpush.bf16.msra.mxu1 %v1342_v27 }
  0x1c   :  { %376 = vmatpush.bf16.msra.mxu2 %v1354_v29 }
  0x1e   :  { %394 = vmatpush.bf16.msra.mxu3 %v1349_v28  ;;  %339 = vmatpush.bf16.msra.mxu0 %v1364_v31 }
  0x1f   :  { %358 = vmatpush.bf16.msra.mxu1 %v1369_v32 }
  0x20   :  { %377 = vmatpush.bf16.msra.mxu2 %v1390_v37 }
  0x21   :  { %340 = vmatmul.bf16.vlgmr.msra.gmra.mxu0 %v831_v40  ;;  %v1131_v40 = vld [vmem:[%s1718_s1 + $0x24] sm:$0xf] }
  0x22   :  { %395 = vmatpush.bf16.msra.mxu3 %v1359_v30  ;;  %460 = vmatpush.bf16.msrb.mxu0 %v1201_v0 }
  0x23   :  { %479 = vmatpush.bf16.msrb.mxu1 %v1206_v1  ;;  %378 = vmatmul.bf16.vlgmr.msra.gmra.mxu2 %v839_v42  ;;  %v1012_v42 = vld [vmem:[%s1718_s1 + $0x28] sm:$0xf] }
  0x24   :  { %359 = vmatmul.bf16.vlgmr.msra.gmra.mxu1 %v835_v41  ;;  %498 = vmatpush.bf16.msrb.mxu2 %v1211_v2  ;;  %v1006_v41 = vld [vmem:[%s1718_s1 + $0x30] sm:$0xf0]  ;;  %v1013_v47 = vor.u32 %v1134_v44, %v1012_v42 }
  0x26   :  { %396 = vmatpush.bf16.msra.mxu3 %v1405_v43  ;;  %461 = vmatpush.bf16.msrb.mxu0 %v1221_v5 }
  0x27   :  { %480 = vmatpush.bf16.msrb.mxu1 %v1226_v6 }
  0x28   :  { %499 = vmatpush.bf16.msrb.mxu2 %v1232_v7 }
  0x29   :  { %984 = vmatmul.msk.bf16.vlgmr.msra.gmra.mxu3 %vm321_vm1, %v843_v46  ;;  %v1009_v46 = vor.u32 %v1131_v40, %v1006_v41 }
  0x2a   :  { %517 = vmatpush.bf16.msrb.mxu3 %v1234_v9  ;;  %462 = vmatpush.bf16.msrb.mxu0 %v1241_v10 }
  0x2b   :  { %481 = vmatpush.bf16.msrb.mxu1 %v1246_v11 }
  0x2c   :  { %500 = vmatpush.bf16.msrb.mxu2 %v1258_v13 }
  0x2e   :  { %518 = vmatpush.bf16.msrb.mxu3 %v1253_v12  ;;  %463 = vmatpush.bf16.msrb.mxu0 %v1265_v14 }
  0x2f   :  { %482 = vmatpush.bf16.msrb.mxu1 %v1270_v15 }
  0x30   :  { %501 = vmatpush.bf16.msrb.mxu2 %v1282_v17 }
  0x31   :  { %345 = vmatmul.bf16.gmra.mxu0 %v847_v53  ;;  %v1135_v53 = vld [vmem:[%s1719_s2 + $0x4] sm:$0xf] }
  0x32   :  { %519 = vmatpush.bf16.msrb.mxu3 %v1277_v16  ;;  %464 = vmatpush.bf16.msrb.mxu0 %v1289_v18 }
  0x33   :  { %383 = vmatmul.bf16.gmra.mxu2 %v855_v55  ;;  %483 = vmatpush.bf16.msrb.mxu1 %v1294_v19  ;;  %v1030_v55 = vld [vmem:[%s1719_s2 + $0x8] sm:$0xf] }
  0x34   :  { %364 = vmatmul.bf16.gmra.mxu1 %v851_v54  ;;  %502 = vmatpush.bf16.msrb.mxu2 %v1306_v21  ;;  %v1024_v54 = vld [vmem:[%s1719_s2 + $0x10] sm:$0xf0]  ;;  %v1031_v59 = vor.u32 %v1138_v56, %v1030_v55 }
  0x36   :  { %520 = vmatpush.bf16.msrb.mxu3 %v1301_v20  ;;  %465 = vmatpush.bf16.msrb.mxu0 %v1313_v22 }
  0x37   :  { %484 = vmatpush.bf16.msrb.mxu1 %v1318_v23 }
  0x38   :  { %503 = vmatpush.bf16.msrb.mxu2 %v1330_v25 }
  0x39   :  { %985 = vmatmul.msk.bf16.gmra.mxu3 %vm321_vm1, %v859_v58  ;;  %v1027_v58 = vor.u32 %v1135_v53, %v1024_v54 }
  0x3a   :  { %521 = vmatpush.bf16.msrb.mxu3 %v1325_v24  ;;  %466 = vmatpush.bf16.msrb.mxu0 %v1337_v26 }
  0x3b   :  { %485 = vmatpush.bf16.msrb.mxu1 %v1342_v27 }
  0x3c   :  { %504 = vmatpush.bf16.msrb.mxu2 %v1354_v29 }
  0x3e   :  { %522 = vmatpush.bf16.msrb.mxu3 %v1349_v28  ;;  %467 = vmatpush.bf16.msrb.mxu0 %v1364_v31 }
  0x3f   :  { %486 = vmatpush.bf16.msrb.mxu1 %v1369_v32 }
  0x40   :  { %505 = vmatpush.bf16.msrb.mxu2 %v1390_v37 }
  0x41   :  { %468 = vmatmul.bf16.vlgmr.msrb.gmra.mxu0 %v989_v4  ;;  %v1082_v4 = vld [vmem:[%s1720_s3 + $0x38] sm:$0xf0] }
  0x42   :  { %523 = vmatpush.bf16.msrb.mxu3 %v1359_v30  ;;  %592 = vmatpush.bf16.msra.mxu0 %v1201_v0 }
  0x43   :  { %611 = vmatpush.bf16.msra.mxu1 %v1206_v1  ;;  %506 = vmatmul.bf16.vlgmr.msrb.gmra.mxu2 %v997_v33 }
  0x44   :  { %630 = vmatpush.bf16.msra.mxu2 %v1211_v2  ;;  %487 = vmatmul.bf16.vlgmr.msrb.gmra.mxu1 %v993_v8  ;;  %v1085_v8 = vor.u32 %v1148_v3, %v1082_v4 }
  0x46   :  { %524 = vmatpush.bf16.msrb.mxu3 %v1405_v43  ;;  %593 = vmatpush.bf16.msra.mxu0 %v1221_v5 }
  0x47   :  { %612 = vmatpush.bf16.msra.mxu1 %v1226_v6 }
  0x48   :  { %631 = vmatpush.bf16.msra.mxu2 %v1232_v7 }
  0x49   :  { %1018 = vmatmul.msk.bf16.vlgmr.msrb.gmra.mxu3 %vm321_vm1, %v1001_v36 }
  0x4a   :  { %649 = vmatpush.bf16.msra.mxu3 %v1234_v9  ;;  %594 = vmatpush.bf16.msra.mxu0 %v1241_v10 }
  0x4b   :  { %613 = vmatpush.bf16.msra.mxu1 %v1246_v11 }
  0x4c   :  { %632 = vmatpush.bf16.msra.mxu2 %v1258_v13 }
  0x4e   :  { %650 = vmatpush.bf16.msra.mxu3 %v1253_v12  ;;  %595 = vmatpush.bf16.msra.mxu0 %v1265_v14 }
  0x4f   :  { %614 = vmatpush.bf16.msra.mxu1 %v1270_v15 }
  0x50   :  { %633 = vmatpush.bf16.msra.mxu2 %v1282_v17 }
  0x51   :  { %473 = vmatmul.bf16.gmra.mxu0 %v1005_v45 }
  0x52   :  { %651 = vmatpush.bf16.msra.mxu3 %v1277_v16  ;;  %596 = vmatpush.bf16.msra.mxu0 %v1289_v18 }
  0x53   :  { %615 = vmatpush.bf16.msra.mxu1 %v1294_v19  ;;  %511 = vmatmul.bf16.gmra.mxu2 %v1013_v47 }
  0x54   :  { %634 = vmatpush.bf16.msra.mxu2 %v1306_v21  ;;  %492 = vmatmul.bf16.gmra.mxu1 %v1009_v46 }
  0x56   :  { %652 = vmatpush.bf16.msra.mxu3 %v1301_v20  ;;  %597 = vmatpush.bf16.msra.mxu0 %v1313_v22 }
  0x57   :  { %616 = vmatpush.bf16.msra.mxu1 %v1318_v23 }
  0x58   :  { %635 = vmatpush.bf16.msra.mxu2 %v1330_v25 }
  0x59   :  { %1019 = vmatmul.msk.bf16.gmra.mxu3 %vm321_vm1, %v1017_v50 }
  0x5a   :  { %653 = vmatpush.bf16.msra.mxu3 %v1325_v24  ;;  %598 = vmatpush.bf16.msra.mxu0 %v1337_v26 }
  0x5b   :  { %617 = vmatpush.bf16.msra.mxu1 %v1342_v27 }
  0x5c   :  { %636 = vmatpush.bf16.msra.mxu2 %v1354_v29 }
  0x5e   :  { %654 = vmatpush.bf16.msra.mxu3 %v1349_v28  ;;  %599 = vmatpush.bf16.msra.mxu0 %v1364_v31 }
  0x5f   :  { %618 = vmatpush.bf16.msra.mxu1 %v1369_v32 }
  0x60   :  { %637 = vmatpush.bf16.msra.mxu2 %v1390_v37 }
  0x61   :  { %600 = vmatmul.bf16.vlgmr.msra.gmra.mxu0 %v1023_v57 }
  0x62   :  { %655 = vmatpush.bf16.msra.mxu3 %v1359_v30  ;;  %724 = vmatpush.bf16.msrb.mxu0 %v1201_v0  ;;  %v1035_v0 = vor.u32 %v1136_v60, %v1032_v61 }
  0x63   :  { %743 = vmatpush.bf16.msrb.mxu1 %v1206_v1  ;;  %638 = vmatmul.bf16.vlgmr.msra.gmra.mxu2 %v1031_v59  ;;  %v1038_v1 = vld [vmem:[%s1719_s2 + $0x20] sm:$0xf] }
  0x64   :  { %762 = vmatpush.bf16.msrb.mxu2 %v1211_v2  ;;  %619 = vmatmul.bf16.vlgmr.msra.gmra.mxu1 %v1027_v58  ;;  %v1141_v2 = vld [vmem:[%s1719_s2 + $0x2c] sm:$0xf0] }
  0x66   :  { %656 = vmatpush.bf16.msra.mxu3 %v1405_v43  ;;  %725 = vmatpush.bf16.msrb.mxu0 %v1221_v5  ;;  %v1139_v5 = vld [vmem:[%s1719_s2 + $0x24] sm:$0xf] }
  0x67   :  { %744 = vmatpush.bf16.msrb.mxu1 %v1226_v6  ;;  %v1040_v6 = vld [vmem:[%s1719_s2 + $0x30] sm:$0xf0] }
  0x68   :  { %763 = vmatpush.bf16.msrb.mxu2 %v1232_v7  ;;  %v1046_v7 = vld [vmem:[%s1719_s2 + $0x28] sm:$0xf] }
  0x69   :  { %1052 = vmatmul.msk.bf16.vlgmr.msra.gmra.mxu3 %vm321_vm1, %v1035_v0 }
  0x6a   :  { %781 = vmatpush.bf16.msrb.mxu3 %v1234_v9  ;;  %726 = vmatpush.bf16.msrb.mxu0 %v1241_v10  ;;  %v1142_v9 = vld [vmem:[%s1719_s2 + $0x34] sm:$0xf0]  ;;  %v1039_v10 = vor.u32 %v1141_v2, %v1038_v1 }
  0x6b   :  { %745 = vmatpush.bf16.msrb.mxu1 %v1246_v11  ;;  %v1043_v11 = vor.u32 %v1139_v5, %v1040_v6 }
  0x6c   :  { %764 = vmatpush.bf16.msrb.mxu2 %v1258_v13  ;;  %v1140_v13 = vld [vmem:[%s1719_s2 + $0x2c] sm:$0xf] }
  0x6e   :  { %782 = vmatpush.bf16.msrb.mxu3 %v1253_v12  ;;  %727 = vmatpush.bf16.msrb.mxu0 %v1265_v14  ;;  %v1047_v12 = vor.u32 %v1142_v9, %v1046_v7  ;;  %v1048_v14 = vld [vmem:[%s1719_s2 + $0x38] sm:$0xf0] }
  0x6f   :  { %746 = vmatpush.bf16.msrb.mxu1 %v1270_v15  ;;  %v1051_v15 = vor.u32 %v1140_v13, %v1048_v14 }
  0x70   :  { %765 = vmatpush.bf16.msrb.mxu2 %v1282_v17  ;;  %v1145_v17 = vld [vmem:[%s1720_s3 + $0xc] sm:$0xf0] }
  0x71   :  { %605 = vmatmul.bf16.gmra.mxu0 %v1039_v10 }
  0x72   :  { %783 = vmatpush.bf16.msrb.mxu3 %v1277_v16  ;;  %728 = vmatpush.bf16.msrb.mxu0 %v1289_v18  ;;  %v1056_v16 = vld [vmem:[%s1720_s3] sm:$0xf]  ;;  %v1143_v18 = vld [vmem:[%s1720_s3 + $0x4] sm:$0xf] }
  0x73   :  { %747 = vmatpush.bf16.msrb.mxu1 %v1294_v19  ;;  %643 = vmatmul.bf16.gmra.mxu2 %v1047_v12  ;;  %v1058_v19 = vld [vmem:[%s1720_s3 + $0x10] sm:$0xf0] }
  0x74   :  { %766 = vmatpush.bf16.msrb.mxu2 %v1306_v21  ;;  %624 = vmatmul.bf16.gmra.mxu1 %v1043_v11  ;;  %v1146_v21 = vld [vmem:[%s1720_s3 + $0x14] sm:$0xf0] }
  0x76   :  { %784 = vmatpush.bf16.msrb.mxu3 %v1301_v20  ;;  %729 = vmatpush.bf16.msrb.mxu0 %v1313_v22  ;;  %v1064_v20 = vld [vmem:[%s1720_s3 + $0x8] sm:$0xf]  ;;  %v1057_v22 = vor.u32 %v1145_v17, %v1056_v16 }
  0x77   :  { %748 = vmatpush.bf16.msrb.mxu1 %v1318_v23  ;;  %v1061_v23 = vor.u32 %v1143_v18, %v1058_v19 }
  0x78   :  { %767 = vmatpush.bf16.msrb.mxu2 %v1330_v25  ;;  %v1144_v25 = vld [vmem:[%s1720_s3 + $0xc] sm:$0xf] }
  0x79   :  { %1053 = vmatmul.msk.bf16.gmra.mxu3 %vm321_vm1, %v1051_v15 }
  0x7a   :  { %785 = vmatpush.bf16.msrb.mxu3 %v1325_v24  ;;  %730 = vmatpush.bf16.msrb.mxu0 %v1337_v26  ;;  %v1065_v24 = vor.u32 %v1146_v21, %v1064_v20  ;;  %v1066_v26 = vld [vmem:[%s1720_s3 + $0x18] sm:$0xf0] }
  0x7b   :  { %749 = vmatpush.bf16.msrb.mxu1 %v1342_v27  ;;  %v1069_v27 = vor.u32 %v1144_v25, %v1066_v26 }
  0x7c   :  { %768 = vmatpush.bf16.msrb.mxu2 %v1354_v29  ;;  %v1149_v29 = vld [vmem:[%s1720_s3 + $0x2c] sm:$0xf0] }
  0x7e   :  { %786 = vmatpush.bf16.msrb.mxu3 %v1349_v28  ;;  %731 = vmatpush.bf16.msrb.mxu0 %v1364_v31  ;;  %v1072_v28 = vld [vmem:[%s1720_s3 + $0x20] sm:$0xf]  ;;  %v1074_v31 = vld [vmem:[%s1720_s3 + $0x30] sm:$0xf0] }
  0x7f   :  { %750 = vmatpush.bf16.msrb.mxu1 %v1369_v32  ;;  %v1080_v32 = vld [vmem:[%s1720_s3 + $0x28] sm:$0xf] }
  0x80   :  { %769 = vmatpush.bf16.msrb.mxu2 %v1390_v37  ;;  %v1150_v37 = vld [vmem:[%s1720_s3 + $0x34] sm:$0xf0] }
  0x81   :  { %732 = vmatmul.bf16.vlgmr.msrb.gmra.mxu0 %v1057_v22  ;;  %v1081_v63 = vor.u32 %v1150_v37, %v1080_v32 }
  0x82   :  { %787 = vmatpush.bf16.msrb.mxu3 %v1359_v30  ;;  %v1147_v30 = vld [vmem:[%s1720_s3 + $0x24] sm:$0xf] }
  0x83   :  { %770 = vmatmul.bf16.vlgmr.msrb.gmra.mxu2 %v1065_v24  ;;  %v1077_v62 = vor.u32 %v1147_v30, %v1074_v31 }
  0x84   :  { %751 = vmatmul.bf16.vlgmr.msrb.gmra.mxu1 %v1061_v23 }
  0x86   :  { %788 = vmatpush.bf16.msrb.mxu3 %v1405_v43  ;;  %v1073_v43 = vor.u32 %v1149_v29, %v1072_v28 }
  0x89   :  { %1086 = vmatmul.msk.bf16.vlgmr.msrb.gmra.mxu3 %vm321_vm1, %v1069_v27 }
  0x91   :  { %737 = vmatmul.bf16.gmra.mxu0 %v1073_v43 }
  0x93   :  { %775 = vmatmul.bf16.gmra.mxu2 %v1081_v63 }
  0x94   :  { %756 = vmatmul.bf16.gmra.mxu1 %v1077_v62 }
  0x99   :  { %1087 = vmatmul.msk.bf16.gmra.mxu3 %vm321_vm1, %v1085_v8 }
  0x9e   :  { %v341_v33 = vpop.f32.mrf.mxu0 }
  0xa1   :  { %v360_v34 = vpop.f32.mrf.mxu1 }
  0xa2   :  { %v361_v35 = vadd.f32 %v360_v34, %v341_v33 }
  0xa6   :  { %v379_v36 = vpop.f32.mrf.mxu2  ;;  %v343_v39 = vpop.f32.mrf.mxu0 }
  0xa7   :  { %v380_v38 = vadd.f32 %v379_v36, %v361_v35 }
  0xa9   :  { %v362_v40 = vpop.f32.mrf.mxu1 }
  0xaa   :  { %v363_v41 = vadd.f32 %v362_v40, %v343_v39 }
  0xac   :  { %v398_v42 = vpop.f32.mrf.mxu3 }
  0xad   :  { %v1686_v44 = vadd.f32 %v398_v42, %v380_v38 }
  0xae   :  { %v381_v45 = vpop.f32.mrf.mxu2  ;;  %v346_v47 = vpop.f32.mrf.mxu0 }
  0xaf   :  { %v382_v46 = vadd.f32 %v381_v45, %v363_v41 }
  0xb1   :  { %v365_v48 = vpop.f32.mrf.mxu1 }
  0xb2   :  { %v366_v49 = vadd.f32 %v365_v48, %v346_v47 }
  0xb4   :  { %v400_v50 = vpop.f32.mrf.mxu3 }
  0xb5   :  { %v1688_v51 = vadd.f32 %v400_v50, %v382_v46 }
  0xb6   :  { %v384_v52 = vpop.f32.mrf.mxu2  ;;  %v348_v54 = vpop.f32.mrf.mxu0 }
  0xb7   :  { %v385_v53 = vadd.f32 %v384_v52, %v366_v49 }
  0xb9   :  { %v367_v55 = vpop.f32.mrf.mxu1 }
  0xba   :  { %v368_v56 = vadd.f32 %v367_v55, %v348_v54 }
  0xbc   :  { %v403_v57 = vpop.f32.mrf.mxu3 }
  0xbd   :  { %v1690_v58 = vadd.f32 %v403_v57, %v385_v53 }
  0xbe   :  { %v386_v59 = vpop.f32.mrf.mxu2  ;;  %v469_v61 = vpop.f32.mrf.mxu0 }
  0xbf   :  { %v387_v60 = vadd.f32 %v386_v59, %v368_v56 }
  0xc1   :  { %v488_v0 = vpop.f32.mrf.mxu1 }
  0xc2   :  { %v489_v1 = vadd.f32 %v488_v0, %v469_v61 }
  0xc4   :  { %v405_v2 = vpop.f32.mrf.mxu3 }
  0xc5   :  { %v1692_v5 = vadd.f32 %v405_v2, %v387_v60  ;;  %v1162_v2 = vld [vmem:[%s1721_s5] ss:$0 sm:$0xff] }
  0xc6   :  { %v507_v6 = vpop.f32.mrf.mxu2  ;;  %v471_v9 = vpop.f32.mrf.mxu0 }
  0xc7   :  { %v508_v7 = vadd.f32 %v507_v6, %v489_v1 }
  0xc9   :  { %v490_v10 = vpop.f32.mrf.mxu1 }
  0xca   :  { %v491_v47 = vadd.f32 %v490_v10, %v471_v9 }
  0xcc   :  { %v526_v11 = vpop.f32.mrf.mxu3 }
  0xcd   :  { %v527_v12 = vadd.f32 %v526_v11, %v508_v7 }
  0xce   :  { %v509_v14 = vpop.f32.mrf.mxu2  ;;  %v474_v15 = vpop.f32.mrf.mxu0 }
  0xcf   :  { %v536_v13 = vmax.f32 %v1686_v44, %v527_v12  ;;  %v510_v50 = vadd.f32 %v509_v14, %v491_v47 }
  0xd1   :  { %v493_v16 = vpop.f32.mrf.mxu1 }
  0xd2   :  { %v494_v17 = vadd.f32 %v493_v16, %v474_v15 }
  0xd4   :  { %v528_v18 = vpop.f32.mrf.mxu3 }
  0xd5   :  { %v529_v54 = vadd.f32 %v528_v18, %v510_v50 }
  0xd6   :  { %v512_v19 = vpop.f32.mrf.mxu2  ;;  %v476_v21 = vpop.f32.mrf.mxu0 }
  0xd7   :  { %v513_v20 = vadd.f32 %v512_v19, %v494_v17  ;;  %v537_v0 = vmax.f32 %v1688_v51, %v529_v54 }
  0xd9   :  { %v495_v22 = vpop.f32.mrf.mxu1 }
  0xdc   :  { %v531_v23 = vpop.f32.mrf.mxu3 }
  0xdd   :  { %v1695_v24 = vadd.f32 %v531_v23, %v513_v20  ;;  %v496_v20 = vadd.f32 %v495_v22, %v476_v21 }
  0xde   :  { %v514_v26 = vpop.f32.mrf.mxu2  ;;  %v601_v27 = vpop.f32.mrf.mxu0 }
  0xdf   :  { %v538_v25 = vmax.f32 %v1690_v58, %v1695_v24 }
  0xe1   :  { %v620_v28 = vpop.f32.mrf.mxu1 }
  0xe2   :  { %v621_v40 = vadd.f32 %v620_v28, %v601_v27 }
  0xe4   :  { %v1699_v29 = vpop.f32.mrf.mxu3 }
  0xe6   :  { %v639_v30 = vpop.f32.mrf.mxu2  ;;  %v603_v31 = vpop.f32.mrf.mxu0 }
  0xe7   :  { %v640_v44 = vadd.f32 %v639_v30, %v621_v40  ;;  %v515_v30 = vadd.f32 %v514_v26, %v496_v20 }
  0xe9   :  { %v622_v32 = vpop.f32.mrf.mxu1 }
  0xea   :  { %v623_v52 = vadd.f32 %v622_v32, %v603_v31 }
  0xec   :  { %v658_v37 = vpop.f32.mrf.mxu3 }
  0xed   :  { %v659_v53 = vadd.f32 %v658_v37, %v640_v44 }
  0xee   :  { %v641_v43 = vpop.f32.mrf.mxu2  ;;  %v606_v62 = vpop.f32.mrf.mxu0 }
  0xef   :  { %v642_v55 = vadd.f32 %v641_v43, %v623_v52  ;;  %v668_v59 = vmax.f32 %v536_v13, %v659_v53 }
  0xf1   :  { %v625_v63 = vpop.f32.mrf.mxu1 }
  0xf2   :  { %v626_v11 = vadd.f32 %v625_v63, %v606_v62  ;;  %v534_v62 = vadd.f32 %v1699_v29, %v515_v30 }
  0xf4   :  { %v660_v3 = vpop.f32.mrf.mxu3 }
  0xf5   :  { %v661_v60 = vadd.f32 %v660_v3, %v642_v55 }
  0xf6   :  { %v644_v4 = vpop.f32.mrf.mxu2  ;;  %v608_v8 = vpop.f32.mrf.mxu0 }
  0xf7   :  { %v669_v12 = vmax.f32 %v537_v0, %v661_v60  ;;  %v645_v18 = vadd.f32 %v644_v4, %v626_v11 }
  0xf9   :  { %v627_v33 = vpop.f32.mrf.mxu1 }
  0xfa   :  { %v628_v31 = vadd.f32 %v627_v33, %v608_v8  ;;  %v539_v8 = vmax.f32 %v1692_v5, %v534_v62 }
  0xfc   :  { %v663_v34 = vpop.f32.mrf.mxu3 }
  0xfd   :  { %v664_v32 = vadd.f32 %v663_v34, %v645_v18 }
  0xfe   :  { %v646_v35 = vpop.f32.mrf.mxu2  ;;  %v733_v36 = vpop.f32.mrf.mxu0 }
  0xff   :  { %v647_v63 = vadd.f32 %v646_v35, %v628_v31  ;;  %v670_v21 = vmax.f32 %v538_v25, %v664_v32 }
 0x101   :  { %v752_v38 = vpop.f32.mrf.mxu1 }
 0x102   :  { %v753_v41 = vadd.f32 %v752_v38, %v733_v36 }
 0x104   :  { %v665_v39 = vpop.f32.mrf.mxu3 }
 0x105   :  { %v666_v22 = vadd.f32 %v665_v39, %v647_v63 }
 0x106   :  { %v771_v42 = vpop.f32.mrf.mxu2  ;;  %v735_v45 = vpop.f32.mrf.mxu0 }
 0x107   :  { %v772_v48 = vadd.f32 %v771_v42, %v753_v41  ;;  %v671_v40 = vmax.f32 %v539_v8, %v666_v22 }
 0x109   :  { %v754_v46 = vpop.f32.mrf.mxu1 }
 0x10a   :  { %v755_v61 = vadd.f32 %v754_v46, %v735_v45 }
 0x10c   :  { %v790_v49 = vpop.f32.mrf.mxu3 }
 0x10d   :  { %v791_v56 = vadd.f32 %v790_v49, %v772_v48 }
 0x10e   :  { %v773_v57 = vpop.f32.mrf.mxu2  ;;  %v738_v7 = vpop.f32.mrf.mxu0 }
 0x10f   :  { %v800_v1 = vmax.f32 %v668_v59, %v791_v56  ;;  %v774_v6 = vadd.f32 %v773_v57, %v755_v61 }
 0x111   :  { %v757_v9 = vpop.f32.mrf.mxu1  ;;  %v808_v15 = vadd.f32 %v1162_v2, %v800_v1 }
 0x112   :  { %v758_v16 = vadd.f32 %v757_v9, %v738_v7 }
 0x113   :  { %v812_v51 = vmax.f32 %v808_v15, 0.0 }
 0x114   :  { %v792_v10 = vpop.f32.mrf.mxu3 }
 0x115   :  { %v793_v14 = vadd.f32 %v792_v10, %v774_v6 }
 0x116   :  { %v776_v13 = vpop.f32.mrf.mxu2  ;;  %v740_v43 = vpop.f32.mrf.mxu0 }
 0x117   :  { %v801_v17 = vmax.f32 %v669_v12, %v793_v14  ;;  %v777_v27 = vadd.f32 %v776_v13, %v758_v16 }
 0x119   :  { %v809_v19 = vadd.f32 %v1162_v2, %v801_v17  ;;  %v759_v3 = vpop.f32.mrf.mxu1 }
 0x11a   :  { %v760_v26 = vadd.f32 %v759_v3, %v740_v43 }
 0x11b   :  { %v813_v23 = vmax.f32 %v809_v19, 0.0 }
 0x11c   :  { %v795_v28 = vpop.f32.mrf.mxu3 }
 0x11d   :  { %v1154_v37 = vpack.c.bf16 %v813_v23, %v812_v51  ;;  %v796_v4 = vadd.f32 %v795_v28, %v777_v27 }
 0x11e   :  { %v778_v36 = vpop.f32.mrf.mxu2 }
 0x11f   :  { %1155 = vst [vmem:[%s1722_s6] sm:$0xff] %v1154_v37   ;;  %v802_v33 = vmax.f32 %v670_v21, %v796_v4  ;;  %v779_v34 = vadd.f32 %v778_v36, %v760_v26 }
 0x121   :  { %v810_v35 = vadd.f32 %v1162_v2, %v802_v33 }
 0x123   :  { %v814_v44 = vmax.f32 %v810_v35, 0.0 }
 0x124   :  { %v797_v38 = vpop.f32.mrf.mxu3 }
 0x125   :  { %v798_v29 = vadd.f32 %v797_v38, %v779_v34 }
 0x127   :  { %v803_v41 = vmax.f32 %v671_v40, %v798_v29 }
 0x129   :  { %v811_v42 = vadd.f32 %v1162_v2, %v803_v41 }
 0x12b   :  { %v815_v45 = vmax.f32 %v811_v42, 0.0 }
 0x12d   :  { %v1159_v46 = vpack.c.bf16 %v815_v45, %v814_v44 }
 0x12f   :  { %1161 = vst [vmem:[%s1722_s6 + $0x8] sm:$0xff] %v1159_v46  }

// kernel: lenet5_forward.5
= control target key start
LH: loop header
LB: loop body
LE: loop exit
PB: predicated region body
PF: predicated region fallthrough
CT: control target
= control target key end

     0   :  { %s10434_s1 = inlined_call_operand.vmem [shape: bf16[2048,512], index: 1, kind: input, shape index: {}]   ;;  %s10435_s0 = inlined_call_operand.vmem [shape: bf16[8,2048], index: 0, kind: input, shape index: {}]   ;;  %s10436_s2 = inlined_call_operand.vmem [shape: f32[1,512], index: 2, kind: input, shape index: {}]   ;;  %s10437_s3 = inlined_call_operand.vmem [shape: bf16[512,128], index: 3, kind: input, shape index: {}]   ;;  %s10438_s4 = inlined_call_operand.vmem [shape: f32[1,128], index: 4, kind: input, shape index: {}]   ;;  %s10439_s5 = inlined_call_operand.vmem [shape: f32[8,128], index: 5, kind: output, shape index: {}]  }
   0x1   :  { %v4437_v0 = vld [vmem:[%s10434_s1 + $0xe0] sm:$0xf]  ;;  %v6529_v1 = vld [vmem:[%s10434_s1 + $0xec] sm:$0xf0] }
   0x2   :  { %v4565_v2 = vld [vmem:[%s10434_s1 + $0x1e0] sm:$0xf]  ;;  %v4438_v3 = vor.u32 %v6529_v1, %v4437_v0  ;;  %v6561_v4 = vld [vmem:[%s10434_s1 + $0x1ec] sm:$0xf0] }
   0x3   :  { %v4693_v5 = vld [vmem:[%s10434_s1 + $0x2e0] sm:$0xf]  ;;  %v6593_v6 = vld [vmem:[%s10434_s1 + $0x2ec] sm:$0xf0]  ;;  %v4566_v7 = vor.u32 %v6561_v4, %v4565_v2 }
   0x4   :  { %v4694_v8 = vor.u32 %v6593_v6, %v4693_v5  ;;  %v4821_v9 = vld [vmem:[%s10434_s1 + $0x3e0] sm:$0xf]  ;;  %v6625_v10 = vld [vmem:[%s10434_s1 + $0x3ec] sm:$0xf0]  ;;  %3166 = vmatpush.bf16.msra.mxu0 %v4438_v3 }
   0x5   :  { %v4421_v11 = vld [vmem:[%s10434_s1 + $0xc0] sm:$0xf]  ;;  %v4822_v12 = vor.u32 %v6625_v10, %v4821_v9  ;;  %v6525_v13 = vld [vmem:[%s10434_s1 + $0xcc] sm:$0xf0]  ;;  %3179 = vmatpush.bf16.msra.mxu1 %v4566_v7 }
   0x6   :  { %v4549_v14 = vld [vmem:[%s10434_s1 + $0x1c0] sm:$0xf]  ;;  %v6557_v15 = vld [vmem:[%s10434_s1 + $0x1cc] sm:$0xf0]  ;;  %3192 = vmatpush.bf16.msra.mxu2 %v4694_v8  ;;  %v4422_v16 = vor.u32 %v6525_v13, %v4421_v11 }
   0x7   :  { %v4550_v17 = vor.u32 %v6557_v15, %v4549_v14  ;;  %v4677_v18 = vld [vmem:[%s10434_s1 + $0x2c0] sm:$0xf]  ;;  %v6589_v19 = vld [vmem:[%s10434_s1 + $0x2cc] sm:$0xf0]  ;;  %3205 = vmatpush.bf16.msra.mxu3 %v4822_v12 }
   0x8   :  { %v4805_v20 = vld [vmem:[%s10434_s1 + $0x3c0] sm:$0xf]  ;;  %v4678_v21 = vor.u32 %v6589_v19, %v4677_v18  ;;  %v6621_v22 = vld [vmem:[%s10434_s1 + $0x3cc] sm:$0xf0]  ;;  %3167 = vmatpush.bf16.msra.mxu0 %v4422_v16 }
   0x9   :  { %v4405_v23 = vld [vmem:[%s10434_s1 + $0xa0] sm:$0xf]  ;;  %v6521_v24 = vld [vmem:[%s10434_s1 + $0xac] sm:$0xf0]  ;;  %v4806_v25 = vor.u32 %v6621_v22, %v4805_v20  ;;  %3180 = vmatpush.bf16.msra.mxu1 %v4550_v17 }
   0xa   :  { %v4533_v26 = vld [vmem:[%s10434_s1 + $0x1a0] sm:$0xf]  ;;  %v6553_v27 = vld [vmem:[%s10434_s1 + $0x1ac] sm:$0xf0]  ;;  %v4406_v29 = vor.u32 %v6521_v24, %v4405_v23  ;;  %3193 = vmatpush.bf16.msra.mxu2 %v4678_v21 }
   0xb   :  { %v4661_v28 = vld [vmem:[%s10434_s1 + $0x2a0] sm:$0xf]  ;;  %v6585_v30 = vld [vmem:[%s10434_s1 + $0x2ac] sm:$0xf0]  ;;  %v4534_v33 = vor.u32 %v6553_v27, %v4533_v26  ;;  %3206 = vmatpush.bf16.msra.mxu3 %v4806_v25 }
   0xc   :  { %v4789_v31 = vld [vmem:[%s10434_s1 + $0x3a0] sm:$0xf]  ;;  %v6617_v32 = vld [vmem:[%s10434_s1 + $0x3ac] sm:$0xf0]  ;;  %v4662_v34 = vor.u32 %v6585_v30, %v4661_v28  ;;  %3168 = vmatpush.bf16.msra.mxu0 %v4406_v29 }
   0xd   :  { %v4389_v35 = vld [vmem:[%s10434_s1 + $0x80] sm:$0xf]  ;;  %v6517_v36 = vld [vmem:[%s10434_s1 + $0x8c] sm:$0xf0]  ;;  %v4790_v38 = vor.u32 %v6617_v32, %v4789_v31  ;;  %3181 = vmatpush.bf16.msra.mxu1 %v4534_v33 }
   0xe   :  { %v4517_v37 = vld [vmem:[%s10434_s1 + $0x180] sm:$0xf]  ;;  %v6549_v39 = vld [vmem:[%s10434_s1 + $0x18c] sm:$0xf0]  ;;  %v4390_v44 = vor.u32 %v6517_v36, %v4389_v35  ;;  %3194 = vmatpush.bf16.msra.mxu2 %v4662_v34 }
   0xf   :  { %v4645_v40 = vld [vmem:[%s10434_s1 + $0x280] sm:$0xf]  ;;  %v6581_v41 = vld [vmem:[%s10434_s1 + $0x28c] sm:$0xf0]  ;;  %v4518_v45 = vor.u32 %v6549_v39, %v4517_v37  ;;  %3207 = vmatpush.bf16.msra.mxu3 %v4790_v38 }
  0x10   :  { %v4773_v42 = vld [vmem:[%s10434_s1 + $0x380] sm:$0xf]  ;;  %v6613_v43 = vld [vmem:[%s10434_s1 + $0x38c] sm:$0xf0]  ;;  %v4646_v46 = vor.u32 %v6581_v41, %v4645_v40  ;;  %3169 = vmatpush.bf16.msra.mxu0 %v4390_v44 }
  0x11   :  { %v4373_v47 = vld [vmem:[%s10434_s1 + $0x60] sm:$0xf]  ;;  %v6513_v48 = vld [vmem:[%s10434_s1 + $0x6c] sm:$0xf0]  ;;  %v4774_v50 = vor.u32 %v6613_v43, %v4773_v42  ;;  %3182 = vmatpush.bf16.msra.mxu1 %v4518_v45 }
  0x12   :  { %v4501_v49 = vld [vmem:[%s10434_s1 + $0x160] sm:$0xf]  ;;  %v6545_v51 = vld [vmem:[%s10434_s1 + $0x16c] sm:$0xf0]  ;;  %v4374_v56 = vor.u32 %v6513_v48, %v4373_v47  ;;  %3195 = vmatpush.bf16.msra.mxu2 %v4646_v46 }
  0x13   :  { %v4629_v52 = vld [vmem:[%s10434_s1 + $0x260] sm:$0xf]  ;;  %v6577_v53 = vld [vmem:[%s10434_s1 + $0x26c] sm:$0xf0]  ;;  %v4502_v57 = vor.u32 %v6545_v51, %v4501_v49  ;;  %3208 = vmatpush.bf16.msra.mxu3 %v4774_v50 }
  0x14   :  { %v4757_v54 = vld [vmem:[%s10434_s1 + $0x360] sm:$0xf]  ;;  %v6609_v55 = vld [vmem:[%s10434_s1 + $0x36c] sm:$0xf0]  ;;  %v4630_v58 = vor.u32 %v6577_v53, %v4629_v52  ;;  %3170 = vmatpush.bf16.msra.mxu0 %v4374_v56 }
  0x15   :  { %v4357_v59 = vld [vmem:[%s10434_s1 + $0x40] sm:$0xf]  ;;  %v6509_v60 = vld [vmem:[%s10434_s1 + $0x4c] sm:$0xf0]  ;;  %v4758_v62 = vor.u32 %v6609_v55, %v4757_v54  ;;  %3183 = vmatpush.bf16.msra.mxu1 %v4502_v57 }
  0x16   :  { %v4485_v61 = vld [vmem:[%s10434_s1 + $0x140] sm:$0xf]  ;;  %v6541_v63 = vld [vmem:[%s10434_s1 + $0x14c] sm:$0xf0]  ;;  %v4358_v4 = vor.u32 %v6509_v60, %v4357_v59  ;;  %3196 = vmatpush.bf16.msra.mxu2 %v4630_v58 }
  0x17   :  { %v4613_v0 = vld [vmem:[%s10434_s1 + $0x240] sm:$0xf]  ;;  %v6573_v1 = vld [vmem:[%s10434_s1 + $0x24c] sm:$0xf0]  ;;  %v4486_v5 = vor.u32 %v6541_v63, %v4485_v61  ;;  %3209 = vmatpush.bf16.msra.mxu3 %v4758_v62 }
  0x18   :  { %v4741_v2 = vld [vmem:[%s10434_s1 + $0x340] sm:$0xf]  ;;  %v6605_v3 = vld [vmem:[%s10434_s1 + $0x34c] sm:$0xf0]  ;;  %v4614_v6 = vor.u32 %v6573_v1, %v4613_v0  ;;  %3171 = vmatpush.bf16.msra.mxu0 %v4358_v4 }
  0x19   :  { %v4341_v7 = vld [vmem:[%s10434_s1 + $0x20] sm:$0xf]  ;;  %v6505_v8 = vld [vmem:[%s10434_s1 + $0x2c] sm:$0xf0]  ;;  %v4742_v10 = vor.u32 %v6605_v3, %v4741_v2  ;;  %3184 = vmatpush.bf16.msra.mxu1 %v4486_v5  ;;  %v21_v2 = vld [vmem:[%s10435_s0 + $0x8] sm:$0xff] }
  0x1a   :  { %v4469_v9 = vld [vmem:[%s10434_s1 + $0x120] sm:$0xf]  ;;  %v6537_v11 = vld [vmem:[%s10434_s1 + $0x12c] sm:$0xf0]  ;;  %v4342_v16 = vor.u32 %v6505_v8, %v4341_v7  ;;  %3197 = vmatpush.bf16.msra.mxu2 %v4614_v6  ;;  %v560_v8 = vunpack.c.l.b16 %v21_v2 }
  0x1b   :  { %v4597_v12 = vld [vmem:[%s10434_s1 + $0x220] sm:$0xf]  ;;  %v6569_v13 = vld [vmem:[%s10434_s1 + $0x22c] sm:$0xf0]  ;;  %v4470_v19 = vor.u32 %v6537_v11, %v4469_v9  ;;  %3210 = vmatpush.bf16.msra.mxu3 %v4742_v10  ;;  %v561_v10 = vunpack.c.h.b16 %v21_v2 }
  0x1c   :  { %v4725_v14 = vld [vmem:[%s10434_s1 + $0x320] sm:$0xf]  ;;  %v6601_v15 = vld [vmem:[%s10434_s1 + $0x32c] sm:$0xf0]  ;;  %v4598_v20 = vor.u32 %v6569_v13, %v4597_v12  ;;  %3172 = vmatpush.bf16.msra.mxu0 %v4342_v16 }
  0x1d   :  { %v4325_v17 = vld [vmem:[%s10434_s1] sm:$0xf]  ;;  %v6501_v18 = vld [vmem:[%s10434_s1 + $0xc] sm:$0xf0]  ;;  %v4726_v24 = vor.u32 %v6601_v15, %v4725_v14  ;;  %3185 = vmatpush.bf16.msra.mxu1 %v4470_v19 }
  0x1e   :  { %v4453_v21 = vld [vmem:[%s10434_s1 + $0x100] sm:$0xf]  ;;  %v6533_v22 = vld [vmem:[%s10434_s1 + $0x10c] sm:$0xf0]  ;;  %v4326_v31 = vor.u32 %v6501_v18, %v4325_v17  ;;  %3198 = vmatpush.bf16.msra.mxu2 %v4598_v20  ;;  %v7370_v18 = vpack.c.b16 %v560_v8, %v560_v8  ;;  %v7374_v20 = vpack.c.b16 %v561_v10, %v561_v10 }
  0x1f   :  { %v4581_v23 = vld [vmem:[%s10434_s1 + $0x200] sm:$0xf]  ;;  %v6565_v25 = vld [vmem:[%s10434_s1 + $0x20c] sm:$0xf0]  ;;  %v4454_v35 = vor.u32 %v6533_v22, %v4453_v21  ;;  %3211 = vmatpush.bf16.msra.mxu3 %v4726_v24 }
  0x20   :  { %v4709_v26 = vld [vmem:[%s10434_s1 + $0x300] sm:$0xf]  ;;  %v6597_v27 = vld [vmem:[%s10434_s1 + $0x30c] sm:$0xf0]  ;;  %v4582_v36 = vor.u32 %v6565_v25, %v4581_v23  ;;  %3173 = vmatpush.bf16.msra.mxu0 %v4326_v31 }
  0x21   :  { %v4949_v28 = vld [vmem:[%s10434_s1 + $0x4e0] sm:$0xf]  ;;  %v6657_v29 = vld [vmem:[%s10434_s1 + $0x4ec] sm:$0xf0]  ;;  %v4710_v39 = vor.u32 %v6597_v27, %v4709_v26  ;;  %3186 = vmatpush.bf16.msra.mxu1 %v4454_v35 }
  0x22   :  { %v5077_v30 = vld [vmem:[%s10434_s1 + $0x5e0] sm:$0xf]  ;;  %v6689_v32 = vld [vmem:[%s10434_s1 + $0x5ec] sm:$0xf0]  ;;  %v4950_v40 = vor.u32 %v6657_v29, %v4949_v28  ;;  %3199 = vmatpush.bf16.msra.mxu2 %v4582_v36 }
  0x23   :  { %v5205_v33 = vld [vmem:[%s10434_s1 + $0x6e0] sm:$0xf]  ;;  %v6721_v34 = vld [vmem:[%s10434_s1 + $0x6ec] sm:$0xf0]  ;;  %v5078_v41 = vor.u32 %v6689_v32, %v5077_v30  ;;  %3212 = vmatpush.bf16.msra.mxu3 %v4710_v39 }
  0x24   :  { %v5333_v37 = vld [vmem:[%s10434_s1 + $0x7e0] sm:$0xf]  ;;  %v6753_v38 = vld [vmem:[%s10434_s1 + $0x7ec] sm:$0xf0]  ;;  %v5206_v42 = vor.u32 %v6721_v34, %v5205_v33  ;;  %3218 = vmatpush.bf16.msrb.mxu0 %v4950_v40 }
  0x25   :  { %v4933_v43 = vld [vmem:[%s10434_s1 + $0x4c0] sm:$0xf]  ;;  %v6653_v44 = vld [vmem:[%s10434_s1 + $0x4cc] sm:$0xf0]  ;;  %v5334_v46 = vor.u32 %v6753_v38, %v5333_v37  ;;  %3231 = vmatpush.bf16.msrb.mxu1 %v5078_v41  ;;  %3200 = vmatmul.bf16.vlgmr.msra.gmra.mxu2 %v7370_v18 }
  0x26   :  { %v5061_v45 = vld [vmem:[%s10434_s1 + $0x5c0] sm:$0xf]  ;;  %v6685_v47 = vld [vmem:[%s10434_s1 + $0x5cc] sm:$0xf0]  ;;  %v4934_v52 = vor.u32 %v6653_v44, %v4933_v43  ;;  %3244 = vmatpush.bf16.msrb.mxu2 %v5206_v42  ;;  %3213 = vmatmul.bf16.vlgmr.msra.gmra.mxu3 %v7374_v20 }
  0x27   :  { %v5189_v48 = vld [vmem:[%s10434_s1 + $0x6c0] sm:$0xf]  ;;  %v6717_v49 = vld [vmem:[%s10434_s1 + $0x6cc] sm:$0xf0]  ;;  %v5062_v54 = vor.u32 %v6685_v47, %v5061_v45  ;;  %3257 = vmatpush.bf16.msrb.mxu3 %v5334_v46 }
  0x28   :  { %v5317_v50 = vld [vmem:[%s10434_s1 + $0x7c0] sm:$0xf]  ;;  %v6749_v51 = vld [vmem:[%s10434_s1 + $0x7cc] sm:$0xf0]  ;;  %v5190_v55 = vor.u32 %v6717_v49, %v5189_v48  ;;  %3219 = vmatpush.bf16.msrb.mxu0 %v4934_v52 }
  0x29   :  { %v4917_v53 = vld [vmem:[%s10434_s1 + $0x4a0] sm:$0xf]  ;;  %v6649_v56 = vld [vmem:[%s10434_s1 + $0x4ac] sm:$0xf0]  ;;  %v5318_v59 = vor.u32 %v6749_v51, %v5317_v50  ;;  %3232 = vmatpush.bf16.msrb.mxu1 %v5062_v54 }
  0x2a   :  { %v5045_v57 = vld [vmem:[%s10434_s1 + $0x5a0] sm:$0xf]  ;;  %v6681_v58 = vld [vmem:[%s10434_s1 + $0x5ac] sm:$0xf0]  ;;  %v4918_v0 = vor.u32 %v6649_v56, %v4917_v53  ;;  %3245 = vmatpush.bf16.msrb.mxu2 %v5190_v55 }
  0x2b   :  { %v5173_v60 = vld [vmem:[%s10434_s1 + $0x6a0] sm:$0xf]  ;;  %v6713_v61 = vld [vmem:[%s10434_s1 + $0x6ac] sm:$0xf0]  ;;  %v5046_v1 = vor.u32 %v6681_v58, %v5045_v57  ;;  %3258 = vmatpush.bf16.msrb.mxu3 %v5318_v59 }
  0x2c   :  { %v5301_v62 = vld [vmem:[%s10434_s1 + $0x7a0] sm:$0xf]  ;;  %v6745_v63 = vld [vmem:[%s10434_s1 + $0x7ac] sm:$0xf0]  ;;  %v5174_v4 = vor.u32 %v6713_v61, %v5173_v60  ;;  %3220 = vmatpush.bf16.msrb.mxu0 %v4918_v0 }
  0x2d   :  { %v20_v3 = vld [vmem:[%s10435_s0] sm:$0xff]  ;;  %v6645_v6 = vld [vmem:[%s10434_s1 + $0x48c] sm:$0xf0]  ;;  %v5302_v11 = vor.u32 %v6745_v63, %v5301_v62  ;;  %3233 = vmatpush.bf16.msrb.mxu1 %v5046_v1 }
  0x2e   :  { %v4901_v5 = vld [vmem:[%s10434_s1 + $0x480] sm:$0xf]  ;;  %v558_v9 = vunpack.c.l.b16 %v20_v3  ;;  %v6677_v12 = vld [vmem:[%s10434_s1 + $0x58c] sm:$0xf0]  ;;  %v559_v15 = vunpack.c.h.b16 %v20_v3  ;;  %3246 = vmatpush.bf16.msrb.mxu2 %v5174_v4  ;;  %v23_v3 = vld [vmem:[%s10435_s0 + $0x18] sm:$0xff] }
  0x2f   :  { %v5029_v7 = vld [vmem:[%s10434_s1 + $0x580] sm:$0xf]  ;;  %v6709_v14 = vld [vmem:[%s10434_s1 + $0x68c] sm:$0xf0]  ;;  %v4902_v21 = vor.u32 %v6645_v6, %v4901_v5  ;;  %3259 = vmatpush.bf16.msrb.mxu3 %v5302_v11 }
  0x30   :  { %v5157_v13 = vld [vmem:[%s10434_s1 + $0x680] sm:$0xf]  ;;  %v6741_v17 = vld [vmem:[%s10434_s1 + $0x78c] sm:$0xf0]  ;;  %v7372_v19 = vpack.c.b16 %v558_v9, %v558_v9  ;;  %v7376_v22 = vpack.c.b16 %v559_v15, %v559_v15  ;;  %v5030_v23 = vor.u32 %v6677_v12, %v5029_v7  ;;  %v564_v15 = vunpack.c.l.b16 %v23_v3 }
  0x31   :  { %v5285_v16 = vld [vmem:[%s10434_s1 + $0x780] sm:$0xf]  ;;  %v5158_v24 = vor.u32 %v6709_v14, %v5157_v13  ;;  %v6641_v26 = vld [vmem:[%s10434_s1 + $0x46c] sm:$0xf0]  ;;  %3221 = vmatpush.bf16.msrb.mxu0 %v4902_v21 }
  0x32   :  { %v4885_v25 = vld [vmem:[%s10434_s1 + $0x460] sm:$0xf]  ;;  %v5286_v28 = vor.u32 %v6741_v17, %v5285_v16  ;;  %v6673_v29 = vld [vmem:[%s10434_s1 + $0x56c] sm:$0xf0]  ;;  %3174 = vmatmul.bf16.vlgmr.msra.gmra.mxu0 %v7372_v19  ;;  %3187 = vmatmul.bf16.vlgmr.msra.gmra.mxu1 %v7376_v22 }
  0x33   :  { %v5013_v27 = vld [vmem:[%s10434_s1 + $0x560] sm:$0xf]  ;;  %v6705_v31 = vld [vmem:[%s10434_s1 + $0x66c] sm:$0xf0]  ;;  %v4886_v34 = vor.u32 %v6641_v26, %v4885_v25  ;;  %3234 = vmatpush.bf16.msrb.mxu1 %v5030_v23  ;;  %3247 = vmatpush.bf16.msrb.mxu2 %v5158_v24  ;;  %v565_v25 = vunpack.c.h.b16 %v23_v3 }
  0x34   :  { %v5141_v30 = vld [vmem:[%s10434_s1 + $0x660] sm:$0xf]  ;;  %v6737_v33 = vld [vmem:[%s10434_s1 + $0x76c] sm:$0xf0]  ;;  %v5014_v35 = vor.u32 %v6673_v29, %v5013_v27  ;;  %3260 = vmatpush.bf16.msrb.mxu3 %v5286_v28 }
  0x35   :  { %v5269_v32 = vld [vmem:[%s10434_s1 + $0x760] sm:$0xf]  ;;  %v5142_v36 = vor.u32 %v6705_v31, %v5141_v30  ;;  %v6637_v38 = vld [vmem:[%s10434_s1 + $0x44c] sm:$0xf0]  ;;  %3222 = vmatpush.bf16.msrb.mxu0 %v4886_v34 }
  0x36   :  { %v4869_v37 = vld [vmem:[%s10434_s1 + $0x440] sm:$0xf]  ;;  %v5270_v40 = vor.u32 %v6737_v33, %v5269_v32  ;;  %v6669_v41 = vld [vmem:[%s10434_s1 + $0x54c] sm:$0xf0] }
  0x37   :  { %v4997_v39 = vld [vmem:[%s10434_s1 + $0x540] sm:$0xf]  ;;  %v6701_v43 = vld [vmem:[%s10434_s1 + $0x64c] sm:$0xf0]  ;;  %v4870_v46 = vor.u32 %v6637_v38, %v4869_v37  ;;  %3235 = vmatpush.bf16.msrb.mxu1 %v5014_v35  ;;  %3248 = vmatpush.bf16.msrb.mxu2 %v5142_v36  ;;  %v7526_v38 = vpack.c.b16 %v564_v15, %v564_v15 }
  0x38   :  { %v5125_v42 = vld [vmem:[%s10434_s1 + $0x640] sm:$0xf]  ;;  %v6733_v45 = vld [vmem:[%s10434_s1 + $0x74c] sm:$0xf0]  ;;  %v4998_v47 = vor.u32 %v6669_v41, %v4997_v39  ;;  %3261 = vmatpush.bf16.msrb.mxu3 %v5270_v40 }
  0x39   :  { %v5253_v44 = vld [vmem:[%s10434_s1 + $0x740] sm:$0xf]  ;;  %v5126_v48 = vor.u32 %v6701_v43, %v5125_v42  ;;  %v6633_v50 = vld [vmem:[%s10434_s1 + $0x42c] sm:$0xf0]  ;;  %3223 = vmatpush.bf16.msrb.mxu0 %v4870_v46  ;;  %v7536_v42 = vpack.c.b16 %v565_v25, %v565_v25 }
  0x3a   :  { %v4853_v49 = vld [vmem:[%s10434_s1 + $0x420] sm:$0xf]  ;;  %v5254_v52 = vor.u32 %v6733_v45, %v5253_v44  ;;  %v6665_v53 = vld [vmem:[%s10434_s1 + $0x52c] sm:$0xf0] }
  0x3b   :  { %v4981_v51 = vld [vmem:[%s10434_s1 + $0x520] sm:$0xf]  ;;  %v6697_v55 = vld [vmem:[%s10434_s1 + $0x62c] sm:$0xf0]  ;;  %v4854_v59 = vor.u32 %v6633_v50, %v4853_v49  ;;  %3236 = vmatpush.bf16.msrb.mxu1 %v4998_v47  ;;  %3249 = vmatpush.bf16.msrb.mxu2 %v5126_v48 }
  0x3c   :  { %v5109_v54 = vld [vmem:[%s10434_s1 + $0x620] sm:$0xf]  ;;  %v6729_v57 = vld [vmem:[%s10434_s1 + $0x72c] sm:$0xf0]  ;;  %v4982_v63 = vor.u32 %v6665_v53, %v4981_v51  ;;  %3262 = vmatpush.bf16.msrb.mxu3 %v5254_v52 }
  0x3d   :  { %v5237_v56 = vld [vmem:[%s10434_s1 + $0x720] sm:$0xf]  ;;  %v6629_v60 = vld [vmem:[%s10434_s1 + $0x40c] sm:$0xf0]  ;;  %v5110_v0 = vor.u32 %v6697_v55, %v5109_v54  ;;  %3224 = vmatpush.bf16.msrb.mxu0 %v4854_v59 }
  0x3e   :  { %v4837_v58 = vld [vmem:[%s10434_s1 + $0x400] sm:$0xf]  ;;  %v6661_v62 = vld [vmem:[%s10434_s1 + $0x50c] sm:$0xf0]  ;;  %v5238_v4 = vor.u32 %v6729_v57, %v5237_v56 }
  0x3f   :  { %v4965_v61 = vld [vmem:[%s10434_s1 + $0x500] sm:$0xf]  ;;  %v6693_v2 = vld [vmem:[%s10434_s1 + $0x60c] sm:$0xf0]  ;;  %v4838_v11 = vor.u32 %v6629_v60, %v4837_v58  ;;  %3237 = vmatpush.bf16.msrb.mxu1 %v4982_v63  ;;  %3250 = vmatpush.bf16.msrb.mxu2 %v5110_v0 }
  0x40   :  { %v5093_v1 = vld [vmem:[%s10434_s1 + $0x600] sm:$0xf]  ;;  %v6725_v6 = vld [vmem:[%s10434_s1 + $0x70c] sm:$0xf0]  ;;  %v4966_v16 = vor.u32 %v6661_v62, %v4965_v61  ;;  %3263 = vmatpush.bf16.msrb.mxu3 %v5238_v4 }
  0x41   :  { %v5221_v5 = vld [vmem:[%s10434_s1 + $0x700] sm:$0xf]  ;;  %v22_v7 = vld [vmem:[%s10435_s0 + $0x10] sm:$0xff]  ;;  %v5094_v17 = vor.u32 %v6693_v2, %v5093_v1  ;;  %3225 = vmatpush.bf16.msrb.mxu0 %v4838_v11 }
  0x42   :  { %v5461_v8 = vld [vmem:[%s10434_s1 + $0x8e0] sm:$0xf]  ;;  %v6785_v9 = vld [vmem:[%s10434_s1 + $0x8ec] sm:$0xf0]  ;;  %v562_v24 = vunpack.c.l.b16 %v22_v7  ;;  %v5222_v26 = vor.u32 %v6725_v6, %v5221_v5  ;;  %v563_v28 = vunpack.c.h.b16 %v22_v7 }
  0x43   :  { %v5589_v10 = vld [vmem:[%s10434_s1 + $0x9e0] sm:$0xf]  ;;  %v6817_v12 = vld [vmem:[%s10434_s1 + $0x9ec] sm:$0xf0]  ;;  %v5462_v27 = vor.u32 %v6785_v9, %v5461_v8  ;;  %3238 = vmatpush.bf16.msrb.mxu1 %v4966_v16  ;;  %3251 = vmatpush.bf16.msrb.mxu2 %v5094_v17 }
  0x44   :  { %v5717_v13 = vld [vmem:[%s10434_s1 + $0xae0] sm:$0xf]  ;;  %v6849_v14 = vld [vmem:[%s10434_s1 + $0xaec] sm:$0xf0]  ;;  %v5590_v29 = vor.u32 %v6817_v12, %v5589_v10  ;;  %v7534_v41 = vpack.c.b16 %v562_v24, %v562_v24  ;;  %3264 = vmatpush.bf16.msrb.mxu3 %v5222_v26  ;;  %v7538_v44 = vpack.c.b16 %v563_v28, %v563_v28 }
  0x45   :  { %v5845_v21 = vld [vmem:[%s10434_s1 + $0xbe0] sm:$0xf]  ;;  %v6881_v23 = vld [vmem:[%s10434_s1 + $0xbec] sm:$0xf0]  ;;  %v5718_v30 = vor.u32 %v6849_v14, %v5717_v13  ;;  %3270 = vmatpush.bf16.msra.mxu0 %v5462_v27 }
  0x46   :  { %v5445_v31 = vld [vmem:[%s10434_s1 + $0x8c0] sm:$0xf]  ;;  %v6781_v32 = vld [vmem:[%s10434_s1 + $0x8cc] sm:$0xf0]  ;;  %v5846_v34 = vor.u32 %v6881_v23, %v5845_v21  ;;  %3252 = vmatmul.bf16.vlgmr.msrb.gmra.mxu2 %v7526_v38  ;;  %3226 = vmatmul.bf16.vlgmr.msrb.gmra.mxu0 %v7534_v41 }
  0x47   :  { %v5573_v33 = vld [vmem:[%s10434_s1 + $0x9c0] sm:$0xf]  ;;  %v6813_v35 = vld [vmem:[%s10434_s1 + $0x9cc] sm:$0xf0]  ;;  %v5446_v43 = vor.u32 %v6781_v32, %v5445_v31  ;;  %3283 = vmatpush.bf16.msra.mxu1 %v5590_v29  ;;  %3296 = vmatpush.bf16.msra.mxu2 %v5718_v30 }
  0x48   :  { %v5701_v36 = vld [vmem:[%s10434_s1 + $0xac0] sm:$0xf]  ;;  %v6845_v37 = vld [vmem:[%s10434_s1 + $0xacc] sm:$0xf0]  ;;  %v5574_v45 = vor.u32 %v6813_v35, %v5573_v33  ;;  %3309 = vmatpush.bf16.msra.mxu3 %v5846_v34  ;;  %3239 = vmatmul.bf16.vlgmr.msrb.gmra.mxu1 %v7538_v44 }
  0x49   :  { %v5829_v39 = vld [vmem:[%s10434_s1 + $0xbc0] sm:$0xf]  ;;  %v6877_v40 = vld [vmem:[%s10434_s1 + $0xbcc] sm:$0xf0]  ;;  %v5702_v46 = vor.u32 %v6845_v37, %v5701_v36  ;;  %3265 = vmatmul.bf16.vlgmr.msrb.gmra.mxu3 %v7536_v42  ;;  %3271 = vmatpush.bf16.msra.mxu0 %v5446_v43 }
  0x4a   :  { %v5429_v47 = vld [vmem:[%s10434_s1 + $0x8a0] sm:$0xf]  ;;  %v6777_v48 = vld [vmem:[%s10434_s1 + $0x8ac] sm:$0xf0]  ;;  %v5830_v50 = vor.u32 %v6877_v40, %v5829_v39 }
  0x4b   :  { %v5557_v49 = vld [vmem:[%s10434_s1 + $0x9a0] sm:$0xf]  ;;  %v6809_v51 = vld [vmem:[%s10434_s1 + $0x9ac] sm:$0xf0]  ;;  %v5430_v56 = vor.u32 %v6777_v48, %v5429_v47  ;;  %3284 = vmatpush.bf16.msra.mxu1 %v5574_v45  ;;  %3297 = vmatpush.bf16.msra.mxu2 %v5702_v46 }
  0x4c   :  { %v5685_v52 = vld [vmem:[%s10434_s1 + $0xaa0] sm:$0xf]  ;;  %v6841_v53 = vld [vmem:[%s10434_s1 + $0xaac] sm:$0xf0]  ;;  %v5558_v57 = vor.u32 %v6809_v51, %v5557_v49  ;;  %3310 = vmatpush.bf16.msra.mxu3 %v5830_v50 }
  0x4d   :  { %v5813_v54 = vld [vmem:[%s10434_s1 + $0xba0] sm:$0xf]  ;;  %v6873_v55 = vld [vmem:[%s10434_s1 + $0xbac] sm:$0xf0]  ;;  %v5686_v58 = vor.u32 %v6841_v53, %v5685_v52  ;;  %3272 = vmatpush.bf16.msra.mxu0 %v5430_v56 }
  0x4e   :  { %v5413_v59 = vld [vmem:[%s10434_s1 + $0x880] sm:$0xf]  ;;  %v6773_v60 = vld [vmem:[%s10434_s1 + $0x88c] sm:$0xf0]  ;;  %v5814_v62 = vor.u32 %v6873_v55, %v5813_v54 }
  0x4f   :  { %v5541_v61 = vld [vmem:[%s10434_s1 + $0x980] sm:$0xf]  ;;  %v6805_v63 = vld [vmem:[%s10434_s1 + $0x98c] sm:$0xf0]  ;;  %v5414_v4 = vor.u32 %v6773_v60, %v5413_v59  ;;  %3285 = vmatpush.bf16.msra.mxu1 %v5558_v57  ;;  %3298 = vmatpush.bf16.msra.mxu2 %v5686_v58 }
  0x50   :  { %v5669_v0 = vld [vmem:[%s10434_s1 + $0xa80] sm:$0xf]  ;;  %v6837_v1 = vld [vmem:[%s10434_s1 + $0xa8c] sm:$0xf0]  ;;  %v5542_v5 = vor.u32 %v6805_v63, %v5541_v61  ;;  %3311 = vmatpush.bf16.msra.mxu3 %v5814_v62  ;;  %v25_v61 = vld [vmem:[%s10435_s0 + $0x28] sm:$0xff] }
  0x51   :  { %v5797_v2 = vld [vmem:[%s10434_s1 + $0xb80] sm:$0xf]  ;;  %v6869_v3 = vld [vmem:[%s10434_s1 + $0xb8c] sm:$0xf0]  ;;  %v5670_v6 = vor.u32 %v6837_v1, %v5669_v0  ;;  %3273 = vmatpush.bf16.msra.mxu0 %v5414_v4 }
  0x52   :  { %v5397_v7 = vld [vmem:[%s10434_s1 + $0x860] sm:$0xf]  ;;  %v6769_v8 = vld [vmem:[%s10434_s1 + $0x86c] sm:$0xf0]  ;;  %v5798_v10 = vor.u32 %v6869_v3, %v5797_v2 }
  0x53   :  { %v5525_v9 = vld [vmem:[%s10434_s1 + $0x960] sm:$0xf]  ;;  %v6801_v11 = vld [vmem:[%s10434_s1 + $0x96c] sm:$0xf0]  ;;  %v5398_v16 = vor.u32 %v6769_v8, %v5397_v7  ;;  %3286 = vmatpush.bf16.msra.mxu1 %v5542_v5  ;;  %3299 = vmatpush.bf16.msra.mxu2 %v5670_v6 }
  0x54   :  { %v5653_v12 = vld [vmem:[%s10434_s1 + $0xa60] sm:$0xf]  ;;  %v6833_v13 = vld [vmem:[%s10434_s1 + $0xa6c] sm:$0xf0]  ;;  %v5526_v17 = vor.u32 %v6801_v11, %v5525_v9  ;;  %3312 = vmatpush.bf16.msra.mxu3 %v5798_v10  ;;  %v568_v10 = vunpack.c.l.b16 %v25_v61 }
  0x55   :  { %v5781_v14 = vld [vmem:[%s10434_s1 + $0xb60] sm:$0xf]  ;;  %v6865_v15 = vld [vmem:[%s10434_s1 + $0xb6c] sm:$0xf0]  ;;  %v5654_v21 = vor.u32 %v6833_v13, %v5653_v12  ;;  %3274 = vmatpush.bf16.msra.mxu0 %v5398_v16 }
  0x56   :  { %v5381_v23 = vld [vmem:[%s10434_s1 + $0x840] sm:$0xf]  ;;  %v6765_v24 = vld [vmem:[%s10434_s1 + $0x84c] sm:$0xf0]  ;;  %v5782_v26 = vor.u32 %v6865_v15, %v5781_v14  ;;  %v569_v14 = vunpack.c.h.b16 %v25_v61 }
  0x57   :  { %v5509_v25 = vld [vmem:[%s10434_s1 + $0x940] sm:$0xf]  ;;  %v6797_v27 = vld [vmem:[%s10434_s1 + $0x94c] sm:$0xf0]  ;;  %v5382_v32 = vor.u32 %v6765_v24, %v5381_v23  ;;  %3287 = vmatpush.bf16.msra.mxu1 %v5526_v17  ;;  %3300 = vmatpush.bf16.msra.mxu2 %v5654_v21 }
  0x58   :  { %v5637_v28 = vld [vmem:[%s10434_s1 + $0xa40] sm:$0xf]  ;;  %v6829_v29 = vld [vmem:[%s10434_s1 + $0xa4c] sm:$0xf0]  ;;  %v5510_v33 = vor.u32 %v6797_v27, %v5509_v25  ;;  %3313 = vmatpush.bf16.msra.mxu3 %v5782_v26 }
  0x59   :  { %v5765_v30 = vld [vmem:[%s10434_s1 + $0xb40] sm:$0xf]  ;;  %v6861_v31 = vld [vmem:[%s10434_s1 + $0xb4c] sm:$0xf0]  ;;  %v5638_v34 = vor.u32 %v6829_v29, %v5637_v28  ;;  %3275 = vmatpush.bf16.msra.mxu0 %v5382_v32  ;;  %v7738_v29 = vpack.c.b16 %v568_v10, %v568_v10 }
  0x5a   :  { %v5365_v35 = vld [vmem:[%s10434_s1 + $0x820] sm:$0xf]  ;;  %v6761_v36 = vld [vmem:[%s10434_s1 + $0x82c] sm:$0xf0]  ;;  %v5766_v39 = vor.u32 %v6861_v31, %v5765_v30 }
  0x5b   :  { %v5493_v37 = vld [vmem:[%s10434_s1 + $0x920] sm:$0xf]  ;;  %v6793_v40 = vld [vmem:[%s10434_s1 + $0x92c] sm:$0xf0]  ;;  %v5366_v49 = vor.u32 %v6761_v36, %v5365_v35  ;;  %3288 = vmatpush.bf16.msra.mxu1 %v5510_v33  ;;  %3301 = vmatpush.bf16.msra.mxu2 %v5638_v34  ;;  %v7748_v33 = vpack.c.b16 %v569_v14, %v569_v14 }
  0x5c   :  { %v5621_v43 = vld [vmem:[%s10434_s1 + $0xa20] sm:$0xf]  ;;  %v6825_v45 = vld [vmem:[%s10434_s1 + $0xa2c] sm:$0xf0]  ;;  %v5494_v53 = vor.u32 %v6793_v40, %v5493_v37  ;;  %3314 = vmatpush.bf16.msra.mxu3 %v5766_v39 }
  0x5d   :  { %v5749_v46 = vld [vmem:[%s10434_s1 + $0xb20] sm:$0xf]  ;;  %v6857_v47 = vld [vmem:[%s10434_s1 + $0xb2c] sm:$0xf0]  ;;  %v5622_v54 = vor.u32 %v6825_v45, %v5621_v43  ;;  %3276 = vmatpush.bf16.msra.mxu0 %v5366_v49 }
  0x5e   :  { %v5349_v48 = vld [vmem:[%s10434_s1 + $0x800] sm:$0xf]  ;;  %v6757_v50 = vld [vmem:[%s10434_s1 + $0x80c] sm:$0xf0]  ;;  %v5750_v58 = vor.u32 %v6857_v47, %v5749_v46 }
  0x5f   :  { %v5477_v51 = vld [vmem:[%s10434_s1 + $0x900] sm:$0xf]  ;;  %v6789_v52 = vld [vmem:[%s10434_s1 + $0x90c] sm:$0xf0]  ;;  %v5350_v1 = vor.u32 %v6757_v50, %v5349_v48  ;;  %3289 = vmatpush.bf16.msra.mxu1 %v5494_v53  ;;  %3302 = vmatpush.bf16.msra.mxu2 %v5622_v54 }
  0x60   :  { %v5605_v55 = vld [vmem:[%s10434_s1 + $0xa00] sm:$0xf]  ;;  %v6821_v56 = vld [vmem:[%s10434_s1 + $0xa0c] sm:$0xf0]  ;;  %v5478_v6 = vor.u32 %v6789_v52, %v5477_v51  ;;  %3315 = vmatpush.bf16.msra.mxu3 %v5750_v58 }
  0x61   :  { %v24_v57 = vld [vmem:[%s10435_s0 + $0x20] sm:$0xff]  ;;  %v6853_v60 = vld [vmem:[%s10434_s1 + $0xb0c] sm:$0xf0]  ;;  %v5606_v7 = vor.u32 %v6821_v56, %v5605_v55  ;;  %3277 = vmatpush.bf16.msra.mxu0 %v5350_v1 }
  0x62   :  { %v5733_v59 = vld [vmem:[%s10434_s1 + $0xb00] sm:$0xf]  ;;  %v6913_v63 = vld [vmem:[%s10434_s1 + $0xcec] sm:$0xf0]  ;;  %v566_v5 = vunpack.c.l.b16 %v24_v57  ;;  %v567_v11 = vunpack.c.h.b16 %v24_v57 }
  0x63   :  { %v5973_v62 = vld [vmem:[%s10434_s1 + $0xce0] sm:$0xf]  ;;  %v6945_v2 = vld [vmem:[%s10434_s1 + $0xdec] sm:$0xf0]  ;;  %v5734_v12 = vor.u32 %v6853_v60, %v5733_v59  ;;  %3290 = vmatpush.bf16.msra.mxu1 %v5478_v6  ;;  %3303 = vmatpush.bf16.msra.mxu2 %v5606_v7 }
  0x64   :  { %v6101_v0 = vld [vmem:[%s10434_s1 + $0xde0] sm:$0xf]  ;;  %v6977_v4 = vld [vmem:[%s10434_s1 + $0xeec] sm:$0xf0]  ;;  %v5974_v13 = vor.u32 %v6913_v63, %v5973_v62  ;;  %v7727_v25 = vpack.c.b16 %v566_v5, %v566_v5  ;;  %v7740_v30 = vpack.c.b16 %v567_v11, %v567_v11 }
  0x65   :  { %v6229_v3 = vld [vmem:[%s10434_s1 + $0xee0] sm:$0xf]  ;;  %v7009_v9 = vld [vmem:[%s10434_s1 + $0xfec] sm:$0xf0]  ;;  %v6102_v15 = vor.u32 %v6945_v2, %v6101_v0  ;;  %3316 = vmatpush.bf16.msra.mxu3 %v5734_v12 }
  0x66   :  { %v6357_v8 = vld [vmem:[%s10434_s1 + $0xfe0] sm:$0xf]  ;;  %v6230_v16 = vor.u32 %v6977_v4, %v6229_v3  ;;  %v6909_v21 = vld [vmem:[%s10434_s1 + $0xccc] sm:$0xf0]  ;;  %3322 = vmatpush.bf16.msrb.mxu0 %v5974_v13  ;;  %3304 = vmatmul.bf16.vlgmr.msra.gmra.mxu2 %v7738_v29 }
  0x67   :  { %v5957_v17 = vld [vmem:[%s10434_s1 + $0xcc0] sm:$0xf]  ;;  %v6358_v24 = vor.u32 %v7009_v9, %v6357_v8  ;;  %v6941_v26 = vld [vmem:[%s10434_s1 + $0xdcc] sm:$0xf0]  ;;  %3335 = vmatpush.bf16.msrb.mxu1 %v6102_v15  ;;  %3278 = vmatmul.bf16.vlgmr.msra.gmra.mxu0 %v7727_v25 }
  0x68   :  { %v6085_v23 = vld [vmem:[%s10434_s1 + $0xdc0] sm:$0xf]  ;;  %v6973_v28 = vld [vmem:[%s10434_s1 + $0xecc] sm:$0xf0]  ;;  %v5958_v34 = vor.u32 %v6909_v21, %v5957_v17  ;;  %3348 = vmatpush.bf16.msrb.mxu2 %v6230_v16  ;;  %3291 = vmatmul.bf16.vlgmr.msra.gmra.mxu1 %v7740_v30 }
  0x69   :  { %v6213_v27 = vld [vmem:[%s10434_s1 + $0xec0] sm:$0xf]  ;;  %v7005_v32 = vld [vmem:[%s10434_s1 + $0xfcc] sm:$0xf0]  ;;  %v6086_v35 = vor.u32 %v6941_v26, %v6085_v23  ;;  %3361 = vmatpush.bf16.msrb.mxu3 %v6358_v24 }
  0x6a   :  { %v6341_v31 = vld [vmem:[%s10434_s1 + $0xfc0] sm:$0xf]  ;;  %v6214_v36 = vor.u32 %v6973_v28, %v6213_v27  ;;  %v6905_v39 = vld [vmem:[%s10434_s1 + $0xcac] sm:$0xf0]  ;;  %3317 = vmatmul.bf16.vlgmr.msra.gmra.mxu3 %v7748_v33  ;;  %3323 = vmatpush.bf16.msrb.mxu0 %v5958_v34 }
  0x6b   :  { %v5941_v37 = vld [vmem:[%s10434_s1 + $0xca0] sm:$0xf]  ;;  %v6342_v43 = vor.u32 %v7005_v32, %v6341_v31  ;;  %v6937_v45 = vld [vmem:[%s10434_s1 + $0xdac] sm:$0xf0]  ;;  %3336 = vmatpush.bf16.msrb.mxu1 %v6086_v35 }
  0x6c   :  { %v6069_v40 = vld [vmem:[%s10434_s1 + $0xda0] sm:$0xf]  ;;  %v6969_v47 = vld [vmem:[%s10434_s1 + $0xeac] sm:$0xf0]  ;;  %v5942_v50 = vor.u32 %v6905_v39, %v5941_v37  ;;  %3349 = vmatpush.bf16.msrb.mxu2 %v6214_v36 }
  0x6d   :  { %v6197_v46 = vld [vmem:[%s10434_s1 + $0xea0] sm:$0xf]  ;;  %v7001_v49 = vld [vmem:[%s10434_s1 + $0xfac] sm:$0xf0]  ;;  %v6070_v51 = vor.u32 %v6937_v45, %v6069_v40  ;;  %3362 = vmatpush.bf16.msrb.mxu3 %v6342_v43 }
  0x6e   :  { %v6325_v48 = vld [vmem:[%s10434_s1 + $0xfa0] sm:$0xf]  ;;  %v6198_v52 = vor.u32 %v6969_v47, %v6197_v46  ;;  %v6901_v54 = vld [vmem:[%s10434_s1 + $0xc8c] sm:$0xf0]  ;;  %3324 = vmatpush.bf16.msrb.mxu0 %v5942_v50 }
  0x6f   :  { %v5925_v53 = vld [vmem:[%s10434_s1 + $0xc80] sm:$0xf]  ;;  %v6326_v56 = vor.u32 %v7001_v49, %v6325_v48  ;;  %v6933_v57 = vld [vmem:[%s10434_s1 + $0xd8c] sm:$0xf0]  ;;  %3337 = vmatpush.bf16.msrb.mxu1 %v6070_v51 }
  0x70   :  { %v6053_v55 = vld [vmem:[%s10434_s1 + $0xd80] sm:$0xf]  ;;  %v6965_v59 = vld [vmem:[%s10434_s1 + $0xe8c] sm:$0xf0]  ;;  %v5926_v62 = vor.u32 %v6901_v54, %v5925_v53  ;;  %3350 = vmatpush.bf16.msrb.mxu2 %v6198_v52 }
  0x71   :  { %v6181_v58 = vld [vmem:[%s10434_s1 + $0xe80] sm:$0xf]  ;;  %v6997_v61 = vld [vmem:[%s10434_s1 + $0xf8c] sm:$0xf0]  ;;  %v6054_v63 = vor.u32 %v6933_v57, %v6053_v55  ;;  %3363 = vmatpush.bf16.msrb.mxu3 %v6326_v56 }
  0x72   :  { %v6309_v60 = vld [vmem:[%s10434_s1 + $0xf80] sm:$0xf]  ;;  %v6182_v0 = vor.u32 %v6965_v59, %v6181_v58  ;;  %v6897_v2 = vld [vmem:[%s10434_s1 + $0xc6c] sm:$0xf0]  ;;  %3325 = vmatpush.bf16.msrb.mxu0 %v5926_v62  ;;  %v27_v59 = vld [vmem:[%s10435_s0 + $0x38] sm:$0xff] }
  0x73   :  { %v5909_v1 = vld [vmem:[%s10434_s1 + $0xc60] sm:$0xf]  ;;  %v6310_v4 = vor.u32 %v6997_v61, %v6309_v60  ;;  %v6929_v5 = vld [vmem:[%s10434_s1 + $0xd6c] sm:$0xf0]  ;;  %3338 = vmatpush.bf16.msrb.mxu1 %v6054_v63  ;;  %v6527_v60 = vld [vmem:[%s10434_s1 + $0xe4] sm:$0xf] }
  0x74   :  { %v6037_v3 = vld [vmem:[%s10434_s1 + $0xd60] sm:$0xf]  ;;  %v6961_v7 = vld [vmem:[%s10434_s1 + $0xe6c] sm:$0xf0]  ;;  %v5910_v10 = vor.u32 %v6897_v2, %v5909_v1  ;;  %3351 = vmatpush.bf16.msrb.mxu2 %v6182_v0  ;;  %v4439_v61 = vld [vmem:[%s10434_s1 + $0xf0] sm:$0xf0] }
  0x75   :  { %v6165_v6 = vld [vmem:[%s10434_s1 + $0xe60] sm:$0xf]  ;;  %v6993_v9 = vld [vmem:[%s10434_s1 + $0xf6c] sm:$0xf0]  ;;  %v6038_v11 = vor.u32 %v6929_v5, %v6037_v3  ;;  %3364 = vmatpush.bf16.msrb.mxu3 %v6310_v4  ;;  %v6559_v62 = vld [vmem:[%s10434_s1 + $0x1e4] sm:$0xf] }
  0x76   :  { %v6293_v8 = vld [vmem:[%s10434_s1 + $0xf60] sm:$0xf]  ;;  %v6166_v12 = vor.u32 %v6961_v7, %v6165_v6  ;;  %v6893_v14 = vld [vmem:[%s10434_s1 + $0xc4c] sm:$0xf0]  ;;  %3326 = vmatpush.bf16.msrb.mxu0 %v5910_v10  ;;  %v4567_v0 = vld [vmem:[%s10434_s1 + $0x1f0] sm:$0xf0] }
  0x77   :  { %v5893_v13 = vld [vmem:[%s10434_s1 + $0xc40] sm:$0xf]  ;;  %v6294_v16 = vor.u32 %v6993_v9, %v6293_v8  ;;  %v6925_v17 = vld [vmem:[%s10434_s1 + $0xd4c] sm:$0xf0]  ;;  %3339 = vmatpush.bf16.msrb.mxu1 %v6038_v11  ;;  %v6591_v1 = vld [vmem:[%s10434_s1 + $0x2e4] sm:$0xf]  ;;  %v572_v8 = vunpack.c.l.b16 %v27_v59  ;;  %v4442_v11 = vor.u32 %v6527_v60, %v4439_v61 }
  0x78   :  { %v6021_v15 = vld [vmem:[%s10434_s1 + $0xd40] sm:$0xf]  ;;  %v6957_v23 = vld [vmem:[%s10434_s1 + $0xe4c] sm:$0xf0]  ;;  %v5894_v27 = vor.u32 %v6893_v14, %v5893_v13  ;;  %3352 = vmatpush.bf16.msrb.mxu2 %v6166_v12  ;;  %v4695_v2 = vld [vmem:[%s10434_s1 + $0x2f0] sm:$0xf0]  ;;  %v573_v12 = vunpack.c.h.b16 %v27_v59  ;;  %v4570_v13 = vor.u32 %v6559_v62, %v4567_v0 }
  0x79   :  { %v6149_v21 = vld [vmem:[%s10434_s1 + $0xe40] sm:$0xf]  ;;  %v6989_v26 = vld [vmem:[%s10434_s1 + $0xf4c] sm:$0xf0]  ;;  %v6022_v28 = vor.u32 %v6925_v17, %v6021_v15  ;;  %3365 = vmatpush.bf16.msrb.mxu3 %v6294_v16  ;;  %v6623_v6 = vld [vmem:[%s10434_s1 + $0x3e4] sm:$0xf]  ;;  %v4698_v14 = vor.u32 %v6591_v1, %v4695_v2 }
  0x7a   :  { %v6277_v24 = vld [vmem:[%s10434_s1 + $0xf40] sm:$0xf]  ;;  %v6150_v31 = vor.u32 %v6957_v23, %v6149_v21  ;;  %v6889_v34 = vld [vmem:[%s10434_s1 + $0xc2c] sm:$0xf0]  ;;  %3327 = vmatpush.bf16.msrb.mxu0 %v5894_v27  ;;  %v4823_v7 = vld [vmem:[%s10434_s1 + $0x3f0] sm:$0xf0] }
  0x7b   :  { %v5877_v32 = vld [vmem:[%s10434_s1 + $0xc20] sm:$0xf]  ;;  %v6278_v36 = vor.u32 %v6989_v26, %v6277_v24  ;;  %v6921_v37 = vld [vmem:[%s10434_s1 + $0xd2c] sm:$0xf0]  ;;  %3340 = vmatpush.bf16.msrb.mxu1 %v6022_v28  ;;  %v6523_v15 = vld [vmem:[%s10434_s1 + $0xc4] sm:$0xf]  ;;  %v4826_v21 = vor.u32 %v6623_v6, %v4823_v7  ;;  %v7948_v28 = vpack.c.b16 %v572_v8, %v572_v8 }
  0x7c   :  { %v6005_v35 = vld [vmem:[%s10434_s1 + $0xd20] sm:$0xf]  ;;  %v6953_v40 = vld [vmem:[%s10434_s1 + $0xe2c] sm:$0xf0]  ;;  %v5878_v47 = vor.u32 %v6889_v34, %v5877_v32  ;;  %3353 = vmatpush.bf16.msrb.mxu2 %v6150_v31  ;;  %v4423_v16 = vld [vmem:[%s10434_s1 + $0xd0] sm:$0xf0] }
  0x7d   :  { %v6133_v39 = vld [vmem:[%s10434_s1 + $0xe20] sm:$0xf]  ;;  %v6985_v45 = vld [vmem:[%s10434_s1 + $0xf2c] sm:$0xf0]  ;;  %v6006_v51 = vor.u32 %v6921_v37, %v6005_v35  ;;  %3366 = vmatpush.bf16.msrb.mxu3 %v6278_v36  ;;  %v6555_v17 = vld [vmem:[%s10434_s1 + $0x1c4] sm:$0xf]  ;;  %v7958_v35 = vpack.c.b16 %v573_v12, %v573_v12  ;;  %v4426_v36 = vor.u32 %v6523_v15, %v4423_v16 }
  0x7e   :  { %v6261_v43 = vld [vmem:[%s10434_s1 + $0xf20] sm:$0xf]  ;;  %v6885_v48 = vld [vmem:[%s10434_s1 + $0xc0c] sm:$0xf0]  ;;  %v6134_v52 = vor.u32 %v6953_v40, %v6133_v39  ;;  %3328 = vmatpush.bf16.msrb.mxu0 %v5878_v47  ;;  %v4551_v24 = vld [vmem:[%s10434_s1 + $0x1d0] sm:$0xf0] }
  0x7f   :  { %v5861_v46 = vld [vmem:[%s10434_s1 + $0xc00] sm:$0xf]  ;;  %v6917_v50 = vld [vmem:[%s10434_s1 + $0xd0c] sm:$0xf0]  ;;  %v6262_v56 = vor.u32 %v6985_v45, %v6261_v43  ;;  %3341 = vmatpush.bf16.msrb.mxu1 %v6006_v51  ;;  %v6587_v26 = vld [vmem:[%s10434_s1 + $0x2c4] sm:$0xf]  ;;  %v4554_v37 = vor.u32 %v6555_v17, %v4551_v24 }
  0x80   :  { %v5989_v49 = vld [vmem:[%s10434_s1 + $0xd00] sm:$0xf]  ;;  %v6949_v54 = vld [vmem:[%s10434_s1 + $0xe0c] sm:$0xf0]  ;;  %v5862_v63 = vor.u32 %v6885_v48, %v5861_v46  ;;  %3354 = vmatpush.bf16.msrb.mxu2 %v6134_v52  ;;  %v4679_v27 = vld [vmem:[%s10434_s1 + $0x2d0] sm:$0xf0] }
  0x81   :  { %v6117_v53 = vld [vmem:[%s10434_s1 + $0xe00] sm:$0xf]  ;;  %v26_v55 = vld [vmem:[%s10435_s0 + $0x30] sm:$0xff]  ;;  %v5990_v4 = vor.u32 %v6917_v50, %v5989_v49  ;;  %3367 = vmatpush.bf16.msrb.mxu3 %v6262_v56  ;;  %v6619_v32 = vld [vmem:[%s10434_s1 + $0x3c4] sm:$0xf]  ;;  %v4682_v39 = vor.u32 %v6587_v26, %v4679_v27 }
  0x82   :  { %v6245_v57 = vld [vmem:[%s10434_s1 + $0xf00] sm:$0xf]  ;;  %v6981_v58 = vld [vmem:[%s10434_s1 + $0xf0c] sm:$0xf0]  ;;  %v570_v3 = vunpack.c.l.b16 %v26_v55  ;;  %v6118_v5 = vor.u32 %v6949_v54, %v6117_v53  ;;  %v571_v9 = vunpack.c.h.b16 %v26_v55  ;;  %3329 = vmatpush.bf16.msrb.mxu0 %v5862_v63  ;;  %v4807_v34 = vld [vmem:[%s10434_s1 + $0x3d0] sm:$0xf0] }
  0x83   :  { %v6246_v10 = vor.u32 %v6981_v58, %v6245_v57  ;;  %3342 = vmatpush.bf16.msrb.mxu1 %v5990_v4  ;;  %v6519_v40 = vld [vmem:[%s10434_s1 + $0xa4] sm:$0xf]  ;;  %v4407_v43 = vld [vmem:[%s10434_s1 + $0xb0] sm:$0xf0]  ;;  %v4810_v46 = vor.u32 %v6619_v32, %v4807_v34 }
  0x84   :  { %v7937_v23 = vpack.c.b16 %v570_v3, %v570_v3  ;;  %3355 = vmatpush.bf16.msrb.mxu2 %v6118_v5  ;;  %v7950_v31 = vpack.c.b16 %v571_v9, %v571_v9  ;;  %v6551_v45 = vld [vmem:[%s10434_s1 + $0x1a4] sm:$0xf]  ;;  %v4535_v47 = vld [vmem:[%s10434_s1 + $0x1b0] sm:$0xf0]  ;;  %v4410_v52 = vor.u32 %v6519_v40, %v4407_v43 }
  0x85   :  { %3368 = vmatpush.bf16.msrb.mxu3 %v6246_v10  ;;  %v6583_v48 = vld [vmem:[%s10434_s1 + $0x2a4] sm:$0xf]  ;;  %v4663_v49 = vld [vmem:[%s10434_s1 + $0x2b0] sm:$0xf0]  ;;  %v4538_v53 = vor.u32 %v6551_v45, %v4535_v47 }
  0x86   :  { %3374 = vmatpush.bf16.msra.mxu0 %v4442_v11  ;;  %3343 = vmatmul.bf16.vlgmr.msrb.gmra.mxu1 %v7950_v31  ;;  %v6615_v50 = vld [vmem:[%s10434_s1 + $0x3a4] sm:$0xf]  ;;  %v4791_v51 = vld [vmem:[%s10434_s1 + $0x3b0] sm:$0xf0]  ;;  %v4666_v54 = vor.u32 %v6583_v48, %v4663_v49 }
  0x87   :  { %3387 = vmatpush.bf16.msra.mxu1 %v4570_v13  ;;  %3330 = vmatmul.bf16.vlgmr.msrb.gmra.mxu0 %v7937_v23  ;;  %v6515_v55 = vld [vmem:[%s10434_s1 + $0x84] sm:$0xf]  ;;  %v4391_v56 = vld [vmem:[%s10434_s1 + $0x90] sm:$0xf0]  ;;  %v4794_v58 = vor.u32 %v6615_v50, %v4791_v51 }
  0x88   :  { %3400 = vmatpush.bf16.msra.mxu2 %v4698_v14  ;;  %3369 = vmatmul.bf16.vlgmr.msrb.gmra.mxu3 %v7958_v35  ;;  %v6547_v57 = vld [vmem:[%s10434_s1 + $0x184] sm:$0xf]  ;;  %v4519_v59 = vld [vmem:[%s10434_s1 + $0x190] sm:$0xf0]  ;;  %v4394_v0 = vor.u32 %v6515_v55, %v4391_v56 }
  0x89   :  { %3413 = vmatpush.bf16.msra.mxu3 %v4826_v21  ;;  %3356 = vmatmul.bf16.vlgmr.msrb.gmra.mxu2 %v7948_v28  ;;  %v6579_v60 = vld [vmem:[%s10434_s1 + $0x284] sm:$0xf]  ;;  %v4647_v61 = vld [vmem:[%s10434_s1 + $0x290] sm:$0xf0]  ;;  %v4522_v1 = vor.u32 %v6547_v57, %v4519_v59 }
  0x8a   :  { %3375 = vmatpush.bf16.msra.mxu0 %v4426_v36  ;;  %v6611_v62 = vld [vmem:[%s10434_s1 + $0x384] sm:$0xf]  ;;  %v4775_v63 = vld [vmem:[%s10434_s1 + $0x390] sm:$0xf0]  ;;  %v4650_v2 = vor.u32 %v6579_v60, %v4647_v61 }
  0x8b   :  { %3388 = vmatpush.bf16.msra.mxu1 %v4554_v37  ;;  %v6511_v3 = vld [vmem:[%s10434_s1 + $0x64] sm:$0xf]  ;;  %v4375_v4 = vld [vmem:[%s10434_s1 + $0x70] sm:$0xf0]  ;;  %v4778_v6 = vor.u32 %v6611_v62, %v4775_v63 }
  0x8c   :  { %3401 = vmatpush.bf16.msra.mxu2 %v4682_v39  ;;  %v6543_v5 = vld [vmem:[%s10434_s1 + $0x164] sm:$0xf]  ;;  %v4503_v7 = vld [vmem:[%s10434_s1 + $0x170] sm:$0xf0]  ;;  %v4378_v12 = vor.u32 %v6511_v3, %v4375_v4 }
  0x8d   :  { %3414 = vmatpush.bf16.msra.mxu3 %v4810_v46  ;;  %v6575_v8 = vld [vmem:[%s10434_s1 + $0x264] sm:$0xf]  ;;  %v4631_v9 = vld [vmem:[%s10434_s1 + $0x270] sm:$0xf0]  ;;  %v4506_v13 = vor.u32 %v6543_v5, %v4503_v7 }
  0x8e   :  { %3376 = vmatpush.bf16.msra.mxu0 %v4410_v52  ;;  %v6607_v10 = vld [vmem:[%s10434_s1 + $0x364] sm:$0xf]  ;;  %v4759_v11 = vld [vmem:[%s10434_s1 + $0x370] sm:$0xf0]  ;;  %v4634_v14 = vor.u32 %v6575_v8, %v4631_v9 }
  0x8f   :  { %3389 = vmatpush.bf16.msra.mxu1 %v4538_v53  ;;  %v6507_v15 = vld [vmem:[%s10434_s1 + $0x44] sm:$0xf]  ;;  %v4359_v16 = vld [vmem:[%s10434_s1 + $0x50] sm:$0xf0]  ;;  %v4762_v21 = vor.u32 %v6607_v10, %v4759_v11 }
  0x90   :  { %3402 = vmatpush.bf16.msra.mxu2 %v4666_v54  ;;  %v6539_v17 = vld [vmem:[%s10434_s1 + $0x144] sm:$0xf]  ;;  %v4487_v24 = vld [vmem:[%s10434_s1 + $0x150] sm:$0xf0]  ;;  %v4362_v36 = vor.u32 %v6507_v15, %v4359_v16 }
  0x91   :  { %3415 = vmatpush.bf16.msra.mxu3 %v4794_v58  ;;  %v6571_v26 = vld [vmem:[%s10434_s1 + $0x244] sm:$0xf]  ;;  %v4615_v27 = vld [vmem:[%s10434_s1 + $0x250] sm:$0xf0]  ;;  %v4490_v37 = vor.u32 %v6539_v17, %v4487_v24 }
  0x92   :  { %3377 = vmatpush.bf16.msra.mxu0 %v4394_v0  ;;  %v6603_v32 = vld [vmem:[%s10434_s1 + $0x344] sm:$0xf]  ;;  %v4743_v34 = vld [vmem:[%s10434_s1 + $0x350] sm:$0xf0]  ;;  %v4618_v39 = vor.u32 %v6571_v26, %v4615_v27 }
  0x93   :  { %3390 = vmatpush.bf16.msra.mxu1 %v4522_v1  ;;  %v6503_v40 = vld [vmem:[%s10434_s1 + $0x24] sm:$0xf]  ;;  %v4343_v43 = vld [vmem:[%s10434_s1 + $0x30] sm:$0xf0]  ;;  %v4746_v46 = vor.u32 %v6603_v32, %v4743_v34 }
  0x94   :  { %3403 = vmatpush.bf16.msra.mxu2 %v4650_v2  ;;  %v6535_v45 = vld [vmem:[%s10434_s1 + $0x124] sm:$0xf]  ;;  %v4471_v47 = vld [vmem:[%s10434_s1 + $0x130] sm:$0xf0]  ;;  %v4346_v52 = vor.u32 %v6503_v40, %v4343_v43 }
  0x95   :  { %3416 = vmatpush.bf16.msra.mxu3 %v4778_v6  ;;  %v6567_v48 = vld [vmem:[%s10434_s1 + $0x224] sm:$0xf]  ;;  %v4599_v49 = vld [vmem:[%s10434_s1 + $0x230] sm:$0xf0]  ;;  %v4474_v55 = vor.u32 %v6535_v45, %v4471_v47 }
  0x96   :  { %3378 = vmatpush.bf16.msra.mxu0 %v4378_v12  ;;  %v6599_v50 = vld [vmem:[%s10434_s1 + $0x324] sm:$0xf]  ;;  %v4727_v51 = vld [vmem:[%s10434_s1 + $0x330] sm:$0xf0]  ;;  %v4602_v56 = vor.u32 %v6567_v48, %v4599_v49 }
  0x97   :  { %3391 = vmatpush.bf16.msra.mxu1 %v4506_v13  ;;  %v6499_v53 = vld [vmem:[%s10434_s1 + $0x4] sm:$0xf]  ;;  %v4327_v54 = vld [vmem:[%s10434_s1 + $0x10] sm:$0xf0]  ;;  %v4730_v60 = vor.u32 %v6599_v50, %v4727_v51 }
  0x98   :  { %3404 = vmatpush.bf16.msra.mxu2 %v4634_v14  ;;  %v6531_v57 = vld [vmem:[%s10434_s1 + $0x104] sm:$0xf]  ;;  %v4455_v58 = vld [vmem:[%s10434_s1 + $0x110] sm:$0xf0]  ;;  %v4330_v3 = vor.u32 %v6499_v53, %v4327_v54 }
  0x99   :  { %3417 = vmatpush.bf16.msra.mxu3 %v4762_v21  ;;  %v6563_v59 = vld [vmem:[%s10434_s1 + $0x204] sm:$0xf]  ;;  %v4583_v61 = vld [vmem:[%s10434_s1 + $0x210] sm:$0xf0]  ;;  %v4458_v7 = vor.u32 %v6531_v57, %v4455_v58 }
  0x9a   :  { %3379 = vmatpush.bf16.msra.mxu0 %v4362_v36  ;;  %v6595_v62 = vld [vmem:[%s10434_s1 + $0x304] sm:$0xf]  ;;  %v4711_v63 = vld [vmem:[%s10434_s1 + $0x310] sm:$0xf0]  ;;  %v4586_v8 = vor.u32 %v6563_v59, %v4583_v61 }
  0x9b   :  { %3392 = vmatpush.bf16.msra.mxu1 %v4490_v37  ;;  %v6655_v0 = vld [vmem:[%s10434_s1 + $0x4e4] sm:$0xf]  ;;  %v4951_v1 = vld [vmem:[%s10434_s1 + $0x4f0] sm:$0xf0]  ;;  %v4714_v11 = vor.u32 %v6595_v62, %v4711_v63 }
  0x9c   :  { %3405 = vmatpush.bf16.msra.mxu2 %v4618_v39  ;;  %v6687_v2 = vld [vmem:[%s10434_s1 + $0x5e4] sm:$0xf]  ;;  %v5079_v4 = vld [vmem:[%s10434_s1 + $0x5f0] sm:$0xf0]  ;;  %v4954_v12 = vor.u32 %v6655_v0, %v4951_v1 }
  0x9d   :  { %3418 = vmatpush.bf16.msra.mxu3 %v4746_v46  ;;  %v6719_v5 = vld [vmem:[%s10434_s1 + $0x6e4] sm:$0xf]  ;;  %v5207_v6 = vld [vmem:[%s10434_s1 + $0x6f0] sm:$0xf0]  ;;  %v5082_v13 = vor.u32 %v6687_v2, %v5079_v4 }
  0x9e   :  { %3380 = vmatpush.bf16.msra.mxu0 %v4346_v52  ;;  %v6751_v9 = vld [vmem:[%s10434_s1 + $0x7e4] sm:$0xf]  ;;  %v5335_v10 = vld [vmem:[%s10434_s1 + $0x7f0] sm:$0xf0]  ;;  %v5210_v14 = vor.u32 %v6719_v5, %v5207_v6 }
  0x9f   :  { %3393 = vmatpush.bf16.msra.mxu1 %v4474_v55  ;;  %v6651_v15 = vld [vmem:[%s10434_s1 + $0x4c4] sm:$0xf]  ;;  %v4935_v16 = vld [vmem:[%s10434_s1 + $0x4d0] sm:$0xf0]  ;;  %v5338_v21 = vor.u32 %v6751_v9, %v5335_v10  ;;  %v540_v10 = vld [vmem:[%s10436_s2] sm:$0xf] }
  0xa0   :  { %3406 = vmatpush.bf16.msra.mxu2 %v4602_v56  ;;  %v6683_v17 = vld [vmem:[%s10434_s1 + $0x5c4] sm:$0xf]  ;;  %v5063_v24 = vld [vmem:[%s10434_s1 + $0x5d0] sm:$0xf0]  ;;  %v4938_v36 = vor.u32 %v6651_v15, %v4935_v16 }
  0xa1   :  { %3419 = vmatpush.bf16.msra.mxu3 %v4730_v60  ;;  %v6715_v26 = vld [vmem:[%s10434_s1 + $0x6c4] sm:$0xf]  ;;  %v5191_v27 = vld [vmem:[%s10434_s1 + $0x6d0] sm:$0xf0]  ;;  %v5066_v37 = vor.u32 %v6683_v17, %v5063_v24  ;;  %v542_v24 = vperm.slane %v540_v10, 0 }
  0xa2   :  { %3381 = vmatpush.bf16.msra.mxu0 %v4330_v3  ;;  %v6747_v32 = vld [vmem:[%s10434_s1 + $0x7c4] sm:$0xf]  ;;  %v5319_v34 = vld [vmem:[%s10434_s1 + $0x7d0] sm:$0xf0]  ;;  %v5194_v39 = vor.u32 %v6715_v26, %v5191_v27 }
  0xa3   :  { %3394 = vmatpush.bf16.msra.mxu1 %v4458_v7  ;;  %v6647_v40 = vld [vmem:[%s10434_s1 + $0x4a4] sm:$0xf]  ;;  %v4919_v43 = vld [vmem:[%s10434_s1 + $0x4b0] sm:$0xf0]  ;;  %v5322_v46 = vor.u32 %v6747_v32, %v5319_v34 }
  0xa4   :  { %3407 = vmatpush.bf16.msra.mxu2 %v4586_v8  ;;  %v6679_v45 = vld [vmem:[%s10434_s1 + $0x5a4] sm:$0xf]  ;;  %v5047_v47 = vld [vmem:[%s10434_s1 + $0x5b0] sm:$0xf0]  ;;  %v4922_v52 = vor.u32 %v6647_v40, %v4919_v43 }
  0xa5   :  { %3420 = vmatpush.bf16.msra.mxu3 %v4714_v11  ;;  %v6711_v48 = vld [vmem:[%s10434_s1 + $0x6a4] sm:$0xf]  ;;  %v5175_v49 = vld [vmem:[%s10434_s1 + $0x6b0] sm:$0xf0]  ;;  %3382 = vmatmul.bf16.vlgmr.msra.gmra.mxu0 %v7372_v19  ;;  %v5050_v53 = vor.u32 %v6679_v45, %v5047_v47 }
  0xa6   :  { %3426 = vmatpush.bf16.msrb.mxu0 %v4954_v12  ;;  %v6743_v50 = vld [vmem:[%s10434_s1 + $0x7a4] sm:$0xf]  ;;  %v5303_v51 = vld [vmem:[%s10434_s1 + $0x7b0] sm:$0xf0]  ;;  %3395 = vmatmul.bf16.vlgmr.msra.gmra.mxu1 %v7376_v22  ;;  %v5178_v54 = vor.u32 %v6711_v48, %v5175_v49 }
  0xa7   :  { %3439 = vmatpush.bf16.msrb.mxu1 %v5082_v13  ;;  %3408 = vmatmul.bf16.vlgmr.msra.gmra.mxu2 %v7370_v18  ;;  %v6643_v55 = vld [vmem:[%s10434_s1 + $0x484] sm:$0xf]  ;;  %v4903_v56 = vld [vmem:[%s10434_s1 + $0x490] sm:$0xf0]  ;;  %v5306_v58 = vor.u32 %v6743_v50, %v5303_v51 }
  0xa8   :  { %3452 = vmatpush.bf16.msrb.mxu2 %v5210_v14  ;;  %3421 = vmatmul.bf16.vlgmr.msra.gmra.mxu3 %v7374_v20  ;;  %v6675_v57 = vld [vmem:[%s10434_s1 + $0x584] sm:$0xf]  ;;  %v5031_v59 = vld [vmem:[%s10434_s1 + $0x590] sm:$0xf0]  ;;  %v4906_v0 = vor.u32 %v6643_v55, %v4903_v56 }
  0xa9   :  { %3465 = vmatpush.bf16.msrb.mxu3 %v5338_v21  ;;  %v6707_v60 = vld [vmem:[%s10434_s1 + $0x684] sm:$0xf]  ;;  %v5159_v61 = vld [vmem:[%s10434_s1 + $0x690] sm:$0xf0]  ;;  %v5034_v2 = vor.u32 %v6675_v57, %v5031_v59 }
  0xaa   :  { %3427 = vmatpush.bf16.msrb.mxu0 %v4938_v36  ;;  %v6739_v62 = vld [vmem:[%s10434_s1 + $0x784] sm:$0xf]  ;;  %v5287_v63 = vld [vmem:[%s10434_s1 + $0x790] sm:$0xf0]  ;;  %v5162_v3 = vor.u32 %v6707_v60, %v5159_v61 }
  0xab   :  { %3440 = vmatpush.bf16.msrb.mxu1 %v5066_v37  ;;  %v6639_v1 = vld [vmem:[%s10434_s1 + $0x464] sm:$0xf]  ;;  %v4887_v4 = vld [vmem:[%s10434_s1 + $0x470] sm:$0xf0]  ;;  %v5290_v7 = vor.u32 %v6739_v62, %v5287_v63 }
  0xac   :  { %3453 = vmatpush.bf16.msrb.mxu2 %v5194_v39  ;;  %v6671_v5 = vld [vmem:[%s10434_s1 + $0x564] sm:$0xf]  ;;  %v5015_v6 = vld [vmem:[%s10434_s1 + $0x570] sm:$0xf0]  ;;  %v4890_v13 = vor.u32 %v6639_v1, %v4887_v4 }
  0xad   :  { %3466 = vmatpush.bf16.msrb.mxu3 %v5322_v46  ;;  %v6703_v8 = vld [vmem:[%s10434_s1 + $0x664] sm:$0xf]  ;;  %v5143_v9 = vld [vmem:[%s10434_s1 + $0x670] sm:$0xf0]  ;;  %v5018_v15 = vor.u32 %v6671_v5, %v5015_v6 }
  0xae   :  { %3428 = vmatpush.bf16.msrb.mxu0 %v4922_v52  ;;  %v6735_v11 = vld [vmem:[%s10434_s1 + $0x764] sm:$0xf]  ;;  %v5271_v12 = vld [vmem:[%s10434_s1 + $0x770] sm:$0xf0]  ;;  %v5146_v16 = vor.u32 %v6703_v8, %v5143_v9  ;;  %v3214_v8 = vpop.f32.mrf.mxu3 }
  0xaf   :  { %3441 = vmatpush.bf16.msrb.mxu1 %v5050_v53  ;;  %v6635_v14 = vld [vmem:[%s10434_s1 + $0x444] sm:$0xf]  ;;  %v4871_v17 = vld [vmem:[%s10434_s1 + $0x450] sm:$0xf0]  ;;  %v5274_v26 = vor.u32 %v6735_v11, %v5271_v12  ;;  %v3175_v40 = vpop.f32.mrf.mxu0  ;;  %v3188_v50 = vpop.f32.mrf.mxu1 }
  0xb0   :  { %3454 = vmatpush.bf16.msrb.mxu2 %v5178_v54  ;;  %v6667_v21 = vld [vmem:[%s10434_s1 + $0x544] sm:$0xf]  ;;  %v4999_v27 = vld [vmem:[%s10434_s1 + $0x550] sm:$0xf0]  ;;  %v4874_v39 = vor.u32 %v6635_v14, %v4871_v17  ;;  %v3176_v49 = vadd.f32 %v3175_v40, %v542_v24 }
  0xb1   :  { %3467 = vmatpush.bf16.msrb.mxu3 %v5306_v58  ;;  %v6699_v32 = vld [vmem:[%s10434_s1 + $0x644] sm:$0xf]  ;;  %v5127_v34 = vld [vmem:[%s10434_s1 + $0x650] sm:$0xf0]  ;;  %v5002_v43 = vor.u32 %v6667_v21, %v4999_v27 }
  0xb2   :  { %3429 = vmatpush.bf16.msrb.mxu0 %v4906_v0  ;;  %v6731_v36 = vld [vmem:[%s10434_s1 + $0x744] sm:$0xf]  ;;  %v5255_v37 = vld [vmem:[%s10434_s1 + $0x750] sm:$0xf0]  ;;  %v5130_v45 = vor.u32 %v6699_v32, %v5127_v34  ;;  %v3189_v57 = vadd.f32 %v3188_v50, %v3176_v49 }
  0xb3   :  { %3442 = vmatpush.bf16.msrb.mxu1 %v5034_v2  ;;  %v6631_v46 = vld [vmem:[%s10434_s1 + $0x424] sm:$0xf]  ;;  %v4855_v47 = vld [vmem:[%s10434_s1 + $0x430] sm:$0xf0]  ;;  %v5258_v51 = vor.u32 %v6731_v36, %v5255_v37  ;;  %v3201_v2 = vpop.f32.mrf.mxu2 }
  0xb4   :  { %3455 = vmatpush.bf16.msrb.mxu2 %v5162_v3  ;;  %v6663_v48 = vld [vmem:[%s10434_s1 + $0x524] sm:$0xf]  ;;  %v4983_v52 = vld [vmem:[%s10434_s1 + $0x530] sm:$0xf0]  ;;  %v4858_v58 = vor.u32 %v6631_v46, %v4855_v47 }
  0xb5   :  { %3468 = vmatpush.bf16.msrb.mxu3 %v5290_v7  ;;  %v6695_v53 = vld [vmem:[%s10434_s1 + $0x624] sm:$0xf]  ;;  %v5111_v54 = vld [vmem:[%s10434_s1 + $0x630] sm:$0xf0]  ;;  %v4986_v61 = vor.u32 %v6663_v48, %v4983_v52  ;;  %v3202_v7 = vadd.f32 %v3201_v2, %v3189_v57 }
  0xb6   :  { %3430 = vmatpush.bf16.msrb.mxu0 %v4890_v13  ;;  %v6727_v55 = vld [vmem:[%s10434_s1 + $0x724] sm:$0xf]  ;;  %v5239_v56 = vld [vmem:[%s10434_s1 + $0x730] sm:$0xf0]  ;;  %v5114_v62 = vor.u32 %v6695_v53, %v5111_v54  ;;  %v3216_v54 = vpop.f32.mrf.mxu3 }
  0xb7   :  { %3443 = vmatpush.bf16.msrb.mxu1 %v5018_v15  ;;  %v6627_v59 = vld [vmem:[%s10434_s1 + $0x404] sm:$0xf]  ;;  %v4839_v60 = vld [vmem:[%s10434_s1 + $0x410] sm:$0xf0]  ;;  %v5242_v3 = vor.u32 %v6727_v55, %v5239_v56  ;;  %v3177_v17 = vpop.f32.mrf.mxu0  ;;  %v3190_v32 = vpop.f32.mrf.mxu1 }
  0xb8   :  { %3456 = vmatpush.bf16.msrb.mxu2 %v5146_v16  ;;  %v6659_v63 = vld [vmem:[%s10434_s1 + $0x504] sm:$0xf]  ;;  %v4967_v0 = vld [vmem:[%s10434_s1 + $0x510] sm:$0xf0]  ;;  %v4842_v12 = vor.u32 %v6627_v59, %v4839_v60  ;;  %v8325_v16 = vadd.f32 %v3214_v8, %v3202_v7 }
  0xb9   :  { %3469 = vmatpush.bf16.msrb.mxu3 %v5274_v26  ;;  %v6691_v1 = vld [vmem:[%s10434_s1 + $0x604] sm:$0xf]  ;;  %v5095_v4 = vld [vmem:[%s10434_s1 + $0x610] sm:$0xf0]  ;;  %v4970_v21 = vor.u32 %v6659_v63, %v4967_v0 }
  0xba   :  { %3431 = vmatpush.bf16.msrb.mxu0 %v4874_v39  ;;  %v6723_v5 = vld [vmem:[%s10434_s1 + $0x704] sm:$0xf]  ;;  %v5223_v6 = vld [vmem:[%s10434_s1 + $0x710] sm:$0xf0]  ;;  %v5098_v24 = vor.u32 %v6691_v1, %v5095_v4 }
  0xbb   :  { %3444 = vmatpush.bf16.msrb.mxu1 %v5002_v43  ;;  %v6783_v9 = vld [vmem:[%s10434_s1 + $0x8e4] sm:$0xf]  ;;  %v5463_v10 = vld [vmem:[%s10434_s1 + $0x8f0] sm:$0xf0]  ;;  %v5226_v34 = vor.u32 %v6723_v5, %v5223_v6  ;;  %v3203_v52 = vpop.f32.mrf.mxu2 }
  0xbc   :  { %3457 = vmatpush.bf16.msrb.mxu2 %v5130_v45  ;;  %v6815_v11 = vld [vmem:[%s10434_s1 + $0x9e4] sm:$0xf]  ;;  %v5591_v13 = vld [vmem:[%s10434_s1 + $0x9f0] sm:$0xf0]  ;;  %v5466_v36 = vor.u32 %v6783_v9, %v5463_v10 }
  0xbd   :  { %3470 = vmatpush.bf16.msrb.mxu3 %v5258_v51  ;;  %v6847_v14 = vld [vmem:[%s10434_s1 + $0xae4] sm:$0xf]  ;;  %v5719_v15 = vld [vmem:[%s10434_s1 + $0xaf0] sm:$0xf0]  ;;  %v5594_v37 = vor.u32 %v6815_v11, %v5591_v13 }
  0xbe   :  { %3432 = vmatpush.bf16.msrb.mxu0 %v4858_v58  ;;  %v6879_v26 = vld [vmem:[%s10434_s1 + $0xbe4] sm:$0xf]  ;;  %v5847_v27 = vld [vmem:[%s10434_s1 + $0xbf0] sm:$0xf0]  ;;  %v5722_v39 = vor.u32 %v6847_v14, %v5719_v15 }
  0xbf   :  { %3445 = vmatpush.bf16.msrb.mxu1 %v4986_v61  ;;  %v6779_v40 = vld [vmem:[%s10434_s1 + $0x8c4] sm:$0xf]  ;;  %v5447_v43 = vld [vmem:[%s10434_s1 + $0x8d0] sm:$0xf0]  ;;  %v5850_v46 = vor.u32 %v6879_v26, %v5847_v27 }
  0xc0   :  { %3458 = vmatpush.bf16.msrb.mxu2 %v5114_v62  ;;  %v6811_v45 = vld [vmem:[%s10434_s1 + $0x9c4] sm:$0xf]  ;;  %v5575_v47 = vld [vmem:[%s10434_s1 + $0x9d0] sm:$0xf0]  ;;  %v5450_v53 = vor.u32 %v6779_v40, %v5447_v43 }
  0xc1   :  { %3471 = vmatpush.bf16.msrb.mxu3 %v5242_v3  ;;  %v6843_v48 = vld [vmem:[%s10434_s1 + $0xac4] sm:$0xf]  ;;  %v5703_v49 = vld [vmem:[%s10434_s1 + $0xad0] sm:$0xf0]  ;;  %v5578_v55 = vor.u32 %v6811_v45, %v5575_v47 }
  0xc2   :  { %3433 = vmatpush.bf16.msrb.mxu0 %v4842_v12  ;;  %v6875_v50 = vld [vmem:[%s10434_s1 + $0xbc4] sm:$0xf]  ;;  %v5831_v51 = vld [vmem:[%s10434_s1 + $0xbd0] sm:$0xf0]  ;;  %v5706_v56 = vor.u32 %v6843_v48, %v5703_v49 }
  0xc3   :  { %3446 = vmatpush.bf16.msrb.mxu1 %v4970_v21  ;;  %v6775_v57 = vld [vmem:[%s10434_s1 + $0x8a4] sm:$0xf]  ;;  %v5431_v58 = vld [vmem:[%s10434_s1 + $0x8b0] sm:$0xf0]  ;;  %v5834_v60 = vor.u32 %v6875_v50, %v5831_v51  ;;  %v3227_v15 = vpop.f32.mrf.mxu0 }
  0xc4   :  { %3459 = vmatpush.bf16.msrb.mxu2 %v5098_v24  ;;  %v6807_v59 = vld [vmem:[%s10434_s1 + $0x9a4] sm:$0xf]  ;;  %v5559_v61 = vld [vmem:[%s10434_s1 + $0x9b0] sm:$0xf0]  ;;  %v5434_v2 = vor.u32 %v6775_v57, %v5431_v58  ;;  %v3228_v32 = vadd.f32 %v3227_v15, %v8325_v16 }
  0xc5   :  { %3472 = vmatpush.bf16.msrb.mxu3 %v5226_v34  ;;  %v6839_v62 = vld [vmem:[%s10434_s1 + $0xaa4] sm:$0xf]  ;;  %v5687_v63 = vld [vmem:[%s10434_s1 + $0xab0] sm:$0xf0]  ;;  %3434 = vmatmul.bf16.vlgmr.msrb.gmra.mxu0 %v7534_v41  ;;  %v5562_v3 = vor.u32 %v6807_v59, %v5559_v61  ;;  %v3240_v34 = vpop.f32.mrf.mxu1 }
  0xc6   :  { %3478 = vmatpush.bf16.msra.mxu0 %v5466_v36  ;;  %v6871_v0 = vld [vmem:[%s10434_s1 + $0xba4] sm:$0xf]  ;;  %v5815_v1 = vld [vmem:[%s10434_s1 + $0xbb0] sm:$0xf0]  ;;  %3447 = vmatmul.bf16.vlgmr.msrb.gmra.mxu1 %v7538_v44  ;;  %v5690_v4 = vor.u32 %v6839_v62, %v5687_v63  ;;  %v3241_v45 = vadd.f32 %v3240_v34, %v3228_v32 }
  0xc7   :  { %3491 = vmatpush.bf16.msra.mxu1 %v5594_v37  ;;  %3460 = vmatmul.bf16.vlgmr.msrb.gmra.mxu2 %v7526_v38  ;;  %v6771_v5 = vld [vmem:[%s10434_s1 + $0x884] sm:$0xf]  ;;  %v5415_v6 = vld [vmem:[%s10434_s1 + $0x890] sm:$0xf0]  ;;  %v5818_v8 = vor.u32 %v6871_v0, %v5815_v1 }
  0xc8   :  { %3504 = vmatpush.bf16.msra.mxu2 %v5722_v39  ;;  %3473 = vmatmul.bf16.vlgmr.msrb.gmra.mxu3 %v7536_v42  ;;  %v6803_v7 = vld [vmem:[%s10434_s1 + $0x984] sm:$0xf]  ;;  %v5543_v9 = vld [vmem:[%s10434_s1 + $0x990] sm:$0xf0]  ;;  %v5418_v14 = vor.u32 %v6771_v5, %v5415_v6 }
  0xc9   :  { %3517 = vmatpush.bf16.msra.mxu3 %v5850_v46  ;;  %v6835_v10 = vld [vmem:[%s10434_s1 + $0xa84] sm:$0xf]  ;;  %v5671_v11 = vld [vmem:[%s10434_s1 + $0xa90] sm:$0xf0]  ;;  %v5546_v17 = vor.u32 %v6803_v7, %v5543_v9  ;;  %v3253_v52 = vpop.f32.mrf.mxu2 }
  0xca   :  { %3479 = vmatpush.bf16.msra.mxu0 %v5450_v53  ;;  %v6867_v12 = vld [vmem:[%s10434_s1 + $0xb84] sm:$0xf]  ;;  %v5799_v13 = vld [vmem:[%s10434_s1 + $0xb90] sm:$0xf0]  ;;  %v5674_v21 = vor.u32 %v6835_v10, %v5671_v11  ;;  %v3254_v57 = vadd.f32 %v3253_v52, %v3241_v45 }
  0xcb   :  { %3492 = vmatpush.bf16.msra.mxu1 %v5578_v55  ;;  %v6767_v24 = vld [vmem:[%s10434_s1 + $0x864] sm:$0xf]  ;;  %v5399_v26 = vld [vmem:[%s10434_s1 + $0x870] sm:$0xf0]  ;;  %v5802_v36 = vor.u32 %v6867_v12, %v5799_v13  ;;  %v3229_v63 = vpop.f32.mrf.mxu0 }
  0xcc   :  { %3505 = vmatpush.bf16.msra.mxu2 %v5706_v56  ;;  %v6799_v27 = vld [vmem:[%s10434_s1 + $0x964] sm:$0xf]  ;;  %v5527_v37 = vld [vmem:[%s10434_s1 + $0x970] sm:$0xf0]  ;;  %v5402_v46 = vor.u32 %v6767_v24, %v5399_v26  ;;  %v3266_v58 = vpop.f32.mrf.mxu3 }
  0xcd   :  { %3518 = vmatpush.bf16.msra.mxu3 %v5834_v60  ;;  %v6831_v39 = vld [vmem:[%s10434_s1 + $0xa64] sm:$0xf]  ;;  %v5655_v40 = vld [vmem:[%s10434_s1 + $0xa70] sm:$0xf0]  ;;  %v5530_v47 = vor.u32 %v6799_v27, %v5527_v37  ;;  %v8458_v62 = vadd.f32 %v3266_v58, %v3254_v57  ;;  %v3242_v5 = vpop.f32.mrf.mxu1 }
  0xce   :  { %3480 = vmatpush.bf16.msra.mxu0 %v5434_v2  ;;  %v6863_v43 = vld [vmem:[%s10434_s1 + $0xb64] sm:$0xf]  ;;  %v5783_v16 = vld [vmem:[%s10434_s1 + $0xb70] sm:$0xf0]  ;;  %v5658_v48 = vor.u32 %v6831_v39, %v5655_v40 }
  0xcf   :  { %3493 = vmatpush.bf16.msra.mxu1 %v5562_v3  ;;  %v6763_v49 = vld [vmem:[%s10434_s1 + $0x844] sm:$0xf]  ;;  %v5383_v50 = vld [vmem:[%s10434_s1 + $0x850] sm:$0xf0]  ;;  %v5786_v53 = vor.u32 %v6863_v43, %v5783_v16 }
  0xd0   :  { %3506 = vmatpush.bf16.msra.mxu2 %v5690_v4  ;;  %v6795_v51 = vld [vmem:[%s10434_s1 + $0x944] sm:$0xf]  ;;  %v5511_v54 = vld [vmem:[%s10434_s1 + $0x950] sm:$0xf0]  ;;  %v5386_v61 = vor.u32 %v6763_v49, %v5383_v50 }
  0xd1   :  { %3519 = vmatpush.bf16.msra.mxu3 %v5818_v8  ;;  %v6827_v55 = vld [vmem:[%s10434_s1 + $0xa44] sm:$0xf]  ;;  %v5639_v56 = vld [vmem:[%s10434_s1 + $0xa50] sm:$0xf0]  ;;  %v5514_v0 = vor.u32 %v6795_v51, %v5511_v54  ;;  %v3255_v27 = vpop.f32.mrf.mxu2 }
  0xd2   :  { %3481 = vmatpush.bf16.msra.mxu0 %v5418_v14  ;;  %v6859_v59 = vld [vmem:[%s10434_s1 + $0xb44] sm:$0xf]  ;;  %v5767_v60 = vld [vmem:[%s10434_s1 + $0xb50] sm:$0xf0]  ;;  %v5642_v1 = vor.u32 %v6827_v55, %v5639_v56 }
  0xd3   :  { %3494 = vmatpush.bf16.msra.mxu1 %v5546_v17  ;;  %v6759_v2 = vld [vmem:[%s10434_s1 + $0x824] sm:$0xf]  ;;  %v5367_v3 = vld [vmem:[%s10434_s1 + $0x830] sm:$0xf0]  ;;  %v5770_v6 = vor.u32 %v6859_v59, %v5767_v60 }
  0xd4   :  { %3507 = vmatpush.bf16.msra.mxu2 %v5674_v21  ;;  %v6791_v4 = vld [vmem:[%s10434_s1 + $0x924] sm:$0xf]  ;;  %v5495_v7 = vld [vmem:[%s10434_s1 + $0x930] sm:$0xf0]  ;;  %v5370_v12 = vor.u32 %v6759_v2, %v5367_v3  ;;  %v3268_v39 = vpop.f32.mrf.mxu3 }
  0xd5   :  { %3520 = vmatpush.bf16.msra.mxu3 %v5802_v36  ;;  %v6823_v8 = vld [vmem:[%s10434_s1 + $0xa24] sm:$0xf]  ;;  %v5623_v9 = vld [vmem:[%s10434_s1 + $0xa30] sm:$0xf0]  ;;  %v5498_v15 = vor.u32 %v6791_v4, %v5495_v7 }
  0xd6   :  { %3482 = vmatpush.bf16.msra.mxu0 %v5402_v46  ;;  %v6855_v10 = vld [vmem:[%s10434_s1 + $0xb24] sm:$0xf]  ;;  %v5751_v11 = vld [vmem:[%s10434_s1 + $0xb30] sm:$0xf0]  ;;  %v5626_v17 = vor.u32 %v6823_v8, %v5623_v9 }
  0xd7   :  { %3495 = vmatpush.bf16.msra.mxu1 %v5530_v47  ;;  %v6755_v13 = vld [vmem:[%s10434_s1 + $0x804] sm:$0xf]  ;;  %v5351_v14 = vld [vmem:[%s10434_s1 + $0x810] sm:$0xf0]  ;;  %v5754_v32 = vor.u32 %v6855_v10, %v5751_v11 }
  0xd8   :  { %3508 = vmatpush.bf16.msra.mxu2 %v5658_v48  ;;  %v6787_v21 = vld [vmem:[%s10434_s1 + $0x904] sm:$0xf]  ;;  %v5479_v24 = vld [vmem:[%s10434_s1 + $0x910] sm:$0xf0]  ;;  %v5354_v45 = vor.u32 %v6755_v13, %v5351_v14 }
  0xd9   :  { %3521 = vmatpush.bf16.msra.mxu3 %v5786_v53  ;;  %v6819_v26 = vld [vmem:[%s10434_s1 + $0xa04] sm:$0xf]  ;;  %v5607_v34 = vld [vmem:[%s10434_s1 + $0xa10] sm:$0xf0]  ;;  %v5482_v49 = vor.u32 %v6787_v21, %v5479_v24 }
  0xda   :  { %3483 = vmatpush.bf16.msra.mxu0 %v5386_v61  ;;  %v6851_v36 = vld [vmem:[%s10434_s1 + $0xb04] sm:$0xf]  ;;  %v5735_v37 = vld [vmem:[%s10434_s1 + $0xb10] sm:$0xf0]  ;;  %v5610_v50 = vor.u32 %v6819_v26, %v5607_v34 }
  0xdb   :  { %3496 = vmatpush.bf16.msra.mxu1 %v5514_v0  ;;  %v6911_v40 = vld [vmem:[%s10434_s1 + $0xce4] sm:$0xf]  ;;  %v5975_v43 = vld [vmem:[%s10434_s1 + $0xcf0] sm:$0xf0]  ;;  %v5738_v53 = vor.u32 %v6851_v36, %v5735_v37 }
  0xdc   :  { %3509 = vmatpush.bf16.msra.mxu2 %v5642_v1  ;;  %v6943_v16 = vld [vmem:[%s10434_s1 + $0xde4] sm:$0xf]  ;;  %v6103_v46 = vld [vmem:[%s10434_s1 + $0xdf0] sm:$0xf0]  ;;  %v5978_v54 = vor.u32 %v6911_v40, %v5975_v43 }
  0xdd   :  { %3522 = vmatpush.bf16.msra.mxu3 %v5770_v6  ;;  %v6975_v47 = vld [vmem:[%s10434_s1 + $0xee4] sm:$0xf]  ;;  %v6231_v48 = vld [vmem:[%s10434_s1 + $0xef0] sm:$0xf0]  ;;  %v6106_v55 = vor.u32 %v6943_v16, %v6103_v46 }
  0xde   :  { %3484 = vmatpush.bf16.msra.mxu0 %v5370_v12  ;;  %v7007_v51 = vld [vmem:[%s10434_s1 + $0xfe4] sm:$0xf]  ;;  %v6359_v52 = vld [vmem:[%s10434_s1 + $0xff0] sm:$0xf0]  ;;  %v6234_v56 = vor.u32 %v6975_v47, %v6231_v48 }
  0xdf   :  { %3497 = vmatpush.bf16.msra.mxu1 %v5498_v15  ;;  %v6907_v57 = vld [vmem:[%s10434_s1 + $0xcc4] sm:$0xf]  ;;  %v5959_v58 = vld [vmem:[%s10434_s1 + $0xcd0] sm:$0xf0]  ;;  %v6362_v60 = vor.u32 %v7007_v51, %v6359_v52 }
  0xe0   :  { %3510 = vmatpush.bf16.msra.mxu2 %v5626_v17  ;;  %v6939_v59 = vld [vmem:[%s10434_s1 + $0xdc4] sm:$0xf]  ;;  %v6087_v61 = vld [vmem:[%s10434_s1 + $0xdd0] sm:$0xf0]  ;;  %v5962_v3 = vor.u32 %v6907_v57, %v5959_v58 }
  0xe1   :  { %3523 = vmatpush.bf16.msra.mxu3 %v5754_v32  ;;  %v6971_v63 = vld [vmem:[%s10434_s1 + $0xec4] sm:$0xf]  ;;  %v6215_v0 = vld [vmem:[%s10434_s1 + $0xed0] sm:$0xf0]  ;;  %v6090_v4 = vor.u32 %v6939_v59, %v6087_v61 }
  0xe2   :  { %3485 = vmatpush.bf16.msra.mxu0 %v5354_v45  ;;  %v7003_v1 = vld [vmem:[%s10434_s1 + $0xfc4] sm:$0xf]  ;;  %v6343_v2 = vld [vmem:[%s10434_s1 + $0xfd0] sm:$0xf0]  ;;  %v6218_v5 = vor.u32 %v6971_v63, %v6215_v0 }
  0xe3   :  { %3498 = vmatpush.bf16.msra.mxu1 %v5482_v49  ;;  %v6903_v6 = vld [vmem:[%s10434_s1 + $0xca4] sm:$0xf]  ;;  %v5943_v7 = vld [vmem:[%s10434_s1 + $0xcb0] sm:$0xf0]  ;;  %v6346_v9 = vor.u32 %v7003_v1, %v6343_v2 }
  0xe4   :  { %3511 = vmatpush.bf16.msra.mxu2 %v5610_v50  ;;  %v6935_v8 = vld [vmem:[%s10434_s1 + $0xda4] sm:$0xf]  ;;  %v6071_v10 = vld [vmem:[%s10434_s1 + $0xdb0] sm:$0xf0]  ;;  %v5946_v15 = vor.u32 %v6903_v6, %v5943_v7  ;;  %v3279_v39 = vpop.f32.mrf.mxu0 }
  0xe5   :  { %3524 = vmatpush.bf16.msra.mxu3 %v5738_v53  ;;  %3486 = vmatmul.bf16.vlgmr.msra.gmra.mxu0 %v7727_v25  ;;  %v6967_v11 = vld [vmem:[%s10434_s1 + $0xea4] sm:$0xf]  ;;  %v6199_v12 = vld [vmem:[%s10434_s1 + $0xeb0] sm:$0xf0]  ;;  %v6074_v17 = vor.u32 %v6935_v8, %v6071_v10  ;;  %v3280_v16 = vadd.f32 %v3279_v39, %v8458_v62  ;;  %v3292_v46 = vpop.f32.mrf.mxu1 }
  0xe6   :  { %3530 = vmatpush.bf16.msrb.mxu0 %v5978_v54  ;;  %3499 = vmatmul.bf16.vlgmr.msra.gmra.mxu1 %v7740_v30  ;;  %v6999_v13 = vld [vmem:[%s10434_s1 + $0xfa4] sm:$0xf]  ;;  %v6327_v14 = vld [vmem:[%s10434_s1 + $0xfb0] sm:$0xf0]  ;;  %v6202_v21 = vor.u32 %v6967_v11, %v6199_v12 }
  0xe7   :  { %3543 = vmatpush.bf16.msrb.mxu1 %v6106_v55  ;;  %3512 = vmatmul.bf16.vlgmr.msra.gmra.mxu2 %v7738_v29  ;;  %v6899_v24 = vld [vmem:[%s10434_s1 + $0xc84] sm:$0xf]  ;;  %v5927_v26 = vld [vmem:[%s10434_s1 + $0xc90] sm:$0xf0]  ;;  %v6330_v32 = vor.u32 %v6999_v13, %v6327_v14  ;;  %v3293_v52 = vadd.f32 %v3292_v46, %v3280_v16 }
  0xe8   :  { %3556 = vmatpush.bf16.msrb.mxu2 %v6234_v56  ;;  %3525 = vmatmul.bf16.vlgmr.msra.gmra.mxu3 %v7748_v33  ;;  %v6931_v27 = vld [vmem:[%s10434_s1 + $0xd84] sm:$0xf]  ;;  %v6055_v34 = vld [vmem:[%s10434_s1 + $0xd90] sm:$0xf0]  ;;  %v5930_v45 = vor.u32 %v6899_v24, %v5927_v26 }
  0xe9   :  { %3569 = vmatpush.bf16.msrb.mxu3 %v6362_v60  ;;  %v6963_v36 = vld [vmem:[%s10434_s1 + $0xe84] sm:$0xf]  ;;  %v6183_v37 = vld [vmem:[%s10434_s1 + $0xe90] sm:$0xf0]  ;;  %v6058_v47 = vor.u32 %v6931_v27, %v6055_v34  ;;  %v3305_v2 = vpop.f32.mrf.mxu2 }
  0xea   :  { %3531 = vmatpush.bf16.msrb.mxu0 %v5962_v3  ;;  %v6995_v40 = vld [vmem:[%s10434_s1 + $0xf84] sm:$0xf]  ;;  %v6311_v43 = vld [vmem:[%s10434_s1 + $0xf90] sm:$0xf0]  ;;  %v6186_v48 = vor.u32 %v6963_v36, %v6183_v37  ;;  %v3306_v6 = vadd.f32 %v3305_v2, %v3293_v52 }
  0xeb   :  { %3544 = vmatpush.bf16.msrb.mxu1 %v6090_v4  ;;  %v6895_v49 = vld [vmem:[%s10434_s1 + $0xc64] sm:$0xf]  ;;  %v5911_v50 = vld [vmem:[%s10434_s1 + $0xc70] sm:$0xf0]  ;;  %v6314_v62 = vor.u32 %v6995_v40, %v6311_v43 }
  0xec   :  { %3557 = vmatpush.bf16.msrb.mxu2 %v6218_v5  ;;  %v6927_v51 = vld [vmem:[%s10434_s1 + $0xd64] sm:$0xf]  ;;  %v6039_v53 = vld [vmem:[%s10434_s1 + $0xd70] sm:$0xf0]  ;;  %v5914_v58 = vor.u32 %v6895_v49, %v5911_v50  ;;  %v3281_v10 = vpop.f32.mrf.mxu0 }
  0xed   :  { %3570 = vmatpush.bf16.msrb.mxu3 %v6346_v9  ;;  %v6959_v54 = vld [vmem:[%s10434_s1 + $0xe64] sm:$0xf]  ;;  %v6167_v55 = vld [vmem:[%s10434_s1 + $0xe70] sm:$0xf0]  ;;  %v6042_v59 = vor.u32 %v6927_v51, %v6039_v53  ;;  %v3318_v7 = vpop.f32.mrf.mxu3  ;;  %v3294_v12 = vpop.f32.mrf.mxu1  ;;  %v4445_v53 = vld [vmem:[%s10434_s1 + $0xe8] sm:$0xf] }
  0xee   :  { %3532 = vmatpush.bf16.msrb.mxu0 %v5946_v15  ;;  %v6991_v56 = vld [vmem:[%s10434_s1 + $0xf64] sm:$0xf]  ;;  %v6295_v57 = vld [vmem:[%s10434_s1 + $0xf70] sm:$0xf0]  ;;  %v6170_v60 = vor.u32 %v6959_v54, %v6167_v55  ;;  %v8657_v13 = vadd.f32 %v3318_v7, %v3306_v6  ;;  %v6530_v54 = vld [vmem:[%s10434_s1 + $0xf4] sm:$0xf0] }
  0xef   :  { %3545 = vmatpush.bf16.msrb.mxu1 %v6074_v17  ;;  %v6891_v61 = vld [vmem:[%s10434_s1 + $0xc44] sm:$0xf]  ;;  %v5895_v63 = vld [vmem:[%s10434_s1 + $0xc50] sm:$0xf0]  ;;  %v6298_v1 = vor.u32 %v6991_v56, %v6295_v57  ;;  %v4573_v55 = vld [vmem:[%s10434_s1 + $0x1e8] sm:$0xf] }
  0xf0   :  { %3558 = vmatpush.bf16.msrb.mxu2 %v6202_v21  ;;  %v6923_v0 = vld [vmem:[%s10434_s1 + $0xd44] sm:$0xf]  ;;  %v6023_v3 = vld [vmem:[%s10434_s1 + $0xd50] sm:$0xf0]  ;;  %v5898_v11 = vor.u32 %v6891_v61, %v5895_v63  ;;  %v4429_v6 = vld [vmem:[%s10434_s1 + $0xc8] sm:$0xf] }
  0xf1   :  { %3571 = vmatpush.bf16.msrb.mxu3 %v6330_v32  ;;  %v6955_v4 = vld [vmem:[%s10434_s1 + $0xe44] sm:$0xf]  ;;  %v6151_v5 = vld [vmem:[%s10434_s1 + $0xe50] sm:$0xf0]  ;;  %v6026_v14 = vor.u32 %v6923_v0, %v6023_v3  ;;  %v3307_v52 = vpop.f32.mrf.mxu2  ;;  %v4829_v0 = vld [vmem:[%s10434_s1 + $0x3e8] sm:$0xf]  ;;  %v4446_v3 = vor.u32 %v6530_v54, %v4445_v53 }
  0xf2   :  { %3533 = vmatpush.bf16.msrb.mxu0 %v5930_v45  ;;  %v6987_v8 = vld [vmem:[%s10434_s1 + $0xf44] sm:$0xf]  ;;  %v6279_v9 = vld [vmem:[%s10434_s1 + $0xf50] sm:$0xf0]  ;;  %v6154_v15 = vor.u32 %v6955_v4, %v6151_v5  ;;  %v6526_v7 = vld [vmem:[%s10434_s1 + $0xd4] sm:$0xf0] }
  0xf3   :  { %3546 = vmatpush.bf16.msrb.mxu1 %v6058_v47  ;;  %v6887_v17 = vld [vmem:[%s10434_s1 + $0xc24] sm:$0xf]  ;;  %v5879_v21 = vld [vmem:[%s10434_s1 + $0xc30] sm:$0xf0]  ;;  %v6282_v26 = vor.u32 %v6987_v8, %v6279_v9  ;;  %v4557_v8 = vld [vmem:[%s10434_s1 + $0x1c8] sm:$0xf] }
  0xf4   :  { %3559 = vmatpush.bf16.msrb.mxu2 %v6186_v48  ;;  %v6919_v24 = vld [vmem:[%s10434_s1 + $0xd24] sm:$0xf]  ;;  %v6007_v27 = vld [vmem:[%s10434_s1 + $0xd30] sm:$0xf0]  ;;  %v5882_v39 = vor.u32 %v6887_v17, %v5879_v21  ;;  %v6558_v10 = vld [vmem:[%s10434_s1 + $0x1d4] sm:$0xf0]  ;;  %v4430_v17 = vor.u32 %v6526_v7, %v4429_v6 }
  0xf5   :  { %3572 = vmatpush.bf16.msrb.mxu3 %v6314_v62  ;;  %v6951_v32 = vld [vmem:[%s10434_s1 + $0xe24] sm:$0xf]  ;;  %v6135_v34 = vld [vmem:[%s10434_s1 + $0xe30] sm:$0xf0]  ;;  %v6010_v16 = vor.u32 %v6919_v24, %v6007_v27  ;;  %v3320_v56 = vpop.f32.mrf.mxu3  ;;  %v6590_v12 = vld [vmem:[%s10434_s1 + $0x2d4] sm:$0xf0]  ;;  %v4558_v21 = vor.u32 %v6558_v10, %v4557_v8 }
  0xf6   :  { %3534 = vmatpush.bf16.msrb.mxu0 %v5914_v58  ;;  %v6983_v36 = vld [vmem:[%s10434_s1 + $0xf24] sm:$0xf]  ;;  %v6263_v37 = vld [vmem:[%s10434_s1 + $0xf30] sm:$0xf0]  ;;  %v6138_v45 = vor.u32 %v6951_v32, %v6135_v34  ;;  %v6562_v58 = vld [vmem:[%s10434_s1 + $0x1f4] sm:$0xf0] }
  0xf7   :  { %3547 = vmatpush.bf16.msrb.mxu1 %v6042_v59  ;;  %v6883_v40 = vld [vmem:[%s10434_s1 + $0xc04] sm:$0xf]  ;;  %v5863_v43 = vld [vmem:[%s10434_s1 + $0xc10] sm:$0xf0]  ;;  %v6266_v49 = vor.u32 %v6983_v36, %v6263_v37  ;;  %v4701_v59 = vld [vmem:[%s10434_s1 + $0x2e8] sm:$0xf]  ;;  %v4574_v4 = vor.u32 %v6562_v58, %v4573_v55 }
  0xf8   :  { %3560 = vmatpush.bf16.msrb.mxu2 %v6170_v60  ;;  %v6915_v46 = vld [vmem:[%s10434_s1 + $0xd04] sm:$0xf]  ;;  %v5991_v47 = vld [vmem:[%s10434_s1 + $0xd10] sm:$0xf0]  ;;  %v5866_v57 = vor.u32 %v6883_v40, %v5863_v43  ;;  %v6594_v60 = vld [vmem:[%s10434_s1 + $0x2f4] sm:$0xf0] }
  0xf9   :  { %3573 = vmatpush.bf16.msrb.mxu3 %v6298_v1  ;;  %v6947_v48 = vld [vmem:[%s10434_s1 + $0xe04] sm:$0xf]  ;;  %v6119_v50 = vld [vmem:[%s10434_s1 + $0xe10] sm:$0xf0]  ;;  %v5994_v61 = vor.u32 %v6915_v46, %v5991_v47  ;;  %v6626_v1 = vld [vmem:[%s10434_s1 + $0x3f4] sm:$0xf0]  ;;  %v4702_v5 = vor.u32 %v6594_v60, %v4701_v59 }
  0xfa   :  { %3535 = vmatpush.bf16.msrb.mxu0 %v5898_v11  ;;  %v6979_v51 = vld [vmem:[%s10434_s1 + $0xf04] sm:$0xf]  ;;  %v6247_v62 = vld [vmem:[%s10434_s1 + $0xf10] sm:$0xf0]  ;;  %v6122_v63 = vor.u32 %v6947_v48, %v6119_v50  ;;  %v4830_v9 = vor.u32 %v6626_v1, %v4829_v0  ;;  %v4685_v11 = vld [vmem:[%s10434_s1 + $0x2c8] sm:$0xf] }
  0xfb   :  { %3548 = vmatpush.bf16.msrb.mxu1 %v6026_v14  ;;  %v6250_v2 = vor.u32 %v6979_v51, %v6247_v62  ;;  %v4813_v14 = vld [vmem:[%s10434_s1 + $0x3c8] sm:$0xf]  ;;  %v4686_v24 = vor.u32 %v6590_v12, %v4685_v11  ;;  %v6522_v27 = vld [vmem:[%s10434_s1 + $0xb4] sm:$0xf0] }
  0xfc   :  { %3561 = vmatpush.bf16.msrb.mxu2 %v6154_v15  ;;  %v6622_v15 = vld [vmem:[%s10434_s1 + $0x3d4] sm:$0xf0]  ;;  %v4541_v32 = vld [vmem:[%s10434_s1 + $0x1a8] sm:$0xf] }
  0xfd   :  { %3574 = vmatpush.bf16.msrb.mxu3 %v6282_v26  ;;  %v4413_v26 = vld [vmem:[%s10434_s1 + $0xa8] sm:$0xf]  ;;  %v4814_v34 = vor.u32 %v6622_v15, %v4813_v14  ;;  %v6554_v36 = vld [vmem:[%s10434_s1 + $0x1b4] sm:$0xf0] }
  0xfe   :  { %3536 = vmatpush.bf16.msrb.mxu0 %v5882_v39  ;;  %v4669_v37 = vld [vmem:[%s10434_s1 + $0x2a8] sm:$0xf]  ;;  %v6586_v39 = vld [vmem:[%s10434_s1 + $0x2b4] sm:$0xf0] }
  0xff   :  { %3549 = vmatpush.bf16.msrb.mxu1 %v6010_v16  ;;  %v4797_v40 = vld [vmem:[%s10434_s1 + $0x3a8] sm:$0xf]  ;;  %v6618_v43 = vld [vmem:[%s10434_s1 + $0x3b4] sm:$0xf0]  ;;  %v4414_v16 = vor.u32 %v6522_v27, %v4413_v26  ;;  %v4670_v46 = vor.u32 %v6586_v39, %v4669_v37 }
 0x100   :  { %3562 = vmatpush.bf16.msrb.mxu2 %v6138_v45  ;;  %v4542_v45 = vor.u32 %v6554_v36, %v4541_v32  ;;  %v4397_v47 = vld [vmem:[%s10434_s1 + $0x88] sm:$0xf]  ;;  %v6518_v48 = vld [vmem:[%s10434_s1 + $0x94] sm:$0xf0]  ;;  %v4798_v50 = vor.u32 %v6618_v43, %v4797_v40 }
 0x101   :  { %3575 = vmatpush.bf16.msrb.mxu3 %v6266_v49  ;;  %v4525_v49 = vld [vmem:[%s10434_s1 + $0x188] sm:$0xf]  ;;  %v6550_v51 = vld [vmem:[%s10434_s1 + $0x194] sm:$0xf0] }
 0x102   :  { %3537 = vmatpush.bf16.msrb.mxu0 %v5866_v57  ;;  %v4653_v62 = vld [vmem:[%s10434_s1 + $0x288] sm:$0xf]  ;;  %v6582_v52 = vld [vmem:[%s10434_s1 + $0x294] sm:$0xf0]  ;;  %v4398_v57 = vor.u32 %v6518_v48, %v4397_v47  ;;  %v4526_v59 = vor.u32 %v6550_v51, %v4525_v49 }
 0x103   :  { %3550 = vmatpush.bf16.msrb.mxu1 %v5994_v61  ;;  %v4781_v54 = vld [vmem:[%s10434_s1 + $0x388] sm:$0xf]  ;;  %v6614_v55 = vld [vmem:[%s10434_s1 + $0x394] sm:$0xf0]  ;;  %v3344_v58 = vpop.f32.mrf.mxu1  ;;  %v4654_v60 = vor.u32 %v6582_v52, %v4653_v62 }
 0x104   :  { %3563 = vmatpush.bf16.msrb.mxu2 %v6122_v63  ;;  %v3331_v53 = vpop.f32.mrf.mxu0  ;;  %v4381_v61 = vld [vmem:[%s10434_s1 + $0x68] sm:$0xf]  ;;  %v6514_v63 = vld [vmem:[%s10434_s1 + $0x74] sm:$0xf0] }
 0x105   :  { %3576 = vmatpush.bf16.msrb.mxu3 %v6250_v2  ;;  %3538 = vmatmul.bf16.vlgmr.msrb.gmra.mxu0 %v7937_v23  ;;  %v3332_v56 = vadd.f32 %v3331_v53, %v8657_v13  ;;  %v4509_v0 = vld [vmem:[%s10434_s1 + $0x168] sm:$0xf]  ;;  %v4782_v13 = vor.u32 %v6614_v55, %v4781_v54  ;;  %v6546_v2 = vld [vmem:[%s10434_s1 + $0x174] sm:$0xf0]  ;;  %v4382_v7 = vor.u32 %v6514_v63, %v4381_v61 }
 0x106   :  { %3582 = vmatpush.bf16.msra.mxu0 %v4446_v3  ;;  %3551 = vmatmul.bf16.vlgmr.msrb.gmra.mxu1 %v7950_v31  ;;  %v4637_v3 = vld [vmem:[%s10434_s1 + $0x268] sm:$0xf]  ;;  %v6610_v6 = vld [vmem:[%s10434_s1 + $0x374] sm:$0xf0]  ;;  %v4510_v8 = vor.u32 %v6546_v2, %v4509_v0 }
 0x107   :  { %3595 = vmatpush.bf16.msra.mxu1 %v4574_v4  ;;  %3564 = vmatmul.bf16.vlgmr.msrb.gmra.mxu2 %v7948_v28  ;;  %v3345_v1 = vadd.f32 %v3344_v58, %v3332_v56  ;;  %v6578_v4 = vld [vmem:[%s10434_s1 + $0x274] sm:$0xf0]  ;;  %v4365_v10 = vld [vmem:[%s10434_s1 + $0x48] sm:$0xf] }
 0x108   :  { %3608 = vmatpush.bf16.msra.mxu2 %v4702_v5  ;;  %3577 = vmatmul.bf16.vlgmr.msrb.gmra.mxu3 %v7958_v35  ;;  %v4765_v5 = vld [vmem:[%s10434_s1 + $0x368] sm:$0xf]  ;;  %v6510_v11 = vld [vmem:[%s10434_s1 + $0x54] sm:$0xf0] }
 0x109   :  { %3621 = vmatpush.bf16.msra.mxu3 %v4830_v9  ;;  %v4638_v9 = vor.u32 %v6578_v4, %v4637_v3  ;;  %v4493_v12 = vld [vmem:[%s10434_s1 + $0x148] sm:$0xf]  ;;  %v4766_v14 = vor.u32 %v6610_v6, %v4765_v5  ;;  %v4366_v37 = vor.u32 %v6510_v11, %v4365_v10  ;;  %v6538_v49 = vld [vmem:[%s10434_s1 + $0x134] sm:$0xf0] }
 0x10a   :  { %3583 = vmatpush.bf16.msra.mxu0 %v4430_v17  ;;  %v6542_v17 = vld [vmem:[%s10434_s1 + $0x154] sm:$0xf0]  ;;  %v4749_v32 = vld [vmem:[%s10434_s1 + $0x348] sm:$0xf] }
 0x10b   :  { %3596 = vmatpush.bf16.msra.mxu1 %v4558_v21  ;;  %v4621_v21 = vld [vmem:[%s10434_s1 + $0x248] sm:$0xf]  ;;  %v3370_v27 = vpop.f32.mrf.mxu3  ;;  %v3346_v39 = vpop.f32.mrf.mxu1  ;;  %v4494_v43 = vor.u32 %v6542_v17, %v4493_v12  ;;  %v6570_v51 = vld [vmem:[%s10434_s1 + $0x234] sm:$0xf0] }
 0x10c   :  { %3609 = vmatpush.bf16.msra.mxu2 %v4686_v24  ;;  %v3357_v15 = vpop.f32.mrf.mxu2  ;;  %v6574_v24 = vld [vmem:[%s10434_s1 + $0x254] sm:$0xf0]  ;;  %v3333_v36 = vpop.f32.mrf.mxu0  ;;  %v4477_v47 = vld [vmem:[%s10434_s1 + $0x128] sm:$0xf] }
 0x10d   :  { %3622 = vmatpush.bf16.msra.mxu3 %v4814_v34  ;;  %v3358_v26 = vadd.f32 %v3357_v15, %v3345_v1  ;;  %v6606_v34 = vld [vmem:[%s10434_s1 + $0x354] sm:$0xf0]  ;;  %v4733_v62 = vld [vmem:[%s10434_s1 + $0x328] sm:$0xf]  ;;  %v4478_v56 = vor.u32 %v6538_v49, %v4477_v47 }
 0x10e   :  { %3584 = vmatpush.bf16.msra.mxu0 %v4414_v16  ;;  %v4622_v16 = vor.u32 %v6574_v24, %v4621_v21  ;;  %v4750_v48 = vor.u32 %v6606_v34, %v4749_v32  ;;  %v6602_v52 = vld [vmem:[%s10434_s1 + $0x334] sm:$0xf0]  ;;  %v4333_v54 = vld [vmem:[%s10434_s1 + $0x8] sm:$0xf] }
 0x10f   :  { %3597 = vmatpush.bf16.msra.mxu1 %v4542_v45  ;;  %v8856_v40 = vadd.f32 %v3370_v27, %v3358_v26  ;;  %v4349_v45 = vld [vmem:[%s10434_s1 + $0x28] sm:$0xf]  ;;  %v6502_v55 = vld [vmem:[%s10434_s1 + $0x14] sm:$0xf0]  ;;  %v4734_v61 = vor.u32 %v6602_v52, %v4733_v62 }
 0x110   :  { %3610 = vmatpush.bf16.msra.mxu2 %v4670_v46  ;;  %v6506_v46 = vld [vmem:[%s10434_s1 + $0x34] sm:$0xf0]  ;;  %v4461_v58 = vld [vmem:[%s10434_s1 + $0x108] sm:$0xf]  ;;  %v4334_v6 = vor.u32 %v6502_v55, %v4333_v54 }
 0x111   :  { %3623 = vmatpush.bf16.msra.mxu3 %v4798_v50  ;;  %v4605_v50 = vld [vmem:[%s10434_s1 + $0x228] sm:$0xf]  ;;  %v4350_v53 = vor.u32 %v6506_v46, %v4349_v45  ;;  %v6566_v63 = vld [vmem:[%s10434_s1 + $0x214] sm:$0xf0] }
 0x112   :  { %3585 = vmatpush.bf16.msra.mxu0 %v4398_v57  ;;  %v4606_v57 = vor.u32 %v6570_v51, %v4605_v50  ;;  %v4717_v0 = vld [vmem:[%s10434_s1 + $0x308] sm:$0xf]  ;;  %v6658_v3 = vld [vmem:[%s10434_s1 + $0x4f4] sm:$0xf0] }
 0x113   :  { %3598 = vmatpush.bf16.msra.mxu1 %v4526_v59  ;;  %v6534_v59 = vld [vmem:[%s10434_s1 + $0x114] sm:$0xf0]  ;;  %v4957_v2 = vld [vmem:[%s10434_s1 + $0x4e8] sm:$0xf]  ;;  %v3372_v5 = vpop.f32.mrf.mxu3 }
 0x114   :  { %3611 = vmatpush.bf16.msra.mxu2 %v4654_v60  ;;  %v4589_v60 = vld [vmem:[%s10434_s1 + $0x208] sm:$0xf]  ;;  %v3359_v1 = vpop.f32.mrf.mxu2  ;;  %v4462_v10 = vor.u32 %v6534_v59, %v4461_v58  ;;  %v4958_v17 = vor.u32 %v6658_v3, %v4957_v2  ;;  %v6654_v27 = vld [vmem:[%s10434_s1 + $0x4d4] sm:$0xf0] }
 0x115   :  { %3624 = vmatpush.bf16.msra.mxu3 %v4782_v13  ;;  %v6598_v13 = vld [vmem:[%s10434_s1 + $0x314] sm:$0xf0]  ;;  %v5085_v4 = vld [vmem:[%s10434_s1 + $0x5e8] sm:$0xf]  ;;  %v4590_v11 = vor.u32 %v6566_v63, %v4589_v60  ;;  %v7044_v63 = vld [vmem:[%s10436_s2] sm:$0xf] }
 0x116   :  { %3586 = vmatpush.bf16.msra.mxu0 %v4382_v7  ;;  %v6690_v7 = vld [vmem:[%s10434_s1 + $0x5f4] sm:$0xf0]  ;;  %v5341_v12 = vld [vmem:[%s10434_s1 + $0x7e8] sm:$0xf]  ;;  %v4718_v15 = vor.u32 %v6598_v13, %v4717_v0  ;;  %v543_v0 = vperm.slane %v7044_v63, 1 }
 0x117   :  { %3599 = vmatpush.bf16.msra.mxu1 %v4510_v8  ;;  %v5213_v8 = vld [vmem:[%s10434_s1 + $0x6e8] sm:$0xf]  ;;  %v5086_v21 = vor.u32 %v6690_v7, %v5085_v4  ;;  %v6686_v36 = vld [vmem:[%s10434_s1 + $0x5d4] sm:$0xf0] }
 0x118   :  { %3612 = vmatpush.bf16.msra.mxu2 %v4638_v9  ;;  %v6722_v9 = vld [vmem:[%s10434_s1 + $0x6f4] sm:$0xf0]  ;;  %v4941_v26 = vld [vmem:[%s10434_s1 + $0x4c8] sm:$0xf] }
 0x119   :  { %3625 = vmatpush.bf16.msra.mxu3 %v4766_v14  ;;  %v6754_v14 = vld [vmem:[%s10434_s1 + $0x7f4] sm:$0xf0]  ;;  %v5214_v24 = vor.u32 %v6722_v9, %v5213_v8  ;;  %v5069_v32 = vld [vmem:[%s10434_s1 + $0x5c8] sm:$0xf]  ;;  %v4942_v45 = vor.u32 %v6654_v27, %v4941_v26 }
 0x11a   :  { %3587 = vmatpush.bf16.msra.mxu0 %v4366_v37  ;;  %v5342_v34 = vor.u32 %v6754_v14, %v5341_v12  ;;  %v5197_v37 = vld [vmem:[%s10434_s1 + $0x6c8] sm:$0xf]  ;;  %v6718_v39 = vld [vmem:[%s10434_s1 + $0x6d4] sm:$0xf0]  ;;  %v5070_v46 = vor.u32 %v6686_v36, %v5069_v32 }
 0x11b   :  { %3600 = vmatpush.bf16.msra.mxu1 %v4494_v43  ;;  %v5325_v43 = vld [vmem:[%s10434_s1 + $0x7c8] sm:$0xf]  ;;  %v5198_v47 = vor.u32 %v6718_v39, %v5197_v37  ;;  %v6650_v49 = vld [vmem:[%s10434_s1 + $0x4b4] sm:$0xf0] }
 0x11c   :  { %3613 = vmatpush.bf16.msra.mxu2 %v4622_v16  ;;  %v6750_v16 = vld [vmem:[%s10434_s1 + $0x7d4] sm:$0xf0]  ;;  %v5053_v50 = vld [vmem:[%s10434_s1 + $0x5a8] sm:$0xf] }
 0x11d   :  { %3626 = vmatpush.bf16.msra.mxu3 %v4750_v48  ;;  %v4925_v48 = vld [vmem:[%s10434_s1 + $0x4a8] sm:$0xf]  ;;  %v5326_v51 = vor.u32 %v6750_v16, %v5325_v43  ;;  %v6682_v62 = vld [vmem:[%s10434_s1 + $0x5b4] sm:$0xf0] }
 0x11e   :  { %3588 = vmatpush.bf16.msra.mxu0 %v4350_v53  ;;  %v5181_v52 = vld [vmem:[%s10434_s1 + $0x6a8] sm:$0xf]  ;;  %v6714_v53 = vld [vmem:[%s10434_s1 + $0x6b4] sm:$0xf0]  ;;  %v5054_v58 = vor.u32 %v6682_v62, %v5053_v50 }
 0x11f   :  { %3601 = vmatpush.bf16.msra.mxu1 %v4478_v56  ;;  %v5309_v54 = vld [vmem:[%s10434_s1 + $0x7a8] sm:$0xf]  ;;  %v6746_v55 = vld [vmem:[%s10434_s1 + $0x7b4] sm:$0xf0]  ;;  %v4926_v56 = vor.u32 %v6650_v49, %v4925_v48  ;;  %v5182_v59 = vor.u32 %v6714_v53, %v5181_v52 }
 0x120   :  { %3614 = vmatpush.bf16.msra.mxu2 %v4606_v57  ;;  %v4909_v57 = vld [vmem:[%s10434_s1 + $0x488] sm:$0xf]  ;;  %v6646_v60 = vld [vmem:[%s10434_s1 + $0x494] sm:$0xf0]  ;;  %v5310_v13 = vor.u32 %v6746_v55, %v5309_v54 }
 0x121   :  { %3627 = vmatpush.bf16.msra.mxu3 %v4734_v61  ;;  %v5037_v61 = vld [vmem:[%s10434_s1 + $0x588] sm:$0xf]  ;;  %v6678_v1 = vld [vmem:[%s10434_s1 + $0x594] sm:$0xf0] }
 0x122   :  { %3589 = vmatpush.bf16.msra.mxu0 %v4334_v6  ;;  %v5165_v2 = vld [vmem:[%s10434_s1 + $0x688] sm:$0xf]  ;;  %v6710_v3 = vld [vmem:[%s10434_s1 + $0x694] sm:$0xf0]  ;;  %v4910_v6 = vor.u32 %v6646_v60, %v4909_v57  ;;  %v3383_v7 = vpop.f32.mrf.mxu0  ;;  %v5038_v8 = vor.u32 %v6678_v1, %v5037_v61 }
 0x123   :  { %3602 = vmatpush.bf16.msra.mxu1 %v4462_v10  ;;  %v5293_v4 = vld [vmem:[%s10434_s1 + $0x788] sm:$0xf]  ;;  %v6742_v5 = vld [vmem:[%s10434_s1 + $0x794] sm:$0xf0]  ;;  %v5166_v9 = vor.u32 %v6710_v3, %v5165_v2  ;;  %v3384_v14 = vadd.f32 %v3383_v7, %v543_v0 }
 0x124   :  { %3615 = vmatpush.bf16.msra.mxu2 %v4590_v11  ;;  %v4893_v10 = vld [vmem:[%s10434_s1 + $0x468] sm:$0xf]  ;;  %v6642_v11 = vld [vmem:[%s10434_s1 + $0x474] sm:$0xf0] }
 0x125   :  { %3628 = vmatpush.bf16.msra.mxu3 %v4718_v15  ;;  %3590 = vmatmul.bf16.vlgmr.msra.gmra.mxu0 %v7372_v19  ;;  %v5021_v12 = vld [vmem:[%s10434_s1 + $0x568] sm:$0xf]  ;;  %v3396_v15 = vpop.f32.mrf.mxu1  ;;  %v6706_v26 = vld [vmem:[%s10434_s1 + $0x674] sm:$0xf0]  ;;  %v4894_v36 = vor.u32 %v6642_v11, %v4893_v10 }
 0x126   :  { %3634 = vmatpush.bf16.msrb.mxu0 %v4958_v17  ;;  %3603 = vmatmul.bf16.vlgmr.msra.gmra.mxu1 %v7376_v22  ;;  %v5294_v17 = vor.u32 %v6742_v5, %v5293_v4  ;;  %v5277_v27 = vld [vmem:[%s10434_s1 + $0x768] sm:$0xf]  ;;  %v6738_v32 = vld [vmem:[%s10434_s1 + $0x774] sm:$0xf0] }
 0x127   :  { %3647 = vmatpush.bf16.msrb.mxu1 %v5086_v21  ;;  %3616 = vmatmul.bf16.vlgmr.msra.gmra.mxu2 %v7370_v18  ;;  %v6674_v21 = vld [vmem:[%s10434_s1 + $0x574] sm:$0xf0]  ;;  %v4877_v43 = vld [vmem:[%s10434_s1 + $0x448] sm:$0xf] }
 0x128   :  { %3660 = vmatpush.bf16.msrb.mxu2 %v5214_v24  ;;  %3629 = vmatmul.bf16.vlgmr.msra.gmra.mxu3 %v7374_v20  ;;  %v5149_v24 = vld [vmem:[%s10434_s1 + $0x668] sm:$0xf]  ;;  %v5022_v37 = vor.u32 %v6674_v21, %v5021_v12  ;;  %v6638_v16 = vld [vmem:[%s10434_s1 + $0x454] sm:$0xf0] }
 0x129   :  { %3673 = vmatpush.bf16.msrb.mxu3 %v5342_v34  ;;  %v3397_v34 = vadd.f32 %v3396_v15, %v3384_v14  ;;  %v5150_v39 = vor.u32 %v6706_v26, %v5149_v24  ;;  %v6670_v48 = vld [vmem:[%s10434_s1 + $0x554] sm:$0xf0]  ;;  %v5133_v49 = vld [vmem:[%s10434_s1 + $0x648] sm:$0xf]  ;;  %v4878_v54 = vor.u32 %v6638_v16, %v4877_v43 }
 0x12a   :  { %3635 = vmatpush.bf16.msrb.mxu0 %v4942_v45  ;;  %v5005_v45 = vld [vmem:[%s10434_s1 + $0x548] sm:$0xf]  ;;  %v6702_v50 = vld [vmem:[%s10434_s1 + $0x654] sm:$0xf0] }
 0x12b   :  { %3648 = vmatpush.bf16.msrb.mxu1 %v5070_v46  ;;  %v3409_v46 = vpop.f32.mrf.mxu2  ;;  %v3422_v62 = vpop.f32.mrf.mxu3  ;;  %v5261_v52 = vld [vmem:[%s10434_s1 + $0x748] sm:$0xf]  ;;  %v6734_v53 = vld [vmem:[%s10434_s1 + $0x754] sm:$0xf0]  ;;  %v5006_v57 = vor.u32 %v6670_v48, %v5005_v45 }
 0x12c   :  { %3661 = vmatpush.bf16.msrb.mxu2 %v5198_v47  ;;  %v5278_v47 = vor.u32 %v6738_v32, %v5277_v27  ;;  %v6634_v60 = vld [vmem:[%s10434_s1 + $0x434] sm:$0xf0]  ;;  %v4989_v61 = vld [vmem:[%s10434_s1 + $0x528] sm:$0xf]  ;;  %v5262_v0 = vor.u32 %v6734_v53, %v5261_v52 }
 0x12d   :  { %3674 = vmatpush.bf16.msrb.mxu3 %v5326_v51  ;;  %v3410_v51 = vadd.f32 %v3409_v46, %v3397_v34  ;;  %v3398_v63 = vpop.f32.mrf.mxu1  ;;  %v5117_v1 = vld [vmem:[%s10434_s1 + $0x628] sm:$0xf]  ;;  %v6698_v2 = vld [vmem:[%s10434_s1 + $0x634] sm:$0xf0] }
 0x12e   :  { %3636 = vmatpush.bf16.msrb.mxu0 %v4926_v56  ;;  %v3385_v56 = vpop.f32.mrf.mxu0  ;;  %v5245_v3 = vld [vmem:[%s10434_s1 + $0x728] sm:$0xf]  ;;  %v6730_v4 = vld [vmem:[%s10434_s1 + $0x734] sm:$0xf0] }
 0x12f   :  { %3649 = vmatpush.bf16.msrb.mxu1 %v5054_v58  ;;  %v9057_v55 = vadd.f32 %v3422_v62, %v3410_v51  ;;  %v5134_v58 = vor.u32 %v6702_v50, %v5133_v49  ;;  %v6630_v7 = vld [vmem:[%s10434_s1 + $0x414] sm:$0xf0]  ;;  %v4973_v10 = vld [vmem:[%s10434_s1 + $0x508] sm:$0xf]  ;;  %v5246_v15 = vor.u32 %v6730_v4, %v5245_v3 }
 0x130   :  { %3662 = vmatpush.bf16.msrb.mxu2 %v5182_v59  ;;  %v4861_v59 = vld [vmem:[%s10434_s1 + $0x428] sm:$0xf]  ;;  %v6662_v11 = vld [vmem:[%s10434_s1 + $0x514] sm:$0xf0] }
 0x131   :  { %3675 = vmatpush.bf16.msrb.mxu3 %v5310_v13  ;;  %v6666_v13 = vld [vmem:[%s10434_s1 + $0x534] sm:$0xf0]  ;;  %v4862_v5 = vor.u32 %v6634_v60, %v4861_v59  ;;  %v5101_v12 = vld [vmem:[%s10434_s1 + $0x608] sm:$0xf]  ;;  %v4974_v16 = vor.u32 %v6662_v11, %v4973_v10 }
 0x132   :  { %3637 = vmatpush.bf16.msrb.mxu0 %v4910_v6  ;;  %v4845_v6 = vld [vmem:[%s10434_s1 + $0x408] sm:$0xf]  ;;  %v6726_v24 = vld [vmem:[%s10434_s1 + $0x714] sm:$0xf0] }
 0x133   :  { %3650 = vmatpush.bf16.msrb.mxu1 %v5038_v8  ;;  %v4990_v8 = vor.u32 %v6666_v13, %v4989_v61  ;;  %v3411_v14 = vpop.f32.mrf.mxu2  ;;  %v5229_v21 = vld [vmem:[%s10434_s1 + $0x708] sm:$0xf]  ;;  %v3424_v26 = vpop.f32.mrf.mxu3  ;;  %v6786_v32 = vld [vmem:[%s10434_s1 + $0x8f4] sm:$0xf0] }
 0x134   :  { %3663 = vmatpush.bf16.msrb.mxu2 %v5166_v9  ;;  %v5118_v9 = vor.u32 %v6698_v2, %v5117_v1  ;;  %v5469_v27 = vld [vmem:[%s10434_s1 + $0x8e8] sm:$0xf]  ;;  %v6850_v43 = vld [vmem:[%s10434_s1 + $0xaf4] sm:$0xf0]  ;;  %v5230_v48 = vor.u32 %v6726_v24, %v5229_v21 }
 0x135   :  { %3676 = vmatpush.bf16.msrb.mxu3 %v5294_v17  ;;  %v6694_v17 = vld [vmem:[%s10434_s1 + $0x614] sm:$0xf0]  ;;  %v5597_v34 = vld [vmem:[%s10434_s1 + $0x9e8] sm:$0xf]  ;;  %v5470_v49 = vor.u32 %v6786_v32, %v5469_v27 }
 0x136   :  { %3638 = vmatpush.bf16.msrb.mxu0 %v4894_v36  ;;  %v4846_v36 = vor.u32 %v6630_v7, %v4845_v6  ;;  %v5102_v45 = vor.u32 %v6694_v17, %v5101_v12  ;;  %v5853_v46 = vld [vmem:[%s10434_s1 + $0xbe8] sm:$0xf]  ;;  %v6782_v52 = vld [vmem:[%s10434_s1 + $0x8d4] sm:$0xf0] }
 0x137   :  { %3651 = vmatpush.bf16.msrb.mxu1 %v5022_v37  ;;  %v6818_v37 = vld [vmem:[%s10434_s1 + $0x9f4] sm:$0xf0]  ;;  %v5453_v62 = vld [vmem:[%s10434_s1 + $0x8c8] sm:$0xf] }
 0x138   :  { %3664 = vmatpush.bf16.msrb.mxu2 %v5150_v39  ;;  %v5725_v39 = vld [vmem:[%s10434_s1 + $0xae8] sm:$0xf]  ;;  %v5598_v50 = vor.u32 %v6818_v37, %v5597_v34  ;;  %v6814_v56 = vld [vmem:[%s10434_s1 + $0x9d4] sm:$0xf0]  ;;  %v5454_v61 = vor.u32 %v6782_v52, %v5453_v62 }
 0x139   :  { %3677 = vmatpush.bf16.msrb.mxu3 %v5278_v47  ;;  %v6882_v47 = vld [vmem:[%s10434_s1 + $0xbf4] sm:$0xf0]  ;;  %v5726_v51 = vor.u32 %v6850_v43, %v5725_v39  ;;  %v5581_v53 = vld [vmem:[%s10434_s1 + $0x9c8] sm:$0xf] }
 0x13a   :  { %3639 = vmatpush.bf16.msrb.mxu0 %v4878_v54  ;;  %v5854_v54 = vor.u32 %v6882_v47, %v5853_v46  ;;  %v5837_v59 = vld [vmem:[%s10434_s1 + $0xbc8] sm:$0xf]  ;;  %v6878_v60 = vld [vmem:[%s10434_s1 + $0xbd4] sm:$0xf0]  ;;  %v5582_v63 = vor.u32 %v6814_v56, %v5581_v53 }
 0x13b   :  { %3652 = vmatpush.bf16.msrb.mxu1 %v5006_v57  ;;  %v5709_v57 = vld [vmem:[%s10434_s1 + $0xac8] sm:$0xf]  ;;  %v6778_v1 = vld [vmem:[%s10434_s1 + $0x8b4] sm:$0xf0]  ;;  %v5838_v3 = vor.u32 %v6878_v60, %v5837_v59 }
 0x13c   :  { %3665 = vmatpush.bf16.msrb.mxu2 %v5134_v58  ;;  %v6846_v58 = vld [vmem:[%s10434_s1 + $0xad4] sm:$0xf0]  ;;  %v5437_v13 = vld [vmem:[%s10434_s1 + $0x8a8] sm:$0xf] }
 0x13d   :  { %3678 = vmatpush.bf16.msrb.mxu3 %v5262_v0  ;;  %v5710_v0 = vor.u32 %v6846_v58, %v5709_v57  ;;  %v5565_v2 = vld [vmem:[%s10434_s1 + $0x9a8] sm:$0xf]  ;;  %v6810_v4 = vld [vmem:[%s10434_s1 + $0x9b4] sm:$0xf0] }
 0x13e   :  { %3640 = vmatpush.bf16.msrb.mxu0 %v4862_v5  ;;  %v5693_v5 = vld [vmem:[%s10434_s1 + $0xaa8] sm:$0xf]  ;;  %v6842_v6 = vld [vmem:[%s10434_s1 + $0xab4] sm:$0xf0]  ;;  %v5566_v10 = vor.u32 %v6810_v4, %v5565_v2 }
 0x13f   :  { %3653 = vmatpush.bf16.msrb.mxu1 %v4990_v8  ;;  %v5821_v7 = vld [vmem:[%s10434_s1 + $0xba8] sm:$0xf]  ;;  %v6874_v8 = vld [vmem:[%s10434_s1 + $0xbb4] sm:$0xf0]  ;;  %v5694_v11 = vor.u32 %v6842_v6, %v5693_v5 }
 0x140   :  { %3666 = vmatpush.bf16.msrb.mxu2 %v5118_v9  ;;  %v5438_v9 = vor.u32 %v6778_v1, %v5437_v13  ;;  %v5421_v12 = vld [vmem:[%s10434_s1 + $0x888] sm:$0xf]  ;;  %v6774_v14 = vld [vmem:[%s10434_s1 + $0x894] sm:$0xf0]  ;;  %v5822_v17 = vor.u32 %v6874_v8, %v5821_v7 }
 0x141   :  { %3679 = vmatpush.bf16.msrb.mxu3 %v5246_v15  ;;  %v5549_v15 = vld [vmem:[%s10434_s1 + $0x988] sm:$0xf]  ;;  %v6806_v21 = vld [vmem:[%s10434_s1 + $0x994] sm:$0xf0]  ;;  %v5422_v34 = vor.u32 %v6774_v14, %v5421_v12 }
 0x142   :  { %3641 = vmatpush.bf16.msrb.mxu0 %v4846_v36  ;;  %v5677_v24 = vld [vmem:[%s10434_s1 + $0xa88] sm:$0xf]  ;;  %v6838_v26 = vld [vmem:[%s10434_s1 + $0xa94] sm:$0xf0]  ;;  %v3435_v36 = vpop.f32.mrf.mxu0  ;;  %v5550_v37 = vor.u32 %v6806_v21, %v5549_v15 }
 0x143   :  { %3654 = vmatpush.bf16.msrb.mxu1 %v4974_v16  ;;  %v5805_v27 = vld [vmem:[%s10434_s1 + $0xb88] sm:$0xf]  ;;  %v6870_v32 = vld [vmem:[%s10434_s1 + $0xb94] sm:$0xf0]  ;;  %v5678_v39 = vor.u32 %v6838_v26, %v5677_v24  ;;  %v3436_v46 = vadd.f32 %v3435_v36, %v9057_v55  ;;  %v3448_v47 = vpop.f32.mrf.mxu1 }
 0x144   :  { %3667 = vmatpush.bf16.msrb.mxu2 %v5102_v45  ;;  %v5405_v43 = vld [vmem:[%s10434_s1 + $0x868] sm:$0xf]  ;;  %v6770_v16 = vld [vmem:[%s10434_s1 + $0x874] sm:$0xf0] }
 0x145   :  { %3680 = vmatpush.bf16.msrb.mxu3 %v5230_v48  ;;  %3642 = vmatmul.bf16.vlgmr.msrb.gmra.mxu0 %v7534_v41  ;;  %v5533_v45 = vld [vmem:[%s10434_s1 + $0x968] sm:$0xf]  ;;  %v5806_v48 = vor.u32 %v6870_v32, %v5805_v27  ;;  %v6866_v55 = vld [vmem:[%s10434_s1 + $0xb74] sm:$0xf0]  ;;  %v3449_v52 = vadd.f32 %v3448_v47, %v3436_v46  ;;  %v5406_v53 = vor.u32 %v6770_v16, %v5405_v43 }
 0x146   :  { %3686 = vmatpush.bf16.msra.mxu0 %v5470_v49  ;;  %3655 = vmatmul.bf16.vlgmr.msrb.gmra.mxu1 %v7538_v44  ;;  %v6802_v49 = vld [vmem:[%s10434_s1 + $0x974] sm:$0xf0]  ;;  %v5789_v62 = vld [vmem:[%s10434_s1 + $0xb68] sm:$0xf] }
 0x147   :  { %3699 = vmatpush.bf16.msra.mxu1 %v5598_v50  ;;  %3668 = vmatmul.bf16.vlgmr.msrb.gmra.mxu2 %v7526_v38  ;;  %v5661_v50 = vld [vmem:[%s10434_s1 + $0xa68] sm:$0xf]  ;;  %v6766_v58 = vld [vmem:[%s10434_s1 + $0x854] sm:$0xf0] }
 0x148   :  { %3712 = vmatpush.bf16.msra.mxu2 %v5726_v51  ;;  %3681 = vmatmul.bf16.vlgmr.msrb.gmra.mxu3 %v7536_v42  ;;  %v6834_v51 = vld [vmem:[%s10434_s1 + $0xa74] sm:$0xf0]  ;;  %v5389_v57 = vld [vmem:[%s10434_s1 + $0x848] sm:$0xf] }
 0x149   :  { %3725 = vmatpush.bf16.msra.mxu3 %v5854_v54  ;;  %v5534_v54 = vor.u32 %v6802_v49, %v5533_v45  ;;  %v5662_v56 = vor.u32 %v6834_v51, %v5661_v50  ;;  %v5517_v59 = vld [vmem:[%s10434_s1 + $0x948] sm:$0xf]  ;;  %v6830_v13 = vld [vmem:[%s10434_s1 + $0xa54] sm:$0xf0]  ;;  %v5390_v5 = vor.u32 %v6766_v58, %v5389_v57 }
 0x14a   :  { %3687 = vmatpush.bf16.msra.mxu0 %v5454_v61  ;;  %v3461_v60 = vpop.f32.mrf.mxu2  ;;  %v5790_v61 = vor.u32 %v6866_v55, %v5789_v62  ;;  %v6862_v4 = vld [vmem:[%s10434_s1 + $0xb54] sm:$0xf0]  ;;  %v3437_v7 = vpop.f32.mrf.mxu0  ;;  %v5501_v12 = vld [vmem:[%s10434_s1 + $0x928] sm:$0xf] }
 0x14b   :  { %3700 = vmatpush.bf16.msra.mxu1 %v5582_v63  ;;  %v6798_v63 = vld [vmem:[%s10434_s1 + $0x954] sm:$0xf0]  ;;  %v3462_v1 = vadd.f32 %v3461_v60, %v3449_v52  ;;  %v3474_v2 = vpop.f32.mrf.mxu3  ;;  %v3450_v14 = vpop.f32.mrf.mxu1  ;;  %v5629_v21 = vld [vmem:[%s10434_s1 + $0xa28] sm:$0xf] }
 0x14c   :  { %3713 = vmatpush.bf16.msra.mxu2 %v5710_v0  ;;  %v5645_v0 = vld [vmem:[%s10434_s1 + $0xa48] sm:$0xf]  ;;  %v5518_v8 = vor.u32 %v6798_v63, %v5517_v59  ;;  %v6826_v24 = vld [vmem:[%s10434_s1 + $0xa34] sm:$0xf0] }
 0x14d   :  { %3726 = vmatpush.bf16.msra.mxu3 %v5838_v3  ;;  %v5773_v3 = vld [vmem:[%s10434_s1 + $0xb48] sm:$0xf]  ;;  %v9256_v6 = vadd.f32 %v3474_v2, %v3462_v1  ;;  %v6858_v27 = vld [vmem:[%s10434_s1 + $0xb34] sm:$0xf0] }
 0x14e   :  { %3688 = vmatpush.bf16.msra.mxu0 %v5438_v9  ;;  %v5646_v9 = vor.u32 %v6830_v13, %v5645_v0  ;;  %v5774_v15 = vor.u32 %v6862_v4, %v5773_v3  ;;  %v5757_v26 = vld [vmem:[%s10434_s1 + $0xb28] sm:$0xf]  ;;  %v6758_v36 = vld [vmem:[%s10434_s1 + $0x814] sm:$0xf0] }
 0x14f   :  { %3701 = vmatpush.bf16.msra.mxu1 %v5566_v10  ;;  %v5373_v10 = vld [vmem:[%s10434_s1 + $0x828] sm:$0xf]  ;;  %v6790_v16 = vld [vmem:[%s10434_s1 + $0x914] sm:$0xf0]  ;;  %v5758_v47 = vor.u32 %v6858_v27, %v5757_v26 }
 0x150   :  { %3714 = vmatpush.bf16.msra.mxu2 %v5694_v11  ;;  %v6762_v11 = vld [vmem:[%s10434_s1 + $0x834] sm:$0xf0]  ;;  %v5485_v43 = vld [vmem:[%s10434_s1 + $0x908] sm:$0xf] }
 0x151   :  { %3727 = vmatpush.bf16.msra.mxu3 %v5822_v17  ;;  %v6794_v17 = vld [vmem:[%s10434_s1 + $0x934] sm:$0xf0]  ;;  %v5374_v32 = vor.u32 %v6762_v11, %v5373_v10  ;;  %v5613_v45 = vld [vmem:[%s10434_s1 + $0xa08] sm:$0xf]  ;;  %v5486_v58 = vor.u32 %v6790_v16, %v5485_v43 }
 0x152   :  { %3689 = vmatpush.bf16.msra.mxu0 %v5422_v34  ;;  %v5357_v34 = vld [vmem:[%s10434_s1 + $0x808] sm:$0xf]  ;;  %v3463_v46 = vpop.f32.mrf.mxu2  ;;  %v6854_v50 = vld [vmem:[%s10434_s1 + $0xb14] sm:$0xf0] }
 0x153   :  { %3702 = vmatpush.bf16.msra.mxu1 %v5550_v37  ;;  %v5502_v37 = vor.u32 %v6794_v17, %v5501_v12  ;;  %v5741_v49 = vld [vmem:[%s10434_s1 + $0xb08] sm:$0xf]  ;;  %v3476_v51 = vpop.f32.mrf.mxu3  ;;  %v6914_v55 = vld [vmem:[%s10434_s1 + $0xcf4] sm:$0xf0] }
 0x154   :  { %3715 = vmatpush.bf16.msra.mxu2 %v5678_v39  ;;  %v5630_v39 = vor.u32 %v6826_v24, %v5629_v21  ;;  %v5981_v62 = vld [vmem:[%s10434_s1 + $0xce8] sm:$0xf]  ;;  %v6978_v57 = vld [vmem:[%s10434_s1 + $0xef4] sm:$0xf0]  ;;  %v5742_v63 = vor.u32 %v6854_v50, %v5741_v49 }
 0x155   :  { %3728 = vmatpush.bf16.msra.mxu3 %v5806_v48  ;;  %v6822_v48 = vld [vmem:[%s10434_s1 + $0xa14] sm:$0xf0]  ;;  %v6109_v52 = vld [vmem:[%s10434_s1 + $0xde8] sm:$0xf]  ;;  %v5982_v0 = vor.u32 %v6914_v55, %v5981_v62 }
 0x156   :  { %3690 = vmatpush.bf16.msra.mxu0 %v5406_v53  ;;  %v5358_v53 = vor.u32 %v6758_v36, %v5357_v34  ;;  %v5614_v59 = vor.u32 %v6822_v48, %v5613_v45  ;;  %v6365_v60 = vld [vmem:[%s10434_s1 + $0xfe8] sm:$0xf]  ;;  %v6910_v3 = vld [vmem:[%s10434_s1 + $0xcd4] sm:$0xf0] }
 0x157   :  { %3703 = vmatpush.bf16.msra.mxu1 %v5534_v54  ;;  %v6946_v54 = vld [vmem:[%s10434_s1 + $0xdf4] sm:$0xf0]  ;;  %v5965_v2 = vld [vmem:[%s10434_s1 + $0xcc8] sm:$0xf] }
 0x158   :  { %3716 = vmatpush.bf16.msra.mxu2 %v5662_v56  ;;  %v6237_v56 = vld [vmem:[%s10434_s1 + $0xee8] sm:$0xf]  ;;  %v6110_v13 = vor.u32 %v6946_v54, %v6109_v52  ;;  %v6942_v7 = vld [vmem:[%s10434_s1 + $0xdd4] sm:$0xf0]  ;;  %v5966_v12 = vor.u32 %v6910_v3, %v5965_v2 }
 0x159   :  { %3729 = vmatpush.bf16.msra.mxu3 %v5790_v61  ;;  %v7010_v61 = vld [vmem:[%s10434_s1 + $0xff4] sm:$0xf0]  ;;  %v6238_v1 = vor.u32 %v6978_v57, %v6237_v56  ;;  %v6093_v4 = vld [vmem:[%s10434_s1 + $0xdc8] sm:$0xf] }
 0x15a   :  { %3691 = vmatpush.bf16.msra.mxu0 %v5390_v5  ;;  %v6366_v5 = vor.u32 %v7010_v61, %v6365_v60  ;;  %v6349_v10 = vld [vmem:[%s10434_s1 + $0xfc8] sm:$0xf]  ;;  %v7006_v11 = vld [vmem:[%s10434_s1 + $0xfd4] sm:$0xf0]  ;;  %v6094_v14 = vor.u32 %v6942_v7, %v6093_v4 }
 0x15b   :  { %3704 = vmatpush.bf16.msra.mxu1 %v5518_v8  ;;  %v6221_v8 = vld [vmem:[%s10434_s1 + $0xec8] sm:$0xf]  ;;  %v6906_v21 = vld [vmem:[%s10434_s1 + $0xcb4] sm:$0xf0]  ;;  %v6350_v26 = vor.u32 %v7006_v11, %v6349_v10 }
 0x15c   :  { %3717 = vmatpush.bf16.msra.mxu2 %v5646_v9  ;;  %v6974_v9 = vld [vmem:[%s10434_s1 + $0xed4] sm:$0xf0]  ;;  %v5949_v17 = vld [vmem:[%s10434_s1 + $0xca8] sm:$0xf] }
 0x15d   :  { %3730 = vmatpush.bf16.msra.mxu3 %v5774_v15  ;;  %v6222_v15 = vor.u32 %v6974_v9, %v6221_v8  ;;  %v6077_v24 = vld [vmem:[%s10434_s1 + $0xda8] sm:$0xf]  ;;  %v6938_v27 = vld [vmem:[%s10434_s1 + $0xdb4] sm:$0xf0] }
 0x15e   :  { %3692 = vmatpush.bf16.msra.mxu0 %v5374_v32  ;;  %v6205_v32 = vld [vmem:[%s10434_s1 + $0xea8] sm:$0xf]  ;;  %v6970_v34 = vld [vmem:[%s10434_s1 + $0xeb4] sm:$0xf0]  ;;  %v6078_v43 = vor.u32 %v6938_v27, %v6077_v24 }
 0x15f   :  { %3705 = vmatpush.bf16.msra.mxu1 %v5502_v37  ;;  %v6333_v36 = vld [vmem:[%s10434_s1 + $0xfa8] sm:$0xf]  ;;  %v7002_v37 = vld [vmem:[%s10434_s1 + $0xfb4] sm:$0xf0]  ;;  %v6206_v16 = vor.u32 %v6970_v34, %v6205_v32 }
 0x160   :  { %3718 = vmatpush.bf16.msra.mxu2 %v5630_v39  ;;  %v5950_v39 = vor.u32 %v6906_v21, %v5949_v17  ;;  %v5933_v45 = vld [vmem:[%s10434_s1 + $0xc88] sm:$0xf]  ;;  %v6902_v46 = vld [vmem:[%s10434_s1 + $0xc94] sm:$0xf0]  ;;  %v6334_v48 = vor.u32 %v7002_v37, %v6333_v36 }
 0x161   :  { %3731 = vmatpush.bf16.msra.mxu3 %v5758_v47  ;;  %v6061_v47 = vld [vmem:[%s10434_s1 + $0xd88] sm:$0xf]  ;;  %v6934_v49 = vld [vmem:[%s10434_s1 + $0xd94] sm:$0xf0]  ;;  %v5934_v54 = vor.u32 %v6902_v46, %v5933_v45 }
 0x162   :  { %3693 = vmatpush.bf16.msra.mxu0 %v5358_v53  ;;  %v6189_v50 = vld [vmem:[%s10434_s1 + $0xe88] sm:$0xf]  ;;  %v6966_v51 = vld [vmem:[%s10434_s1 + $0xe94] sm:$0xf0]  ;;  %v3487_v62 = vpop.f32.mrf.mxu0  ;;  %v6062_v57 = vor.u32 %v6934_v49, %v6061_v47 }
 0x163   :  { %3706 = vmatpush.bf16.msra.mxu1 %v5486_v58  ;;  %v6317_v55 = vld [vmem:[%s10434_s1 + $0xf88] sm:$0xf]  ;;  %v6998_v52 = vld [vmem:[%s10434_s1 + $0xf94] sm:$0xf0]  ;;  %v3488_v53 = vadd.f32 %v3487_v62, %v9256_v6  ;;  %v3500_v56 = vpop.f32.mrf.mxu1  ;;  %v6190_v58 = vor.u32 %v6966_v51, %v6189_v50 }
 0x164   :  { %3719 = vmatpush.bf16.msra.mxu2 %v5614_v59  ;;  %v5917_v59 = vld [vmem:[%s10434_s1 + $0xc68] sm:$0xf]  ;;  %v6898_v60 = vld [vmem:[%s10434_s1 + $0xc74] sm:$0xf0]  ;;  %v6318_v6 = vor.u32 %v6998_v52, %v6317_v55 }
 0x165   :  { %3732 = vmatpush.bf16.msra.mxu3 %v5742_v63  ;;  %3694 = vmatmul.bf16.vlgmr.msra.gmra.mxu0 %v7727_v25  ;;  %v6045_v61 = vld [vmem:[%s10434_s1 + $0xd68] sm:$0xf]  ;;  %v3501_v63 = vadd.f32 %v3500_v56, %v3488_v53  ;;  %v6994_v3 = vld [vmem:[%s10434_s1 + $0xf74] sm:$0xf0]  ;;  %v5918_v4 = vor.u32 %v6898_v60, %v5917_v59 }
 0x166   :  { %3738 = vmatpush.bf16.msrb.mxu0 %v5982_v0  ;;  %3707 = vmatmul.bf16.vlgmr.msra.gmra.mxu1 %v7740_v30  ;;  %v6930_v0 = vld [vmem:[%s10434_s1 + $0xd74] sm:$0xf0]  ;;  %v6301_v2 = vld [vmem:[%s10434_s1 + $0xf68] sm:$0xf] }
 0x167   :  { %3751 = vmatpush.bf16.msrb.mxu1 %v6110_v13  ;;  %3720 = vmatmul.bf16.vlgmr.msra.gmra.mxu2 %v7738_v29  ;;  %v6173_v13 = vld [vmem:[%s10434_s1 + $0xe68] sm:$0xf]  ;;  %v6894_v9 = vld [vmem:[%s10434_s1 + $0xc54] sm:$0xf0]  ;;  %v6302_v11 = vor.u32 %v6994_v3, %v6301_v2  ;;  %v6560_v2 = vld [vmem:[%s10434_s1 + $0x1ec] sm:$0xf] }
 0x168   :  { %3764 = vmatpush.bf16.msrb.mxu2 %v6238_v1  ;;  %3733 = vmatmul.bf16.vlgmr.msra.gmra.mxu3 %v7748_v33  ;;  %v6962_v1 = vld [vmem:[%s10434_s1 + $0xe74] sm:$0xf0]  ;;  %v5901_v8 = vld [vmem:[%s10434_s1 + $0xc48] sm:$0xf] }
 0x169   :  { %3777 = vmatpush.bf16.msrb.mxu3 %v6366_v5  ;;  %v6046_v5 = vor.u32 %v6930_v0, %v6045_v61  ;;  %v6174_v7 = vor.u32 %v6962_v1, %v6173_v13  ;;  %v6029_v10 = vld [vmem:[%s10434_s1 + $0xd48] sm:$0xf]  ;;  %v6958_v17 = vld [vmem:[%s10434_s1 + $0xe54] sm:$0xf0]  ;;  %v5902_v34 = vor.u32 %v6894_v9, %v5901_v8  ;;  %v6528_v13 = vld [vmem:[%s10434_s1 + $0xec] sm:$0xf] }
 0x16a   :  { %3739 = vmatpush.bf16.msrb.mxu0 %v5966_v12  ;;  %v3513_v12 = vpop.f32.mrf.mxu2  ;;  %v6990_v27 = vld [vmem:[%s10434_s1 + $0xf54] sm:$0xf0]  ;;  %v3489_v32 = vpop.f32.mrf.mxu0  ;;  %v6013_v46 = vld [vmem:[%s10434_s1 + $0xd28] sm:$0xf]  ;;  %v4447_v1 = vld [vmem:[%s10434_s1 + $0xf8] sm:$0xf0] }
 0x16b   :  { %3752 = vmatpush.bf16.msrb.mxu1 %v6094_v14  ;;  %v6926_v14 = vld [vmem:[%s10434_s1 + $0xd54] sm:$0xf0]  ;;  %v3514_v21 = vadd.f32 %v3513_v12, %v3501_v63  ;;  %v3526_v24 = vpop.f32.mrf.mxu3  ;;  %v3502_v36 = vpop.f32.mrf.mxu1  ;;  %v6141_v49 = vld [vmem:[%s10434_s1 + $0xe28] sm:$0xf]  ;;  %v4703_v8 = vld [vmem:[%s10434_s1 + $0x2f8] sm:$0xf0] }
 0x16c   :  { %3765 = vmatpush.bf16.msrb.mxu2 %v6222_v15  ;;  %v6157_v15 = vld [vmem:[%s10434_s1 + $0xe48] sm:$0xf]  ;;  %v6890_v45 = vld [vmem:[%s10434_s1 + $0xc34] sm:$0xf0]  ;;  %v4831_v12 = vld [vmem:[%s10434_s1 + $0x3f8] sm:$0xf0] }
 0x16d   :  { %3778 = vmatpush.bf16.msrb.mxu3 %v6350_v26  ;;  %v6285_v26 = vld [vmem:[%s10434_s1 + $0xf48] sm:$0xf]  ;;  %v9455_v37 = vadd.f32 %v3526_v24, %v3514_v21  ;;  %v6954_v50 = vld [vmem:[%s10434_s1 + $0xe34] sm:$0xf0]  ;;  %v6524_v24 = vld [vmem:[%s10434_s1 + $0xcc] sm:$0xf] }
 0x16e   :  { %3740 = vmatpush.bf16.msrb.mxu0 %v5950_v39  ;;  %v6030_v39 = vor.u32 %v6926_v14, %v6029_v10  ;;  %v6286_v47 = vor.u32 %v6990_v27, %v6285_v26  ;;  %v6269_v51 = vld [vmem:[%s10434_s1 + $0xf28] sm:$0xf]  ;;  %v6986_v62 = vld [vmem:[%s10434_s1 + $0xf34] sm:$0xf0]  ;;  %v6142_v56 = vor.u32 %v6954_v50, %v6141_v49  ;;  %v4431_v26 = vld [vmem:[%s10434_s1 + $0xd8] sm:$0xf0] }
 0x16f   :  { %3753 = vmatpush.bf16.msrb.mxu1 %v6078_v43  ;;  %v6158_v43 = vor.u32 %v6958_v17, %v6157_v15  ;;  %v5869_v52 = vld [vmem:[%s10434_s1 + $0xc08] sm:$0xf]  ;;  %v6886_v53 = vld [vmem:[%s10434_s1 + $0xc14] sm:$0xf0]  ;;  %v6270_v60 = vor.u32 %v6986_v62, %v6269_v51  ;;  %v4450_v15 = vor.u32 %v6528_v13, %v4447_v1  ;;  %v6556_v27 = vld [vmem:[%s10434_s1 + $0x1cc] sm:$0xf] }
 0x170   :  { %3766 = vmatpush.bf16.msrb.mxu2 %v6206_v16  ;;  %v5885_v16 = vld [vmem:[%s10434_s1 + $0xc28] sm:$0xf]  ;;  %v6950_v61 = vld [vmem:[%s10434_s1 + $0xe14] sm:$0xf0]  ;;  %v6588_v36 = vld [vmem:[%s10434_s1 + $0x2cc] sm:$0xf] }
 0x171   :  { %3779 = vmatpush.bf16.msrb.mxu3 %v6334_v48  ;;  %v6922_v48 = vld [vmem:[%s10434_s1 + $0xd34] sm:$0xf0]  ;;  %v5886_v55 = vor.u32 %v6890_v45, %v5885_v16  ;;  %v6125_v59 = vld [vmem:[%s10434_s1 + $0xe08] sm:$0xf]  ;;  %v4815_v16 = vld [vmem:[%s10434_s1 + $0x3d8] sm:$0xf0]  ;;  %v4434_v45 = vor.u32 %v6524_v24, %v4431_v26 }
 0x172   :  { %3741 = vmatpush.bf16.msrb.mxu0 %v5934_v54  ;;  %v6014_v54 = vor.u32 %v6922_v48, %v6013_v46  ;;  %v6982_v63 = vld [vmem:[%s10434_s1 + $0xf14] sm:$0xf0]  ;;  %v3515_v0 = vpop.f32.mrf.mxu2  ;;  %v6126_v10 = vor.u32 %v6950_v61, %v6125_v59  ;;  %v6520_v48 = vld [vmem:[%s10434_s1 + $0xac] sm:$0xf]  ;;  %v4415_v49 = vld [vmem:[%s10434_s1 + $0xb8] sm:$0xf0] }
 0x173   :  { %3754 = vmatpush.bf16.msrb.mxu1 %v6062_v57  ;;  %v5997_v57 = vld [vmem:[%s10434_s1 + $0xd08] sm:$0xf]  ;;  %v3528_v3 = vpop.f32.mrf.mxu3  ;;  %v6552_v50 = vld [vmem:[%s10434_s1 + $0x1ac] sm:$0xf]  ;;  %v4543_v62 = vld [vmem:[%s10434_s1 + $0x1b8] sm:$0xf0] }
 0x174   :  { %3767 = vmatpush.bf16.msrb.mxu2 %v6190_v58  ;;  %v6918_v58 = vld [vmem:[%s10434_s1 + $0xd14] sm:$0xf0]  ;;  %v6516_v59 = vld [vmem:[%s10434_s1 + $0x8c] sm:$0xf]  ;;  %v4655_v13 = vld [vmem:[%s10434_s1 + $0x298] sm:$0xf0] }
 0x175   :  { %3780 = vmatpush.bf16.msrb.mxu3 %v6318_v6  ;;  %v6253_v6 = vld [vmem:[%s10434_s1 + $0xf08] sm:$0xf]  ;;  %v5998_v9 = vor.u32 %v6918_v58, %v5997_v57  ;;  %v4546_v57 = vor.u32 %v6552_v50, %v4543_v62  ;;  %v6548_v61 = vld [vmem:[%s10434_s1 + $0x18c] sm:$0xf]  ;;  %v4783_v3 = vld [vmem:[%s10434_s1 + $0x398] sm:$0xf0] }
 0x176   :  { %3742 = vmatpush.bf16.msrb.mxu0 %v5918_v4  ;;  %v5870_v4 = vor.u32 %v6886_v53, %v5869_v52  ;;  %v6254_v14 = vor.u32 %v6982_v63, %v6253_v6  ;;  %v4671_v52 = vld [vmem:[%s10434_s1 + $0x2b8] sm:$0xf0]  ;;  %v6616_v53 = vld [vmem:[%s10434_s1 + $0x3ac] sm:$0xf] }
 0x177   :  { %3755 = vmatpush.bf16.msrb.mxu1 %v6046_v5  ;;  %v4575_v5 = vld [vmem:[%s10434_s1 + $0x1f8] sm:$0xf0]  ;;  %v6580_v0 = vld [vmem:[%s10434_s1 + $0x28c] sm:$0xf] }
 0x178   :  { %3768 = vmatpush.bf16.msrb.mxu2 %v6174_v7  ;;  %v6592_v7 = vld [vmem:[%s10434_s1 + $0x2ec] sm:$0xf]  ;;  %v4578_v17 = vor.u32 %v6560_v2, %v4575_v5  ;;  %v4527_v63 = vld [vmem:[%s10434_s1 + $0x198] sm:$0xf0] }
 0x179   :  { %3781 = vmatpush.bf16.msrb.mxu3 %v6302_v11  ;;  %v6624_v11 = vld [vmem:[%s10434_s1 + $0x3ec] sm:$0xf]  ;;  %v4706_v21 = vor.u32 %v6592_v7, %v4703_v8  ;;  %v4530_v8 = vor.u32 %v6548_v61, %v4527_v63  ;;  %v4767_v26 = vld [vmem:[%s10434_s1 + $0x378] sm:$0xf0] }
 0x17a   :  { %3743 = vmatpush.bf16.msrb.mxu0 %v5902_v34  ;;  %v4834_v32 = vor.u32 %v6624_v11, %v4831_v12  ;;  %v4559_v34 = vld [vmem:[%s10434_s1 + $0x1d8] sm:$0xf0]  ;;  %v6612_v2 = vld [vmem:[%s10434_s1 + $0x38c] sm:$0xf] }
 0x17b   :  { %3756 = vmatpush.bf16.msrb.mxu1 %v6030_v39  ;;  %v4687_v39 = vld [vmem:[%s10434_s1 + $0x2d8] sm:$0xf0]  ;;  %v4562_v46 = vor.u32 %v6556_v27, %v4559_v34  ;;  %v6544_v12 = vld [vmem:[%s10434_s1 + $0x16c] sm:$0xf] }
 0x17c   :  { %3769 = vmatpush.bf16.msrb.mxu2 %v6158_v43  ;;  %v6620_v43 = vld [vmem:[%s10434_s1 + $0x3cc] sm:$0xf]  ;;  %v4383_v11 = vld [vmem:[%s10434_s1 + $0x78] sm:$0xf0] }
 0x17d   :  { %3782 = vmatpush.bf16.msrb.mxu3 %v6286_v47  ;;  %v4690_v47 = vor.u32 %v6588_v36, %v4687_v39  ;;  %v4818_v51 = vor.u32 %v6620_v43, %v4815_v16  ;;  %v6608_v24 = vld [vmem:[%s10434_s1 + $0x36c] sm:$0xf]  ;;  %v4367_v39 = vld [vmem:[%s10434_s1 + $0x58] sm:$0xf0] }
 0x17e   :  { %3744 = vmatpush.bf16.msrb.mxu0 %v5886_v55  ;;  %v6584_v55 = vld [vmem:[%s10434_s1 + $0x2ac] sm:$0xf]  ;;  %v4770_v16 = vor.u32 %v6608_v24, %v4767_v26  ;;  %v4751_v62 = vld [vmem:[%s10434_s1 + $0x358] sm:$0xf0] }
 0x17f   :  { %3757 = vmatpush.bf16.msrb.mxu1 %v6014_v54  ;;  %v4799_v54 = vld [vmem:[%s10434_s1 + $0x3b8] sm:$0xf0]  ;;  %v4674_v58 = vor.u32 %v6584_v55, %v4671_v52  ;;  %v6508_v36 = vld [vmem:[%s10434_s1 + $0x4c] sm:$0xf] }
 0x180   :  { %3770 = vmatpush.bf16.msrb.mxu2 %v6142_v56  ;;  %v4418_v56 = vor.u32 %v6520_v48, %v4415_v49  ;;  %v4802_v6 = vor.u32 %v6616_v53, %v4799_v54  ;;  %v6540_v43 = vld [vmem:[%s10434_s1 + $0x14c] sm:$0xf]  ;;  %v4623_v48 = vld [vmem:[%s10434_s1 + $0x258] sm:$0xf0]  ;;  %v4370_v52 = vor.u32 %v6508_v36, %v4367_v39 }
 0x181   :  { %3783 = vmatpush.bf16.msrb.mxu3 %v6270_v60  ;;  %v4399_v60 = vld [vmem:[%s10434_s1 + $0x98] sm:$0xf0]  ;;  %v6568_v63 = vld [vmem:[%s10434_s1 + $0x22c] sm:$0xf] }
 0x182   :  { %3745 = vmatpush.bf16.msrb.mxu0 %v5870_v4  ;;  %v3539_v1 = vpop.f32.mrf.mxu0  ;;  %v4402_v5 = vor.u32 %v6516_v59, %v4399_v60  ;;  %v4351_v59 = vld [vmem:[%s10434_s1 + $0x38] sm:$0xf0]  ;;  %v6536_v60 = vld [vmem:[%s10434_s1 + $0x12c] sm:$0xf] }
 0x183   :  { %3758 = vmatpush.bf16.msrb.mxu1 %v5998_v9  ;;  %v3540_v4 = vadd.f32 %v3539_v1, %v9455_v37  ;;  %v3552_v7 = vpop.f32.mrf.mxu1  ;;  %v4658_v9 = vor.u32 %v6580_v0, %v4655_v13  ;;  %v4786_v37 = vor.u32 %v6612_v2, %v4783_v3  ;;  %v4607_v0 = vld [vmem:[%s10434_s1 + $0x238] sm:$0xf0]  ;;  %v6600_v13 = vld [vmem:[%s10434_s1 + $0x32c] sm:$0xf] }
 0x184   :  { %3771 = vmatpush.bf16.msrb.mxu2 %v6126_v10  ;;  %v6512_v10 = vld [vmem:[%s10434_s1 + $0x6c] sm:$0xf]  ;;  %v4735_v1 = vld [vmem:[%s10434_s1 + $0x338] sm:$0xf0] }
 0x185   :  { %3784 = vmatpush.bf16.msrb.mxu3 %v6254_v14  ;;  %3746 = vmatmul.bf16.vlgmr.msrb.gmra.mxu0 %v7937_v23  ;;  %v3553_v14 = vadd.f32 %v3552_v7, %v3540_v4  ;;  %v4386_v27 = vor.u32 %v6512_v10, %v4383_v11  ;;  %v6500_v3 = vld [vmem:[%s10434_s1 + $0xc] sm:$0xf]  ;;  %v4335_v4 = vld [vmem:[%s10434_s1 + $0x18] sm:$0xf0]  ;;  %v4610_v7 = vor.u32 %v6568_v63, %v4607_v0 }
 0x186   :  { %3790 = vmatpush.bf16.msra.mxu0 %v4450_v15  ;;  %3759 = vmatmul.bf16.vlgmr.msrb.gmra.mxu1 %v7950_v31  ;;  %v4511_v15 = vld [vmem:[%s10434_s1 + $0x178] sm:$0xf0]  ;;  %v6564_v10 = vld [vmem:[%s10434_s1 + $0x20c] sm:$0xf]  ;;  %v4738_v11 = vor.u32 %v6600_v13, %v4735_v1 }
 0x187   :  { %3803 = vmatpush.bf16.msra.mxu1 %v4578_v17  ;;  %3772 = vmatmul.bf16.vlgmr.msrb.gmra.mxu2 %v7948_v28  ;;  %v6576_v17 = vld [vmem:[%s10434_s1 + $0x26c] sm:$0xf]  ;;  %v5215_v36 = vld [vmem:[%s10434_s1 + $0x6f8] sm:$0xf0] }
 0x188   :  { %3816 = vmatpush.bf16.msra.mxu2 %v4706_v21  ;;  %3785 = vmatmul.bf16.vlgmr.msrb.gmra.mxu3 %v7958_v35  ;;  %v4639_v21 = vld [vmem:[%s10434_s1 + $0x278] sm:$0xf0]  ;;  %v6688_v24 = vld [vmem:[%s10434_s1 + $0x5ec] sm:$0xf] }
 0x189   :  { %3829 = vmatpush.bf16.msra.mxu3 %v4834_v32  ;;  %v4514_v32 = vor.u32 %v6544_v12, %v4511_v15  ;;  %v4642_v34 = vor.u32 %v6576_v17, %v4639_v21  ;;  %v4591_v12 = vld [vmem:[%s10434_s1 + $0x218] sm:$0xf0]  ;;  %v6656_v17 = vld [vmem:[%s10434_s1 + $0x4ec] sm:$0xf] }
 0x18a   :  { %3791 = vmatpush.bf16.msra.mxu0 %v4434_v45  ;;  %v3565_v45 = vpop.f32.mrf.mxu2  ;;  %v3541_v55 = vpop.f32.mrf.mxu0  ;;  %v4959_v21 = vld [vmem:[%s10434_s1 + $0x4f8] sm:$0xf0]  ;;  %v6680_v0 = vld [vmem:[%s10434_s1 + $0x5ac] sm:$0xf] }
 0x18b   :  { %3804 = vmatpush.bf16.msra.mxu1 %v4562_v46  ;;  %v4495_v46 = vld [vmem:[%s10434_s1 + $0x158] sm:$0xf0]  ;;  %v3566_v49 = vadd.f32 %v3565_v45, %v3553_v14  ;;  %v3578_v50 = vpop.f32.mrf.mxu3  ;;  %v3554_v53 = vpop.f32.mrf.mxu1 }
 0x18c   :  { %3817 = vmatpush.bf16.msra.mxu2 %v4690_v47  ;;  %v6572_v47 = vld [vmem:[%s10434_s1 + $0x24c] sm:$0xf]  ;;  %v4719_v14 = vld [vmem:[%s10434_s1 + $0x318] sm:$0xf0] }
 0x18d   :  { %3830 = vmatpush.bf16.msra.mxu3 %v4818_v51  ;;  %v6604_v51 = vld [vmem:[%s10434_s1 + $0x34c] sm:$0xf]  ;;  %v9654_v54 = vadd.f32 %v3578_v50, %v3566_v49  ;;  %v5343_v45 = vld [vmem:[%s10434_s1 + $0x7f8] sm:$0xf0] }
 0x18e   :  { %3792 = vmatpush.bf16.msra.mxu0 %v4418_v56  ;;  %v4498_v56 = vor.u32 %v6540_v43, %v4495_v46  ;;  %v4754_v61 = vor.u32 %v6604_v51, %v4751_v62  ;;  %v4594_v43 = vor.u32 %v6564_v10, %v4591_v12  ;;  %v6652_v50 = vld [vmem:[%s10434_s1 + $0x4cc] sm:$0xf]  ;;  %v4943_v51 = vld [vmem:[%s10434_s1 + $0x4d8] sm:$0xf0] }
 0x18f   :  { %3805 = vmatpush.bf16.msra.mxu1 %v4546_v57  ;;  %v4626_v57 = vor.u32 %v6572_v47, %v4623_v48  ;;  %v4962_v47 = vor.u32 %v6656_v17, %v4959_v21  ;;  %v6684_v62 = vld [vmem:[%s10434_s1 + $0x5cc] sm:$0xf]  ;;  %v4927_v63 = vld [vmem:[%s10434_s1 + $0x4b8] sm:$0xf0] }
 0x190   :  { %3818 = vmatpush.bf16.msra.mxu2 %v4674_v58  ;;  %v6504_v58 = vld [vmem:[%s10434_s1 + $0x2c] sm:$0xf]  ;;  %v5055_v1 = vld [vmem:[%s10434_s1 + $0x5b8] sm:$0xf0] }
 0x191   :  { %3831 = vmatpush.bf16.msra.mxu3 %v4802_v6  ;;  %v4479_v6 = vld [vmem:[%s10434_s1 + $0x138] sm:$0xf0]  ;;  %v4354_v2 = vor.u32 %v6504_v58, %v4351_v59  ;;  %v6716_v53 = vld [vmem:[%s10434_s1 + $0x6cc] sm:$0xf]  ;;  %v4946_v59 = vor.u32 %v6652_v50, %v4943_v51 }
 0x192   :  { %3793 = vmatpush.bf16.msra.mxu0 %v4402_v5  ;;  %v4482_v5 = vor.u32 %v6536_v60, %v4479_v6  ;;  %v3567_v15 = vpop.f32.mrf.mxu2  ;;  %v5327_v58 = vld [vmem:[%s10434_s1 + $0x7d8] sm:$0xf0]  ;;  %v6648_v6 = vld [vmem:[%s10434_s1 + $0x4ac] sm:$0xf] }
 0x193   :  { %3806 = vmatpush.bf16.msra.mxu1 %v4530_v8  ;;  %v6532_v8 = vld [vmem:[%s10434_s1 + $0x10c] sm:$0xf]  ;;  %v3580_v26 = vpop.f32.mrf.mxu3  ;;  %v4911_v10 = vld [vmem:[%s10434_s1 + $0x498] sm:$0xf0] }
 0x194   :  { %3819 = vmatpush.bf16.msra.mxu2 %v4658_v9  ;;  %v4463_v9 = vld [vmem:[%s10434_s1 + $0x118] sm:$0xf0]  ;;  %v6740_v15 = vld [vmem:[%s10434_s1 + $0x78c] sm:$0xf] }
 0x195   :  { %3832 = vmatpush.bf16.msra.mxu3 %v4786_v37  ;;  %v6596_v37 = vld [vmem:[%s10434_s1 + $0x30c] sm:$0xf]  ;;  %v4466_v39 = vor.u32 %v6532_v8, %v4463_v9  ;;  %v5039_v12 = vld [vmem:[%s10434_s1 + $0x598] sm:$0xf0] }
 0x196   :  { %3794 = vmatpush.bf16.msra.mxu0 %v4386_v27  ;;  %v4338_v27 = vor.u32 %v6500_v3, %v4335_v4  ;;  %v4722_v46 = vor.u32 %v6596_v37, %v4719_v14  ;;  %v5183_v3 = vld [vmem:[%s10434_s1 + $0x6b8] sm:$0xf0]  ;;  %v6744_v4 = vld [vmem:[%s10434_s1 + $0x7ac] sm:$0xf] }
 0x197   :  { %3807 = vmatpush.bf16.msra.mxu1 %v4514_v32  ;;  %v5087_v32 = vld [vmem:[%s10434_s1 + $0x5f8] sm:$0xf0]  ;;  %v6644_v8 = vld [vmem:[%s10434_s1 + $0x48c] sm:$0xf] }
 0x198   :  { %3820 = vmatpush.bf16.msra.mxu2 %v4642_v34  ;;  %v6720_v34 = vld [vmem:[%s10434_s1 + $0x6ec] sm:$0xf]  ;;  %v5090_v48 = vor.u32 %v6688_v24, %v5087_v32  ;;  %v5167_v14 = vld [vmem:[%s10434_s1 + $0x698] sm:$0xf0]  ;;  %v4914_v21 = vor.u32 %v6644_v8, %v4911_v10 }
 0x199   :  { %3833 = vmatpush.bf16.msra.mxu3 %v4770_v16  ;;  %v6752_v16 = vld [vmem:[%s10434_s1 + $0x7ec] sm:$0xf]  ;;  %v5218_v49 = vor.u32 %v6720_v34, %v5215_v36  ;;  %v5295_v17 = vld [vmem:[%s10434_s1 + $0x798] sm:$0xf0] }
 0x19a   :  { %3795 = vmatpush.bf16.msra.mxu0 %v4370_v52  ;;  %v5346_v55 = vor.u32 %v6752_v16, %v5343_v45  ;;  %v5071_v52 = vld [vmem:[%s10434_s1 + $0x5d8] sm:$0xf0]  ;;  %v6708_v37 = vld [vmem:[%s10434_s1 + $0x68c] sm:$0xf]  ;;  %v5298_v16 = vor.u32 %v6740_v15, %v5295_v17 }
 0x19b   :  { %3808 = vmatpush.bf16.msra.mxu1 %v4498_v56  ;;  %v5199_v56 = vld [vmem:[%s10434_s1 + $0x6d8] sm:$0xf0]  ;;  %v5074_v60 = vor.u32 %v6684_v62, %v5071_v52  ;;  %v6640_v32 = vld [vmem:[%s10434_s1 + $0x46c] sm:$0xf] }
 0x19c   :  { %3821 = vmatpush.bf16.msra.mxu2 %v4626_v57  ;;  %v6748_v57 = vld [vmem:[%s10434_s1 + $0x7cc] sm:$0xf]  ;;  %v4895_v34 = vld [vmem:[%s10434_s1 + $0x478] sm:$0xf0] }
 0x19d   :  { %3834 = vmatpush.bf16.msra.mxu3 %v4754_v61  ;;  %v5202_v61 = vor.u32 %v6716_v53, %v5199_v56  ;;  %v5330_v13 = vor.u32 %v6748_v57, %v5327_v58  ;;  %v6672_v36 = vld [vmem:[%s10434_s1 + $0x56c] sm:$0xf]  ;;  %v5023_v45 = vld [vmem:[%s10434_s1 + $0x578] sm:$0xf0]  ;;  %v4898_v51 = vor.u32 %v6640_v32, %v4895_v34 }
 0x19e   :  { %3796 = vmatpush.bf16.msra.mxu0 %v4354_v2  ;;  %v6712_v2 = vld [vmem:[%s10434_s1 + $0x6ac] sm:$0xf]  ;;  %v5026_v62 = vor.u32 %v6672_v36, %v5023_v45  ;;  %v4879_v53 = vld [vmem:[%s10434_s1 + $0x458] sm:$0xf0] }
 0x19f   :  { %3809 = vmatpush.bf16.msra.mxu1 %v4482_v5  ;;  %v5311_v5 = vld [vmem:[%s10434_s1 + $0x7b8] sm:$0xf0]  ;;  %v5186_v9 = vor.u32 %v6712_v2, %v5183_v3  ;;  %v6636_v52 = vld [vmem:[%s10434_s1 + $0x44c] sm:$0xf] }
 0x1a0   :  { %3822 = vmatpush.bf16.msra.mxu2 %v4610_v7  ;;  %v4930_v7 = vor.u32 %v6648_v6, %v4927_v63  ;;  %v6668_v56 = vld [vmem:[%s10434_s1 + $0x54c] sm:$0xf]  ;;  %v4863_v8 = vld [vmem:[%s10434_s1 + $0x438] sm:$0xf0] }
 0x1a1   :  { %3835 = vmatpush.bf16.msra.mxu3 %v4738_v11  ;;  %v6628_v15 = vld [vmem:[%s10434_s1 + $0x40c] sm:$0xf]  ;;  %v4847_v17 = vld [vmem:[%s10434_s1 + $0x418] sm:$0xf0] }
 0x1a2   :  { %3797 = vmatpush.bf16.msra.mxu0 %v4338_v27  ;;  %v3591_v24 = vpop.f32.mrf.mxu0  ;;  %v5170_v27 = vor.u32 %v6708_v37, %v5167_v14  ;;  %v5247_v37 = vld [vmem:[%s10434_s1 + $0x738] sm:$0xf0]  ;;  %v6692_v32 = vld [vmem:[%s10434_s1 + $0x60c] sm:$0xf] }
 0x1a3   :  { %3810 = vmatpush.bf16.msra.mxu1 %v4466_v39 }
 0x1a4   :  { %3823 = vmatpush.bf16.msra.mxu2 %v4594_v43  ;;  %v3604_v43 = vpop.f32.mrf.mxu1 }
 0x1a5   :  { %3836 = vmatpush.bf16.msra.mxu3 %v4722_v46  ;;  %3798 = vmatmul.bf16.vlgmr.msra.gmra.mxu0 %v7372_v19  ;;  %v6676_v19 = vld [vmem:[%s10434_s1 + $0x58c] sm:$0xf] }
 0x1a6   :  { %3842 = vmatpush.bf16.msrb.mxu0 %v4962_v47  ;;  %3811 = vmatmul.bf16.vlgmr.msra.gmra.mxu1 %v7376_v22  ;;  %v5314_v22 = vor.u32 %v6744_v4, %v5311_v5  ;;  %v5042_v26 = vor.u32 %v6676_v19, %v5039_v12  ;;  %v6704_v46 = vld [vmem:[%s10434_s1 + $0x66c] sm:$0xf]  ;;  %v5151_v47 = vld [vmem:[%s10434_s1 + $0x678] sm:$0xf0] }
 0x1a7   :  { %3855 = vmatpush.bf16.msrb.mxu1 %v5090_v48  ;;  %3824 = vmatmul.bf16.vlgmr.msra.gmra.mxu2 %v7370_v18  ;;  %v5058_v18 = vor.u32 %v6680_v0, %v5055_v1  ;;  %v6736_v48 = vld [vmem:[%s10434_s1 + $0x76c] sm:$0xf]  ;;  %v4882_v1 = vor.u32 %v6636_v52, %v4879_v53  ;;  %v4991_v19 = vld [vmem:[%s10434_s1 + $0x538] sm:$0xf0] }
 0x1a8   :  { %3868 = vmatpush.bf16.msrb.mxu2 %v5218_v49  ;;  %3837 = vmatmul.bf16.vlgmr.msra.gmra.mxu3 %v7374_v20  ;;  %v9792_v20 = vld [vmem:[%s10436_s2] sm:$0xf]  ;;  %v5279_v49 = vld [vmem:[%s10434_s1 + $0x778] sm:$0xf0]  ;;  %v6732_v0 = vld [vmem:[%s10434_s1 + $0x74c] sm:$0xf] }
 0x1a9   :  { %3881 = vmatpush.bf16.msrb.mxu3 %v5346_v55  ;;  %v544_v11 = vperm.slane %v9792_v20, 2  ;;  %v5154_v55 = vor.u32 %v6704_v46, %v5151_v47  ;;  %v5282_v58 = vor.u32 %v6736_v48, %v5279_v49  ;;  %v6728_v12 = vld [vmem:[%s10434_s1 + $0x72c] sm:$0xf]  ;;  %v5471_v47 = vld [vmem:[%s10434_s1 + $0x8f8] sm:$0xf0]  ;;  %v4850_v49 = vor.u32 %v6628_v15, %v4847_v17 }
 0x1aa   :  { %3843 = vmatpush.bf16.msrb.mxu0 %v4946_v59  ;;  %v3617_v57 = vpop.f32.mrf.mxu2  ;;  %v5007_v59 = vld [vmem:[%s10434_s1 + $0x558] sm:$0xf0]  ;;  %v3593_v3 = vpop.f32.mrf.mxu0  ;;  %v5250_v36 = vor.u32 %v6728_v12, %v5247_v37  ;;  %v6784_v46 = vld [vmem:[%s10434_s1 + $0x8ec] sm:$0xf] }
 0x1ab   :  { %3856 = vmatpush.bf16.msrb.mxu1 %v5074_v60  ;;  %v3592_v39 = vadd.f32 %v3591_v24, %v544_v11  ;;  %v6700_v60 = vld [vmem:[%s10434_s1 + $0x64c] sm:$0xf]  ;;  %v3630_v63 = vpop.f32.mrf.mxu3  ;;  %v5010_v4 = vor.u32 %v6668_v56, %v5007_v59  ;;  %v5855_v56 = vld [vmem:[%s10434_s1 + $0xbf8] sm:$0xf0] }
 0x1ac   :  { %3869 = vmatpush.bf16.msrb.mxu2 %v5202_v61  ;;  %v5135_v61 = vld [vmem:[%s10434_s1 + $0x658] sm:$0xf0]  ;;  %v6696_v11 = vld [vmem:[%s10434_s1 + $0x62c] sm:$0xf] }
 0x1ad   :  { %3882 = vmatpush.bf16.msrb.mxu3 %v5330_v13  ;;  %v3605_v50 = vadd.f32 %v3604_v43, %v3592_v39  ;;  %v5263_v13 = vld [vmem:[%s10434_s1 + $0x758] sm:$0xf0]  ;;  %v5138_v5 = vor.u32 %v6700_v60, %v5135_v61  ;;  %v6724_v43 = vld [vmem:[%s10434_s1 + $0x70c] sm:$0xf] }
 0x1ae   :  { %3844 = vmatpush.bf16.msrb.mxu0 %v4930_v7  ;;  %v6632_v7 = vld [vmem:[%s10434_s1 + $0x42c] sm:$0xf]  ;;  %v5266_v10 = vor.u32 %v6732_v0, %v5263_v13  ;;  %v5103_v39 = vld [vmem:[%s10434_s1 + $0x618] sm:$0xf0] }
 0x1af   :  { %3857 = vmatpush.bf16.msrb.mxu1 %v5058_v18  ;;  %v3618_v6 = vadd.f32 %v3617_v57, %v3605_v50  ;;  %v6664_v18 = vld [vmem:[%s10434_s1 + $0x52c] sm:$0xf]  ;;  %v4866_v14 = vor.u32 %v6632_v7, %v4863_v8  ;;  %v5599_v50 = vld [vmem:[%s10434_s1 + $0x9f8] sm:$0xf0]  ;;  %v5106_v52 = vor.u32 %v6692_v32, %v5103_v39 }
 0x1b0   :  { %3870 = vmatpush.bf16.msrb.mxu2 %v5186_v9  ;;  %v3606_v9 = vpop.f32.mrf.mxu1  ;;  %v6816_v48 = vld [vmem:[%s10434_s1 + $0x9ec] sm:$0xf]  ;;  %v5583_v13 = vld [vmem:[%s10434_s1 + $0x9d8] sm:$0xf0] }
 0x1b1   :  { %3883 = vmatpush.bf16.msrb.mxu3 %v5314_v22  ;;  %v9858_v2 = vadd.f32 %v3630_v63, %v3618_v6  ;;  %v5119_v22 = vld [vmem:[%s10434_s1 + $0x638] sm:$0xf0]  ;;  %v6880_v53 = vld [vmem:[%s10434_s1 + $0xbec] sm:$0xf]  ;;  %v5602_v59 = vor.u32 %v6816_v48, %v5599_v50 }
 0x1b2   :  { %3845 = vmatpush.bf16.msrb.mxu0 %v4914_v21  ;;  %v4994_v21 = vor.u32 %v6664_v18, %v4991_v19  ;;  %v5122_v24 = vor.u32 %v6696_v11, %v5119_v22  ;;  %v3619_v34 = vpop.f32.mrf.mxu2  ;;  %v6780_v61 = vld [vmem:[%s10434_s1 + $0x8cc] sm:$0xf]  ;;  %v5455_v6 = vld [vmem:[%s10434_s1 + $0x8d8] sm:$0xf0]  ;;  %v5858_v0 = vor.u32 %v6880_v53, %v5855_v56 }
 0x1b3   :  { %3858 = vmatpush.bf16.msrb.mxu1 %v5042_v26  ;;  %v6660_v26 = vld [vmem:[%s10434_s1 + $0x50c] sm:$0xf]  ;;  %v3632_v45 = vpop.f32.mrf.mxu3  ;;  %v5711_v3 = vld [vmem:[%s10434_s1 + $0xad8] sm:$0xf0]  ;;  %v5458_v7 = vor.u32 %v6780_v61, %v5455_v6 }
 0x1b4   :  { %3871 = vmatpush.bf16.msrb.mxu2 %v5170_v27  ;;  %v4975_v27 = vld [vmem:[%s10434_s1 + $0x518] sm:$0xf0]  ;;  %v6812_v63 = vld [vmem:[%s10434_s1 + $0x9cc] sm:$0xf] }
 0x1b5   :  { %3884 = vmatpush.bf16.msrb.mxu3 %v5298_v16  ;;  %v5231_v16 = vld [vmem:[%s10434_s1 + $0x718] sm:$0xf0]  ;;  %v5586_v8 = vor.u32 %v6812_v63, %v5583_v13  ;;  %v6776_v9 = vld [vmem:[%s10434_s1 + $0x8ac] sm:$0xf] }
 0x1b6   :  { %3846 = vmatpush.bf16.msrb.mxu0 %v4898_v51  ;;  %v6848_v51 = vld [vmem:[%s10434_s1 + $0xaec] sm:$0xf]  ;;  %v5234_v57 = vor.u32 %v6724_v43, %v5231_v16  ;;  %v5567_v22 = vld [vmem:[%s10434_s1 + $0x9b8] sm:$0xf0] }
 0x1b7   :  { %3859 = vmatpush.bf16.msrb.mxu1 %v5026_v62  ;;  %v5727_v62 = vld [vmem:[%s10434_s1 + $0xaf8] sm:$0xf0]  ;;  %v6808_v19 = vld [vmem:[%s10434_s1 + $0x9ac] sm:$0xf] }
 0x1b8   :  { %3872 = vmatpush.bf16.msrb.mxu2 %v5154_v55  ;;  %v4978_v55 = vor.u32 %v6660_v26, %v4975_v27  ;;  %v5730_v60 = vor.u32 %v6848_v51, %v5727_v62  ;;  %v6840_v12 = vld [vmem:[%s10434_s1 + $0xaac] sm:$0xf]  ;;  %v5695_v37 = vld [vmem:[%s10434_s1 + $0xab8] sm:$0xf0]  ;;  %v5570_v17 = vor.u32 %v6808_v19, %v5567_v22 }
 0x1b9   :  { %3885 = vmatpush.bf16.msrb.mxu3 %v5282_v58  ;;  %v5474_v58 = vor.u32 %v6784_v46, %v5471_v47  ;;  %v5423_v26 = vld [vmem:[%s10434_s1 + $0x898] sm:$0xf0]  ;;  %v6836_v27 = vld [vmem:[%s10434_s1 + $0xa8c] sm:$0xf] }
 0x1ba   :  { %3847 = vmatpush.bf16.msrb.mxu0 %v4882_v1  ;;  %v6844_v1 = vld [vmem:[%s10434_s1 + $0xacc] sm:$0xf]  ;;  %v5679_v32 = vld [vmem:[%s10434_s1 + $0xa98] sm:$0xf0] }
 0x1bb   :  { %3860 = vmatpush.bf16.msrb.mxu1 %v5010_v4  ;;  %v6876_v4 = vld [vmem:[%s10434_s1 + $0xbcc] sm:$0xf]  ;;  %v5714_v18 = vor.u32 %v6844_v1, %v5711_v3  ;;  %v5682_v45 = vor.u32 %v6836_v27, %v5679_v32  ;;  %v5407_v47 = vld [vmem:[%s10434_s1 + $0x878] sm:$0xf0] }
 0x1bc   :  { %3873 = vmatpush.bf16.msrb.mxu2 %v5138_v5  ;;  %v5839_v5 = vld [vmem:[%s10434_s1 + $0xbd8] sm:$0xf0]  ;;  %v6868_v34 = vld [vmem:[%s10434_s1 + $0xb8c] sm:$0xf] }
 0x1bd   :  { %3886 = vmatpush.bf16.msrb.mxu3 %v5266_v10  ;;  %v5439_v10 = vld [vmem:[%s10434_s1 + $0x8b8] sm:$0xf0]  ;;  %v5842_v11 = vor.u32 %v6876_v4, %v5839_v5  ;;  %v6768_v46 = vld [vmem:[%s10434_s1 + $0x86c] sm:$0xf] }
 0x1be   :  { %3848 = vmatpush.bf16.msrb.mxu0 %v4866_v14  ;;  %v6872_v14 = vld [vmem:[%s10434_s1 + $0xbac] sm:$0xf]  ;;  %v5442_v15 = vor.u32 %v6776_v9, %v5439_v10  ;;  %v5535_v51 = vld [vmem:[%s10434_s1 + $0x978] sm:$0xf0]  ;;  %v5410_v56 = vor.u32 %v6768_v46, %v5407_v47 }
 0x1bf   :  { %3861 = vmatpush.bf16.msrb.mxu1 %v4994_v21  ;;  %v5698_v21 = vor.u32 %v6840_v12, %v5695_v37  ;;  %v6800_v48 = vld [vmem:[%s10434_s1 + $0x96c] sm:$0xf]  ;;  %v5791_v53 = vld [vmem:[%s10434_s1 + $0xb78] sm:$0xf0] }
 0x1c0   :  { %3874 = vmatpush.bf16.msrb.mxu2 %v5122_v24  ;;  %v6772_v24 = vld [vmem:[%s10434_s1 + $0x88c] sm:$0xf]  ;;  %v5647_v1 = vld [vmem:[%s10434_s1 + $0xa58] sm:$0xf0] }
 0x1c1   :  { %3887 = vmatpush.bf16.msrb.mxu3 %v5250_v36  ;;  %v5807_v36 = vld [vmem:[%s10434_s1 + $0xb98] sm:$0xf0]  ;;  %v5426_v39 = vor.u32 %v6772_v24, %v5423_v26  ;;  %v6832_v62 = vld [vmem:[%s10434_s1 + $0xa6c] sm:$0xf] }
 0x1c2   :  { %3849 = vmatpush.bf16.msrb.mxu0 %v4850_v49  ;;  %v10008_v43 = vpop.f32.mrf.mxu0  ;;  %v5810_v50 = vor.u32 %v6868_v34, %v5807_v36  ;;  %v6796_v61 = vld [vmem:[%s10434_s1 + $0x94c] sm:$0xf]  ;;  %v5775_v5 = vld [vmem:[%s10434_s1 + $0xb58] sm:$0xf0] }
 0x1c3   :  { %3862 = vmatpush.bf16.msrb.mxu1 %v4978_v55  ;;  %v10019_v49 = vpop.f32.mrf.mxu1  ;;  %v5663_v55 = vld [vmem:[%s10434_s1 + $0xa78] sm:$0xf0]  ;;  %v6828_v13 = vld [vmem:[%s10434_s1 + $0xa4c] sm:$0xf] }
 0x1c4   :  { %3875 = vmatpush.bf16.msrb.mxu2 %v5106_v52  ;;  %v6864_v52 = vld [vmem:[%s10434_s1 + $0xb6c] sm:$0xf]  ;;  %v5650_v9 = vor.u32 %v6828_v13, %v5647_v1  ;;  %v5375_v19 = vld [vmem:[%s10434_s1 + $0x838] sm:$0xf0] }
 0x1c5   :  { %3888 = vmatpush.bf16.msrb.mxu3 %v5234_v57  ;;  %3850 = vmatmul.bf16.vlgmr.msrb.gmra.mxu0 %v7534_v41  ;;  %v6804_v41 = vld [vmem:[%s10434_s1 + $0x98c] sm:$0xf]  ;;  %v5538_v57 = vor.u32 %v6800_v48, %v5535_v51  ;;  %v5794_v63 = vor.u32 %v6864_v52, %v5791_v53  ;;  %v5503_v37 = vld [vmem:[%s10434_s1 + $0x938] sm:$0xf0] }
 0x1c6   :  { %3894 = vmatpush.bf16.msra.mxu0 %v5474_v58  ;;  %3863 = vmatmul.bf16.vlgmr.msrb.gmra.mxu1 %v7538_v44  ;;  %v5551_v44 = vld [vmem:[%s10434_s1 + $0x998] sm:$0xf0]  ;;  %v5666_v58 = vor.u32 %v6832_v62, %v5663_v55  ;;  %v6860_v4 = vld [vmem:[%s10434_s1 + $0xb4c] sm:$0xf] }
 0x1c7   :  { %3907 = vmatpush.bf16.msra.mxu1 %v5602_v59  ;;  %3876 = vmatmul.bf16.vlgmr.msrb.gmra.mxu2 %v7526_v38  ;;  %v5823_v38 = vld [vmem:[%s10434_s1 + $0xbb8] sm:$0xf0]  ;;  %v5554_v16 = vor.u32 %v6804_v41, %v5551_v44  ;;  %v6764_v59 = vld [vmem:[%s10434_s1 + $0x84c] sm:$0xf]  ;;  %v5778_v12 = vor.u32 %v6860_v4, %v5775_v5 }
 0x1c8   :  { %3920 = vmatpush.bf16.msra.mxu2 %v5730_v60  ;;  %3889 = vmatmul.bf16.vlgmr.msrb.gmra.mxu3 %v7536_v42  ;;  %v5826_v42 = vor.u32 %v6872_v14, %v5823_v38  ;;  %v5391_v60 = vld [vmem:[%s10434_s1 + $0x858] sm:$0xf0]  ;;  %v6760_v10 = vld [vmem:[%s10434_s1 + $0x82c] sm:$0xf] }
 0x1c9   :  { %3933 = vmatpush.bf16.msra.mxu3 %v5858_v0  ;;  %v5519_v0 = vld [vmem:[%s10434_s1 + $0x958] sm:$0xf0]  ;;  %v6824_v14 = vld [vmem:[%s10434_s1 + $0xa2c] sm:$0xf] }
 0x1ca   :  { %3895 = vmatpush.bf16.msra.mxu0 %v5458_v7  ;;  %v10045_v6 = vpop.f32.mrf.mxu2  ;;  %v5394_v7 = vor.u32 %v6764_v59, %v5391_v60  ;;  %v5631_v38 = vld [vmem:[%s10434_s1 + $0xa38] sm:$0xf0]  ;;  %v6756_v24 = vld [vmem:[%s10434_s1 + $0x80c] sm:$0xf] }
 0x1cb   :  { %3908 = vmatpush.bf16.msra.mxu1 %v5586_v8  ;;  %v10056_v3 = vpop.f32.mrf.mxu3  ;;  %v3645_v8 = vpop.f32.mrf.mxu0  ;;  %v5359_v26 = vld [vmem:[%s10434_s1 + $0x818] sm:$0xf0]  ;;  %v6788_v44 = vld [vmem:[%s10434_s1 + $0x90c] sm:$0xf] }
 0x1cc   :  { %3921 = vmatpush.bf16.msra.mxu2 %v5714_v18  ;;  %v5522_v18 = vor.u32 %v6796_v61, %v5519_v0  ;;  %v3658_v22 = vpop.f32.mrf.mxu1  ;;  %v5487_v27 = vld [vmem:[%s10434_s1 + $0x918] sm:$0xf0]  ;;  %v6820_v32 = vld [vmem:[%s10434_s1 + $0xa0c] sm:$0xf]  ;;  %v5362_v51 = vor.u32 %v6756_v24, %v5359_v26 }
 0x1cd   :  { %3934 = vmatpush.bf16.msra.mxu3 %v5842_v11  ;;  %v6792_v11 = vld [vmem:[%s10434_s1 + $0x92c] sm:$0xf]  ;;  %v5983_v48 = vld [vmem:[%s10434_s1 + $0xcf8] sm:$0xf0]  ;;  %v5490_v53 = vor.u32 %v6788_v44, %v5487_v27 }
 0x1ce   :  { %3896 = vmatpush.bf16.msra.mxu0 %v5442_v15  ;;  %v6856_v15 = vld [vmem:[%s10434_s1 + $0xb2c] sm:$0xf]  ;;  %v5506_v41 = vor.u32 %v6792_v11, %v5503_v37  ;;  %v6111_v62 = vld [vmem:[%s10434_s1 + $0xdf8] sm:$0xf0] }
 0x1cf   :  { %3909 = vmatpush.bf16.msra.mxu1 %v5570_v17  ;;  %v5759_v17 = vld [vmem:[%s10434_s1 + $0xb38] sm:$0xf0]  ;;  %v6912_v47 = vld [vmem:[%s10434_s1 + $0xcec] sm:$0xf] }
 0x1d0   :  { %3922 = vmatpush.bf16.msra.mxu2 %v5698_v21  ;;  %v5378_v21 = vor.u32 %v6760_v10, %v5375_v19  ;;  %v5762_v36 = vor.u32 %v6856_v15, %v5759_v17  ;;  %v6976_v55 = vld [vmem:[%s10434_s1 + $0xeec] sm:$0xf]  ;;  %v6239_v52 = vld [vmem:[%s10434_s1 + $0xef8] sm:$0xf0]  ;;  %v5986_v60 = vor.u32 %v6912_v47, %v5983_v48 }
 0x1d1   :  { %3935 = vmatpush.bf16.msra.mxu3 %v5826_v42  ;;  %v5634_v42 = vor.u32 %v6824_v14, %v5631_v38  ;;  %v6908_v0 = vld [vmem:[%s10434_s1 + $0xccc] sm:$0xf]  ;;  %v5967_v13 = vld [vmem:[%s10434_s1 + $0xcd8] sm:$0xf0] }
 0x1d2   :  { %3897 = vmatpush.bf16.msra.mxu0 %v5426_v39  ;;  %v3671_v34 = vpop.f32.mrf.mxu2  ;;  %v5615_v39 = vld [vmem:[%s10434_s1 + $0xa18] sm:$0xf0]  ;;  %v6940_v1 = vld [vmem:[%s10434_s1 + $0xdcc] sm:$0xf]  ;;  %v5970_v10 = vor.u32 %v6908_v0, %v5967_v13 }
 0x1d3   :  { %3910 = vmatpush.bf16.msra.mxu1 %v5554_v16  ;;  %v6852_v16 = vld [vmem:[%s10434_s1 + $0xb0c] sm:$0xf]  ;;  %v3684_v46 = vpop.f32.mrf.mxu3  ;;  %v6095_v5 = vld [vmem:[%s10434_s1 + $0xdd8] sm:$0xf0] }
 0x1d4   :  { %3923 = vmatpush.bf16.msra.mxu2 %v5682_v45  ;;  %v5743_v45 = vld [vmem:[%s10434_s1 + $0xb18] sm:$0xf0]  ;;  %v6098_v19 = vor.u32 %v6940_v1, %v6095_v5  ;;  %v6904_v22 = vld [vmem:[%s10434_s1 + $0xcac] sm:$0xf] }
 0x1d5   :  { %3936 = vmatpush.bf16.msra.mxu3 %v5810_v50  ;;  %v6944_v50 = vld [vmem:[%s10434_s1 + $0xdec] sm:$0xf]  ;;  %v5746_v59 = vor.u32 %v6852_v16, %v5743_v45  ;;  %v6223_v8 = vld [vmem:[%s10434_s1 + $0xed8] sm:$0xf0] }
 0x1d6   :  { %3898 = vmatpush.bf16.msra.mxu0 %v5410_v56  ;;  %v5618_v56 = vor.u32 %v6820_v32, %v5615_v39  ;;  %v6114_v61 = vor.u32 %v6944_v50, %v6111_v62  ;;  %v6936_v37 = vld [vmem:[%s10434_s1 + $0xdac] sm:$0xf]  ;;  %v6079_v38 = vld [vmem:[%s10434_s1 + $0xdb8] sm:$0xf0] }
 0x1d7   :  { %3911 = vmatpush.bf16.msra.mxu1 %v5538_v57  ;;  %v7008_v57 = vld [vmem:[%s10434_s1 + $0xfec] sm:$0xf]  ;;  %v6207_v17 = vld [vmem:[%s10434_s1 + $0xeb8] sm:$0xf0]  ;;  %v6082_v26 = vor.u32 %v6936_v37, %v6079_v38 }
 0x1d8   :  { %3924 = vmatpush.bf16.msra.mxu2 %v5666_v58  ;;  %v6367_v58 = vld [vmem:[%s10434_s1 + $0xff8] sm:$0xf0]  ;;  %v6968_v15 = vld [vmem:[%s10434_s1 + $0xeac] sm:$0xf] }
 0x1d9   :  { %3937 = vmatpush.bf16.msra.mxu3 %v5794_v63  ;;  %v6242_v63 = vor.u32 %v6976_v55, %v6239_v52  ;;  %v6370_v4 = vor.u32 %v7008_v57, %v6367_v58  ;;  %v6063_v44 = vld [vmem:[%s10434_s1 + $0xd98] sm:$0xf0]  ;;  %v6964_v27 = vld [vmem:[%s10434_s1 + $0xe8c] sm:$0xf] }
 0x1da   :  { %3899 = vmatpush.bf16.msra.mxu0 %v5394_v7  ;;  %v6972_v7 = vld [vmem:[%s10434_s1 + $0xecc] sm:$0xf]  ;;  %v6191_v32 = vld [vmem:[%s10434_s1 + $0xe98] sm:$0xf0] }
 0x1db   :  { %3912 = vmatpush.bf16.msra.mxu1 %v5522_v18  ;;  %v7004_v18 = vld [vmem:[%s10434_s1 + $0xfcc] sm:$0xf]  ;;  %v6226_v11 = vor.u32 %v6972_v7, %v6223_v8  ;;  %v6319_v39 = vld [vmem:[%s10434_s1 + $0xf98] sm:$0xf0]  ;;  %v6194_v47 = vor.u32 %v6964_v27, %v6191_v32 }
 0x1dc   :  { %3925 = vmatpush.bf16.msra.mxu2 %v5650_v9  ;;  %v6351_v9 = vld [vmem:[%s10434_s1 + $0xfd8] sm:$0xf0]  ;;  %v6896_v48 = vld [vmem:[%s10434_s1 + $0xc6c] sm:$0xf] }
 0x1dd   :  { %3938 = vmatpush.bf16.msra.mxu3 %v5778_v12  ;;  %v5951_v12 = vld [vmem:[%s10434_s1 + $0xcb8] sm:$0xf0]  ;;  %v6354_v14 = vor.u32 %v7004_v18, %v6351_v9  ;;  %v6960_v52 = vld [vmem:[%s10434_s1 + $0xe6c] sm:$0xf] }
 0x1de   :  { %3900 = vmatpush.bf16.msra.mxu0 %v5378_v21  ;;  %v6335_v21 = vld [vmem:[%s10434_s1 + $0xfb8] sm:$0xf0]  ;;  %v5954_v24 = vor.u32 %v6904_v22, %v5951_v12  ;;  %v6924_v0 = vld [vmem:[%s10434_s1 + $0xd4c] sm:$0xf] }
 0x1df   :  { %3913 = vmatpush.bf16.msra.mxu1 %v5506_v41  ;;  %v6210_v41 = vor.u32 %v6968_v15, %v6207_v17  ;;  %v5919_v50 = vld [vmem:[%s10434_s1 + $0xc78] sm:$0xf0]  ;;  %v6956_v5 = vld [vmem:[%s10434_s1 + $0xe4c] sm:$0xf] }
 0x1e0   :  { %3926 = vmatpush.bf16.msra.mxu2 %v5634_v42  ;;  %v6932_v42 = vld [vmem:[%s10434_s1 + $0xd8c] sm:$0xf]  ;;  %v6047_v55 = vld [vmem:[%s10434_s1 + $0xd78] sm:$0xf0]  ;;  %v5922_v58 = vor.u32 %v6896_v48, %v5919_v50 }
 0x1e1   :  { %3939 = vmatpush.bf16.msra.mxu3 %v5762_v36  ;;  %v6996_v36 = vld [vmem:[%s10434_s1 + $0xf8c] sm:$0xf]  ;;  %v6066_v46 = vor.u32 %v6932_v42, %v6063_v44  ;;  %v6303_v57 = vld [vmem:[%s10434_s1 + $0xf78] sm:$0xf0] }
 0x1e2   :  { %3901 = vmatpush.bf16.msra.mxu0 %v5362_v51  ;;  %v10206_v34 = vpop.f32.mrf.mxu0  ;;  %v6928_v51 = vld [vmem:[%s10434_s1 + $0xd6c] sm:$0xf]  ;;  %v6322_v62 = vor.u32 %v6996_v36, %v6319_v39  ;;  %v6159_v7 = vld [vmem:[%s10434_s1 + $0xe58] sm:$0xf0] }
 0x1e3   :  { %3914 = vmatpush.bf16.msra.mxu1 %v5490_v53  ;;  %v10214_v45 = vpop.f32.mrf.mxu1  ;;  %v6175_v53 = vld [vmem:[%s10434_s1 + $0xe78] sm:$0xf0]  ;;  %v6988_v18 = vld [vmem:[%s10434_s1 + $0xf4c] sm:$0xf]  ;;  %v6162_v37 = vor.u32 %v6956_v5, %v6159_v7 }
 0x1e4   :  { %3927 = vmatpush.bf16.msra.mxu2 %v5618_v56  ;;  %v6992_v56 = vld [vmem:[%s10434_s1 + $0xf6c] sm:$0xf]  ;;  %v6287_v9 = vld [vmem:[%s10434_s1 + $0xf58] sm:$0xf0] }
 0x1e5   :  { %3940 = vmatpush.bf16.msra.mxu3 %v5746_v59  ;;  %3902 = vmatmul.bf16.vlgmr.msra.gmra.mxu0 %v7727_v25  ;;  %v7000_v25 = vld [vmem:[%s10434_s1 + $0xfac] sm:$0xf]  ;;  %v6050_v59 = vor.u32 %v6928_v51, %v6047_v55  ;;  %v6306_v13 = vor.u32 %v6992_v56, %v6303_v57  ;;  %v5887_v38 = vld [vmem:[%s10434_s1 + $0xc38] sm:$0xf0] }
 0x1e6   :  { %3946 = vmatpush.bf16.msrb.mxu0 %v5986_v60  ;;  %3915 = vmatmul.bf16.vlgmr.msra.gmra.mxu1 %v7740_v30  ;;  %v5935_v30 = vld [vmem:[%s10434_s1 + $0xc98] sm:$0xf0]  ;;  %v6178_v60 = vor.u32 %v6960_v52, %v6175_v53  ;;  %v6920_v15 = vld [vmem:[%s10434_s1 + $0xd2c] sm:$0xf] }
 0x1e7   :  { %3959 = vmatpush.bf16.msrb.mxu1 %v6114_v61  ;;  %3928 = vmatmul.bf16.vlgmr.msra.gmra.mxu2 %v7738_v29  ;;  %v6900_v29 = vld [vmem:[%s10434_s1 + $0xc8c] sm:$0xf]  ;;  %v5999_v27 = vld [vmem:[%s10434_s1 + $0xd18] sm:$0xf0] }
 0x1e8   :  { %3972 = vmatpush.bf16.msrb.mxu2 %v6242_v63  ;;  %3941 = vmatmul.bf16.vlgmr.msra.gmra.mxu3 %v7748_v33  ;;  %v6338_v33 = vor.u32 %v7000_v25, %v6335_v21  ;;  %v5938_v16 = vor.u32 %v6900_v29, %v5935_v30  ;;  %v6892_v61 = vld [vmem:[%s10434_s1 + $0xc4c] sm:$0xf]  ;;  %v5903_v63 = vld [vmem:[%s10434_s1 + $0xc58] sm:$0xf0] }
 0x1e9   :  { %3985 = vmatpush.bf16.msrb.mxu3 %v6370_v4  ;;  %v6031_v4 = vld [vmem:[%s10434_s1 + $0xd58] sm:$0xf0]  ;;  %v6952_v17 = vld [vmem:[%s10434_s1 + $0xe2c] sm:$0xf] }
 0x1ea   :  { %3947 = vmatpush.bf16.msrb.mxu0 %v5970_v10  ;;  %v10249_v1 = vpop.f32.mrf.mxu2  ;;  %v3697_v10 = vpop.f32.mrf.mxu0  ;;  %v6034_v12 = vor.u32 %v6924_v0, %v6031_v4  ;;  %v6143_v25 = vld [vmem:[%s10434_s1 + $0xe38] sm:$0xf0]  ;;  %v6984_v21 = vld [vmem:[%s10434_s1 + $0xf2c] sm:$0xf]  ;;  %v7031_v0 = vld [vmem:[%s10437_s3 + $0xa0] sm:$0xff] }
 0x1eb   :  { %3960 = vmatpush.bf16.msrb.mxu1 %v6098_v19  ;;  %v10260_v8 = vpop.f32.mrf.mxu3  ;;  %v3644_v19 = vadd.f32 %v10008_v43, %v9858_v2  ;;  %v3710_v22 = vpop.f32.mrf.mxu1  ;;  %v6290_v2 = vor.u32 %v6988_v18, %v6287_v9  ;;  %v6015_v43 = vld [vmem:[%s10434_s1 + $0xd38] sm:$0xf0]  ;;  %v6146_v30 = vor.u32 %v6952_v17, %v6143_v25  ;;  %v6884_v42 = vld [vmem:[%s10434_s1 + $0xc0c] sm:$0xf]  ;;  %v7011_v25 = vld [vmem:[%s10437_s3] sm:$0xff] }
 0x1ec   :  { %3973 = vmatpush.bf16.msrb.mxu2 %v6226_v11  ;;  %v5906_v11 = vor.u32 %v6892_v61, %v5903_v63  ;;  %v6018_v29 = vor.u32 %v6920_v15, %v6015_v43  ;;  %v6916_v44 = vld [vmem:[%s10434_s1 + $0xd0c] sm:$0xf]  ;;  %v6127_v36 = vld [vmem:[%s10434_s1 + $0xe18] sm:$0xf0]  ;;  %v7023_v63 = vld [vmem:[%s10437_s3 + $0x60] sm:$0xff] }
 0x1ed   :  { %3986 = vmatpush.bf16.msrb.mxu3 %v6354_v14  ;;  %v6888_v14 = vld [vmem:[%s10434_s1 + $0xc2c] sm:$0xf]  ;;  %v6002_v51 = vor.u32 %v6916_v44, %v5999_v27  ;;  %v7018_v52 = vld [vmem:[%s10437_s3 + $0x38] sm:$0xff]  ;;  %v7021_v22 = vld [vmem:[%s10437_s3 + $0x50] sm:$0xff] }
 0x1ee   :  { %3948 = vmatpush.bf16.msrb.mxu0 %v5954_v24  ;;  %v6271_v24 = vld [vmem:[%s10434_s1 + $0xf38] sm:$0xf0]  ;;  %v6948_v32 = vld [vmem:[%s10434_s1 + $0xe0c] sm:$0xf] }
 0x1ef   :  { %3961 = vmatpush.bf16.msrb.mxu1 %v6082_v26  ;;  %v3657_v26 = vadd.f32 %v10019_v49, %v3644_v19  ;;  %v6274_v49 = vor.u32 %v6984_v21, %v6271_v24  ;;  %v7026_v53 = vld [vmem:[%s10437_s3 + $0x78] sm:$0xff]  ;;  %v7024_v61 = vld [vmem:[%s10437_s3 + $0x68] sm:$0xff]  ;;  %v7013_v19 = vld [vmem:[%s10437_s3 + $0x10] sm:$0xff]  ;;  %v3998_v21 = vmax.f32 %v8856_v40, 0.0  ;;  %v545_v40 = vperm.slane %v9792_v20, 3 }
 0x1f0   :  { %3974 = vmatpush.bf16.msrb.mxu2 %v6210_v41  ;;  %v5890_v41 = vor.u32 %v6888_v14, %v5887_v38  ;;  %v7014_v4 = vld [vmem:[%s10437_s3 + $0x18] sm:$0xff]  ;;  %v7012_v14 = vld [vmem:[%s10437_s3 + $0x8] sm:$0xff]  ;;  %v7019_v24 = vld [vmem:[%s10437_s3 + $0x40] sm:$0xff] }
 0x1f1   :  { %3987 = vmatpush.bf16.msrb.mxu3 %v6338_v33  ;;  %v5871_v33 = vld [vmem:[%s10434_s1 + $0xc18] sm:$0xf0]  ;;  %v3670_v48 = vadd.f32 %v10045_v6, %v3657_v26  ;;  %v7020_v38 = vld [vmem:[%s10437_s3 + $0x48] sm:$0xff]  ;;  %v7027_v26 = vld [vmem:[%s10437_s3 + $0x80] sm:$0xff] }
 0x1f2   :  { %3949 = vmatpush.bf16.msrb.mxu0 %v5938_v16  ;;  %v3723_v39 = vpop.f32.mrf.mxu2  ;;  %v6980_v16 = vld [vmem:[%s10434_s1 + $0xf0c] sm:$0xf]  ;;  %v5874_v50 = vor.u32 %v6884_v42, %v5871_v33  ;;  %v7034_v6 = vld [vmem:[%s10437_s3 + $0xb8] sm:$0xff] }
 0x1f3   :  { %3962 = vmatpush.bf16.msrb.mxu1 %v6066_v46  ;;  %v6255_v46 = vld [vmem:[%s10434_s1 + $0xf18] sm:$0xf0]  ;;  %v3683_v56 = vadd.f32 %v10056_v3, %v3670_v48  ;;  %v7033_v3 = vld [vmem:[%s10437_s3 + $0xb0] sm:$0xff]  ;;  %v7028_v15 = vld [vmem:[%s10437_s3 + $0x88] sm:$0xff] }
 0x1f4   :  { %3975 = vmatpush.bf16.msrb.mxu2 %v6194_v47  ;;  %v3736_v47 = vpop.f32.mrf.mxu3  ;;  %v6258_v55 = vor.u32 %v6980_v16, %v6255_v46  ;;  %v7022_v5 = vld [vmem:[%s10437_s3 + $0x58] sm:$0xff] }
 0x1f5   :  { %3988 = vmatpush.bf16.msrb.mxu3 %v6322_v62  ;;  %v6130_v62 = vor.u32 %v6948_v32, %v6127_v36  ;;  %v3696_v57 = vadd.f32 %v10206_v34, %v3683_v56  ;;  %v7030_v7 = vld [vmem:[%s10437_s3 + $0x98] sm:$0xff]  ;;  %v7041_v56 = vld [vmem:[%s10437_s3 + $0xf0] sm:$0xff] }
 0x1f6   :  { %3950 = vmatpush.bf16.msrb.mxu0 %v5922_v58  ;;  %v7017_v58 = vld [vmem:[%s10437_s3 + $0x30] sm:$0xff]  ;;  %v7042_v20 = vld [vmem:[%s10437_s3 + $0xf8] sm:$0xff] }
 0x1f7   :  { %3963 = vmatpush.bf16.msrb.mxu1 %v6050_v59  ;;  %v7025_v59 = vld [vmem:[%s10437_s3 + $0x70] sm:$0xff]  ;;  %v3709_v34 = vadd.f32 %v10214_v45, %v3696_v57 }
 0x1f8   :  { %3976 = vmatpush.bf16.msrb.mxu2 %v6178_v60  ;;  %v7016_v60 = vld [vmem:[%s10437_s3 + $0x28] sm:$0xff] }
 0x1f9   :  { %3989 = vmatpush.bf16.msrb.mxu3 %v6306_v13 }
 0x1fa   :  { %3951 = vmatpush.bf16.msrb.mxu0 %v5906_v11 }
 0x1fb   :  { %3964 = vmatpush.bf16.msrb.mxu1 %v6034_v12  ;;  %v7029_v12 = vld [vmem:[%s10437_s3 + $0x90] sm:$0xff] }
 0x1fc   :  { %3977 = vmatpush.bf16.msrb.mxu2 %v6162_v37 }
 0x1fd   :  { %3990 = vmatpush.bf16.msrb.mxu3 %v6290_v2 }
 0x1fe   :  { %3952 = vmatpush.bf16.msrb.mxu0 %v5890_v41  ;;  %v3999_v41 = vmax.f32 %v9654_v54, 0.0 }
 0x1ff   :  { %3965 = vmatpush.bf16.msrb.mxu1 %v6018_v29 }
 0x200   :  { %3978 = vmatpush.bf16.msrb.mxu2 %v6146_v30  ;;  %v4002_v30 = vpack.c.bf16 %v3998_v21, %v3998_v21  ;;  %v4003_v42 = vpack.c.bf16 %v3999_v41, %v3999_v41  ;;  %v7043_v41 = vld [vmem:[%s10438_s4] ss:$0 sm:$0xff] }
 0x201   :  { %3991 = vmatpush.bf16.msrb.mxu3 %v6274_v49 }
 0x202   :  { %3953 = vmatpush.bf16.msrb.mxu0 %v5874_v50 }
 0x203   :  { %3966 = vmatpush.bf16.msrb.mxu1 %v6002_v51  ;;  %v3760_v45 = vpop.f32.mrf.mxu1 }
 0x204   :  { %3979 = vmatpush.bf16.msrb.mxu2 %v6130_v62 }
 0x205   :  { %3992 = vmatpush.bf16.msrb.mxu3 %v6258_v55  ;;  %3954 = vmatmul.bf16.vlgmr.msrb.gmra.mxu0 %v7937_v23  ;;  %v7032_v23 = vld [vmem:[%s10437_s3 + $0xa8] sm:$0xff] }
 0x206   :  { %4266 = vmatpush.bf16.msra.mxu0 %v7018_v52  ;;  %3967 = vmatmul.bf16.vlgmr.msrb.gmra.mxu1 %v7950_v31  ;;  %v3747_v31 = vpop.f32.mrf.mxu0 }
 0x207   :  { %4279 = vmatpush.bf16.msra.mxu1 %v7026_v53  ;;  %3980 = vmatmul.bf16.vlgmr.msrb.gmra.mxu2 %v7948_v28  ;;  %v3722_v28 = vadd.f32 %v10249_v1, %v3709_v34  ;;  %v7038_v34 = vld [vmem:[%s10437_s3 + $0xd8] sm:$0xff] }
 0x208   :  { %4292 = vmatpush.bf16.msra.mxu2 %v7034_v6  ;;  %3993 = vmatmul.bf16.vlgmr.msrb.gmra.mxu3 %v7958_v35  ;;  %v7015_v35 = vld [vmem:[%s10437_s3 + $0x20] sm:$0xff] }
 0x209   :  { %v3735_v13 = vadd.f32 %v10260_v8, %v3722_v28  ;;  %4305 = vmatpush.bf16.msra.mxu3 %v7042_v20  ;;  %v7036_v28 = vld [vmem:[%s10437_s3 + $0xc8] sm:$0xff] }
 0x20a   :  { %4267 = vmatpush.bf16.msra.mxu0 %v7017_v58  ;;  %v3773_v18 = vpop.f32.mrf.mxu2  ;;  %v7040_v58 = vld [vmem:[%s10437_s3 + $0xe8] sm:$0xff] }
 0x20b   :  { %4280 = vmatpush.bf16.msra.mxu1 %v7025_v59  ;;  %v3748_v1 = vadd.f32 %v3747_v31, %v3735_v13  ;;  %v3786_v9 = vpop.f32.mrf.mxu3  ;;  %v3762_v11 = vpop.f32.mrf.mxu1  ;;  %v7035_v13 = vld [vmem:[%s10437_s3 + $0xc0] sm:$0xff] }
 0x20c   :  { %4293 = vmatpush.bf16.msra.mxu2 %v7033_v3  ;;  %v7039_v3 = vld [vmem:[%s10437_s3 + $0xe0] sm:$0xff] }
 0x20d   :  { %v3761_v8 = vadd.f32 %v3760_v45, %v3748_v1  ;;  %4306 = vmatpush.bf16.msra.mxu3 %v7041_v56 }
 0x20e   :  { %4268 = vmatpush.bf16.msra.mxu0 %v7016_v60  ;;  %v3749_v10 = vpop.f32.mrf.mxu0 }
 0x20f   :  { %4281 = vmatpush.bf16.msra.mxu1 %v7024_v61  ;;  %v3774_v37 = vadd.f32 %v3773_v18, %v3761_v8 }
 0x210   :  { %4294 = vmatpush.bf16.msra.mxu2 %v7032_v23  ;;  %v7037_v23 = vld [vmem:[%s10437_s3 + $0xd0] sm:$0xff] }
 0x211   :  { %v3787_v2 = vadd.f32 %v3786_v9, %v3774_v37  ;;  %4307 = vmatpush.bf16.msra.mxu3 %v7040_v58 }
 0x212   :  { %4269 = vmatpush.bf16.msra.mxu0 %v7015_v35  ;;  %v3775_v43 = vpop.f32.mrf.mxu2 }
 0x213   :  { %4282 = vmatpush.bf16.msra.mxu1 %v7023_v63  ;;  %v3788_v17 = vpop.f32.mrf.mxu3  ;;  %v4000_v29 = vmax.f32 %v3787_v2, 0.0 }
 0x214   :  { %4295 = vmatpush.bf16.msra.mxu2 %v7031_v0 }
 0x215   :  { %v4004_v33 = vpack.c.bf16 %v4000_v29, %v4000_v29  ;;  %4308 = vmatpush.bf16.msra.mxu3 %v7039_v3 }
 0x216   :  { %4270 = vmatpush.bf16.msra.mxu0 %v7014_v4 }
 0x217   :  { %4283 = vmatpush.bf16.msra.mxu1 %v7022_v5 }
 0x218   :  { %4296 = vmatpush.bf16.msra.mxu2 %v7030_v7 }
 0x219   :  { %4309 = vmatpush.bf16.msra.mxu3 %v7038_v34 }
 0x21a   :  { %4271 = vmatpush.bf16.msra.mxu0 %v7013_v19 }
 0x21b   :  { %4284 = vmatpush.bf16.msra.mxu1 %v7021_v22 }
 0x21c   :  { %4297 = vmatpush.bf16.msra.mxu2 %v7029_v12 }
 0x21d   :  { %4310 = vmatpush.bf16.msra.mxu3 %v7037_v23 }
 0x21e   :  { %4272 = vmatpush.bf16.msra.mxu0 %v7012_v14 }
 0x21f   :  { %4285 = vmatpush.bf16.msra.mxu1 %v7020_v38 }
 0x220   :  { %4298 = vmatpush.bf16.msra.mxu2 %v7028_v15 }
 0x221   :  { %4311 = vmatpush.bf16.msra.mxu3 %v7036_v28 }
 0x222   :  { %4273 = vmatpush.bf16.msra.mxu0 %v7011_v25  ;;  %v3799_v44 = vpop.f32.mrf.mxu0 }
 0x223   :  { %4286 = vmatpush.bf16.msra.mxu1 %v7019_v24  ;;  %v3800_v49 = vadd.f32 %v3799_v44, %v545_v40  ;;  %v3812_v27 = vpop.f32.mrf.mxu1 }
 0x224   :  { %4299 = vmatpush.bf16.msra.mxu2 %v7027_v26 }
 0x225   :  { %4274 = vmatmul.bf16.vlgmr.msra.gmra.mxu0 %v4002_v30  ;;  %v3813_v32 = vadd.f32 %v3812_v27, %v3800_v49  ;;  %4312 = vmatpush.bf16.msra.mxu3 %v7035_v13 }
 0x226   :  { %4287 = vmatmul.bf16.vlgmr.msra.gmra.mxu1 %v4003_v42 }
 0x227   :  { %4300 = vmatmul.bf16.vlgmr.msra.gmra.mxu2 %v4004_v33 }
 0x22a   :  { %v3825_v36 = vpop.f32.mrf.mxu2  ;;  %v3801_v46 = vpop.f32.mrf.mxu0 }
 0x22b   :  { %v3826_v39 = vadd.f32 %v3825_v36, %v3813_v32  ;;  %v3838_v16 = vpop.f32.mrf.mxu3  ;;  %v3814_v47 = vpop.f32.mrf.mxu1 }
 0x22d   :  { %v3839_v54 = vadd.f32 %v3838_v16, %v3826_v39 }
 0x232   :  { %v3827_v48 = vpop.f32.mrf.mxu2 }
 0x233   :  { %v3840_v50 = vpop.f32.mrf.mxu3 }
 0x242   :  { %v3851_v51 = vpop.f32.mrf.mxu0 }
 0x243   :  { %v3864_v62 = vpop.f32.mrf.mxu1  ;;  %v3852_v31 = vadd.f32 %v3851_v51, %v3839_v54 }
 0x245   :  { %v3865_v1 = vadd.f32 %v3864_v62, %v3852_v31 }
 0x24a   :  { %v3877_v55 = vpop.f32.mrf.mxu2  ;;  %v3853_v53 = vpop.f32.mrf.mxu0 }
 0x24b   :  { %v3890_v52 = vpop.f32.mrf.mxu3  ;;  %v3866_v6 = vpop.f32.mrf.mxu1  ;;  %v3878_v4 = vadd.f32 %v3877_v55, %v3865_v1 }
 0x24d   :  { %v3891_v18 = vadd.f32 %v3890_v52, %v3878_v4 }
 0x252   :  { %v3879_v57 = vpop.f32.mrf.mxu2 }
 0x253   :  { %v3892_v59 = vpop.f32.mrf.mxu3 }
 0x262   :  { %v3903_v60 = vpop.f32.mrf.mxu0 }
 0x263   :  { %v3916_v61 = vpop.f32.mrf.mxu1  ;;  %v3904_v9 = vadd.f32 %v3903_v60, %v3891_v18 }
 0x265   :  { %v3917_v10 = vadd.f32 %v3916_v61, %v3904_v9 }
 0x26a   :  { %v3929_v35 = vpop.f32.mrf.mxu2  ;;  %v3905_v63 = vpop.f32.mrf.mxu0 }
 0x26b   :  { %v3942_v45 = vpop.f32.mrf.mxu3  ;;  %v3918_v0 = vpop.f32.mrf.mxu1  ;;  %v3930_v8 = vadd.f32 %v3929_v35, %v3917_v10 }
 0x26d   :  { %v3943_v19 = vadd.f32 %v3942_v45, %v3930_v8 }
 0x272   :  { %v3931_v5 = vpop.f32.mrf.mxu2 }
 0x273   :  { %v3944_v7 = vpop.f32.mrf.mxu3 }
 0x282   :  { %v3955_v11 = vpop.f32.mrf.mxu0 }
 0x283   :  { %v3968_v22 = vpop.f32.mrf.mxu1  ;;  %v3956_v12 = vadd.f32 %v3955_v11, %v3943_v19 }
 0x285   :  { %v3969_v37 = vadd.f32 %v3968_v22, %v3956_v12 }
 0x28a   :  { %v3981_v14 = vpop.f32.mrf.mxu2  ;;  %v3957_v2 = vpop.f32.mrf.mxu0 }
 0x28b   :  { %v3994_v38 = vpop.f32.mrf.mxu3  ;;  %v3982_v15 = vadd.f32 %v3981_v14, %v3969_v37  ;;  %v3970_v43 = vpop.f32.mrf.mxu1 }
 0x28d   :  { %v3995_v17 = vadd.f32 %v3994_v38, %v3982_v15 }
 0x28f   :  { %v4001_v25 = vmax.f32 %v3995_v17, 0.0 }
 0x291   :  { %v4005_v21 = vpack.c.bf16 %v4001_v25, %v4001_v25 }
 0x292   :  { %v3983_v24 = vpop.f32.mrf.mxu2 }
 0x293   :  { %v3996_v26 = vpop.f32.mrf.mxu3  ;;  %4313 = vmatmul.bf16.vlgmr.msra.gmra.mxu3 %v4005_v21 }
 0x2a2   :  { %v4275_v29 = vpop.f32.mrf.mxu0 }
 0x2a3   :  { %v4276_v30 = vadd.f32 %v7043_v41, %v4275_v29  ;;  %v4288_v42 = vpop.f32.mrf.mxu1 }
 0x2a5   :  { %v4289_v33 = vadd.f32 %v4288_v42, %v4276_v30 }
 0x2aa   :  { %v4301_v40 = vpop.f32.mrf.mxu2  ;;  %v4277_v49 = vpop.f32.mrf.mxu0 }
 0x2ab   :  { %v4302_v44 = vadd.f32 %v4301_v40, %v4289_v33  ;;  %v4290_v27 = vpop.f32.mrf.mxu1 }
 0x2b2   :  { %v4303_v32 = vpop.f32.mrf.mxu2 }
 0x316   :  { %v4314_v36 = vpop.f32.mrf.mxu3 }
 0x317   :  { %v4315_v39 = vadd.f32 %v4314_v36, %v4302_v44 }
 0x319   :  { %4318 = vst [vmem:[%s10439_s5] sm:$0xff] %v4315_v39 }
 0x31e   :  { %v4316_v16 = vpop.f32.mrf.mxu3 }

</bundles_post_ra>
